<compile_context>
chip_gen: v6e
topology: v6e:2x2x1
jax: 0.10.0
libtpu: 0.0.40
codegen_flags: <defaults>
</compile_context>

<pallas_src>
import math
import numpy as np

import jax
import jax.numpy as jnp
from jax.experimental import pallas as pl
from jax.experimental.pallas import tpu as pltpu

# ---------------------------------------------------------------------------
# Config (stands in for the PyTorch `args`)
# ---------------------------------------------------------------------------
IMAGE_SIZE = 16
TEX_INPUT_TENSOR_SIZE = 4
TEX_NUM_CHANNELS = 8
TEX_MAX_CHANNELS = 32
TEXTURE_OUTPUT_DIM = 3
EPS = 1e-5           # PyTorch BatchNorm2d default eps
BATCH_TILE = 4       # batch elements stacked along the lane axis per grid step


# ---------------------------------------------------------------------------
# Host-side constant builders (batched upsample operator & conv boundary masks)
# ---------------------------------------------------------------------------
def _pad_lanes(n):
    """Round the flattened (batched) spatial length up to a multiple of 128 (min 128)."""
    return max(128, ((n + 127) // 128) * 128)


def _upsample_matrix(h_in, w_in, b_tile, l_in, h_out, w_out, l_out):
    """Block-diagonal (l_in, l_out) 0/1 nearest-2x-upsample operator for the batched
    lane layout [elem0 pixels | elem1 pixels | ... | lane padding].  Rows/cols for
    padding lanes are zero, so lane-padding garbage never propagates.  0/1 is exact
    in bf16 (MXU-native operand)."""
    u = np.zeros((l_in, l_out), np.float32)
    p_in, p_out = h_in * w_in, h_out * w_out
    for b in range(b_tile):
        for py in range(h_out):
            for px in range(w_out):
                u[b * p_in + (py // 2) * w_in + (px // 2),
                  b * p_out + py * w_out + px] = 1.0
    return jnp.asarray(u, dtype=jnp.bfloat16)


def _conv_mask9(h, w, b_tile, l):
    """(9, l) 0/1 masks: tap k=(dy,dx) is valid at output pixel (y,x) of every stacked
    batch element iff the source (y+dy, x+dx) lies inside that element's image; padding
    lanes are 0.  This also kills lane-roll leakage across batch-element boundaries:
    a cross-boundary read only ever happens for an out-of-image tap, which is masked."""
    m = np.zeros((9, l), np.float32)
    k = 0
    for dy in (-1, 0, 1):
        for dx in (-1, 0, 1):
            valid = np.zeros((h, w), np.float32)
            valid[max(0, -dy):min(h, h - dy), max(0, -dx):min(w, w - dx)] = 1.0
            flat = valid.reshape(-1)
            for b in range(b_tile):
                m[k, b * h * w:(b + 1) * h * w] = flat
            k += 1
    return m


def _broadcast_mask(m9, cin, l):
    """Pre-broadcast the (9, l) tap mask over Cin host-side -> (9*Cin, l), tap-major,
    matching the in-kernel im2col patch stacking (one wide VPU multiply in the kernel;
    JAX does not CSE broadcast_in_dim)."""
    return jnp.asarray(np.broadcast_to(m9[:, None, :], (9, cin, l)).reshape(9 * cin, l))


# ---------------------------------------------------------------------------
# In-kernel building blocks
# ---------------------------------------------------------------------------
def _conv3x3_lane_dense(x, w_ref, b_ref, m_ref, w_img, l):
    """3x3 conv (stride 1, pad 1) on activations stored as (Cin, L) with the flattened,
    batch-stacked H*W spatial axis on lanes.

    The 9 taps are static pltpu.roll lane rotations (XLU), stacked along sublanes
    (im2col), masked with ONE pre-broadcast (9*Cin, L) f32 multiply, cast to bf16 and
    contracted against the bf16 (Cout, 9*Cin) weight in a single MXU matmul with f32
    accumulation; bias is a (Cout, 1) broadcast add.  Tap order (dy, dx) row-major
    matches the host-side weight reshape and mask layout."""
    parts = []
    for dy in (-1, 0, 1):
        for dx in (-1, 0, 1):
            s = dy * w_img + dx                    # flat lane shift of this tap
            # want shifted[p] = x[p + s]  (jnp.roll semantics -> shift = -s mod L)
            parts.append(x if s == 0 else pltpu.roll(x, shift=(-s) % l, axis=1))
    patches = jnp.concatenate(parts, axis=0)                   # (9*Cin, L) f32
    patches = (patches * m_ref[...]).astype(jnp.bfloat16)      # mask + cast for MXU
    return (jnp.dot(w_ref[...], patches, preferred_element_type=jnp.float32)
            + b_ref[...])


def make_generator_kernel(block_meta):
    """block_meta: tuple of (in_ch, W_out, L_out) per ResBlock (batched output spatial).
    The trailing norm+act, head conv and tanh run at the last block's spatial size and
    reuse its conv2 mask (head Cin == last block out-channels)."""

    def kernel(*refs):
        x_ref = refs[0]
        o_ref = refs[-1]
        x = x_ref[0]                               # (C, L) lane-dense f32 activations
        idx = 1
        m2 = None
        w_img = l_out = None
        for (in_ch, w_img, l_out) in block_meta:
            (s1, t1, w1, b1, s2, t2, w2, b2,
             wsk, bsk, u, m1, m2) = refs[idx:idx + 13]
            idx += 13
            # Pre-upsample: main BN->ReLU and skip 1x1 conv (pointwise, commutes with
            # nearest resize) both depend only on x, so they share ONE upsample matmul:
            # [a ; skip] @ U, then free sublane-aligned row slices.
            a = jnp.maximum(x * s1[...] + t1[...], 0.0)
            skip = (jnp.dot(wsk[...], x.astype(jnp.bfloat16),
                            preferred_element_type=jnp.float32) + bsk[...])
            up = jnp.dot(jnp.concatenate([a, skip], axis=0).astype(jnp.bfloat16),
                         u[...], preferred_element_type=jnp.float32)
            au, skip_up = up[:in_ch], up[in_ch:]
            # Post-upsample main path: conv3x3 -> BN -> ReLU -> conv3x3, then residual.
            h = _conv3x3_lane_dense(au, w1, b1, m1, w_img, l_out)
            hb = jnp.maximum(h * s2[...] + t2[...], 0.0)
            x = _conv3x3_lane_dense(hb, w2, b2, m2, w_img, l_out) + skip_up
        # trailing BN -> ReLU, head Conv3x3 (padded to 8 out-ch) -> Tanh, lane-dense store
        fs, ft, wh, bh = refs[idx:idx + 4]
        t = jnp.maximum(x * fs[...] + ft[...], 0.0)
        o_ref[0] = jnp.tanh(_conv3x3_lane_dense(t, wh, bh, m2, w_img, l_out))

    return kernel


# ---------------------------------------------------------------------------
# Wrapper: parameter repacking + single fused pallas_call
# ---------------------------------------------------------------------------
def _col(v):                       # (C,) -> (C, 1): broadcasts over the spatial lanes
    return v.reshape(-1, 1)


def _im2col_w(w):                  # (3,3,Cin,Cout) HWIO -> (Cout, 9*Cin) bf16, (ky,kx,ci)
    kh, kw, cin, cout = w.shape
    return jnp.transpose(w, (3, 0, 1, 2)).reshape(cout, kh * kw * cin).astype(jnp.bfloat16)


def _const_spec(a):
    zeros = (0,) * a.ndim
    return pl.BlockSpec(a.shape, lambda i, _z=zeros: _z)


def generator_forward(params, inputs_nchw, batch_tile=BATCH_TILE):
    n, c0, h0, w0 = inputs_nchw.shape
    p0 = h0 * w0
    bt = max(1, min(batch_tile, n))
    n_pad = -(-n // bt) * bt
    num_tiles = n_pad // bt

    x = inputs_nchw.reshape(n, c0, p0).astype(jnp.float32)
    if n_pad != n:
        x = jnp.concatenate([x, jnp.zeros((n_pad - n, c0, p0), jnp.float32)], axis=0)
    # lane layout per grid step: [elem0 pixels | elem1 pixels | ... ]
    x = (x.reshape(num_tiles, bt, c0, p0)
           .transpose(0, 2, 1, 3)
           .reshape(num_tiles, c0, bt * p0))

    flat, block_meta = [], []
    h, w, l = h0, w0, bt * p0
    for p in params['blocks']:
        in_ch = int(p['scale1'].shape[0])
        out_ch = int(p['b1'].shape[0])
        ho, wo = 2 * h, 2 * w
        lo = _pad_lanes(bt * ho * wo)
        m9 = _conv_mask9(ho, wo, bt, lo)
        flat += [
            _col(p['scale1']), _col(p['shift1']),
            _im2col_w(p['w1']), _col(p['b1']),
            _col(p['scale2']), _col(p['shift2']),
            _im2col_w(p['w2']), _col(p['b2']),
            jnp.transpose(p['w_skip'][0, 0]).astype(jnp.bfloat16),   # (Cout, Cin)
            _col(p['b_skip']),
            _upsample_matrix(h, w, bt, l, ho, wo, lo),
            _broadcast_mask(m9, in_ch, lo),      # conv1 mask
            _broadcast_mask(m9, out_ch, lo),     # conv2 mask (also reused by the head)
        ]
        block_meta.append((in_ch, wo, lo))
        h, w, l = ho, wo, lo

    # head: pad to 8 output channels so the final store is a full sublane tile
    n_out = int(params['head_w'].shape[-1])
    n_out_pad = max(8, -(-n_out // 8) * 8)
    head_w = jnp.pad(params['head_w'], ((0, 0), (0, 0), (0, 0), (0, n_out_pad - n_out)))
    head_b = jnp.pad(params['head_b'], (0, n_out_pad - n_out))
    flat += [_col(params['final_scale']), _col(params['final_shift']),
             _im2col_w(head_w), _col(head_b)]

    kernel = make_generator_kernel(tuple(block_meta))
    in_specs = [pl.BlockSpec((1, c0, bt * p0), lambda i: (i, 0, 0))]
    in_specs += [_const_spec(a) for a in flat]

    y = pl.pallas_call(
        kernel,
        grid=(num_tiles,),
        in_specs=in_specs,
        out_specs=pl.BlockSpec((1, n_out_pad, l), lambda i: (i, 0, 0)),
        out_shape=jax.ShapeDtypeStruct((num_tiles, n_out_pad, l), jnp.float32),
        compiler_params=pltpu.CompilerParams(dimension_semantics=("parallel",)),
    )(x, *flat)

    # un-stack batch elements from the lane axis and drop head/channel padding
    p_last = h * w
    y = (y[..., : bt * p_last]
           .reshape(num_tiles, n_out_pad, bt, p_last)
           .transpose(0, 2, 1, 3)
           .reshape(n_pad, n_out_pad, p_last)[:n, :n_out]
           .reshape(n, n_out, h, w))
    return [y]   # list of head results, NCHW


# ---------------------------------------------------------------------------
# Pure-JAX reference (same math, f32) for validation
# ---------------------------------------------------------------------------
def generator_reference(params, x):
    def bn(z, s, t):
        return z * s[None, :, None, None] + t[None, :, None, None]

    def conv(z, w, b, pad):
        y = jax.lax.conv_general_dilated(
            z, w, (1, 1), ((pad, pad), (pad, pad)),
            dimension_numbers=('NCHW', 'HWIO', 'NCHW'))
        return y + b[None, :, None, None]

    def up2(z):
        return jnp.repeat(jnp.repeat(z, 2, axis=2), 2, axis=3)

    for p in params['blocks']:
        a = jax.nn.relu(bn(x, p['scale1'], p['shift1']))
        main = conv(jax.nn.relu(bn(conv(up2(a), p['w1'], p['b1'], 1),
                                   p['scale2'], p['shift2'])), p['w2'], p['b2'], 1)
        skip = conv(up2(x), p['w_skip'], p['b_skip'], 0)
        x = main + skip
    t = jax.nn.relu(bn(x, params['final_scale'], params['final_shift']))
    return jnp.tanh(conv(t, params['head_w'], params['head_b'], 1))


# ---------------------------------------------------------------------------
# Deterministic parameter initialization (shapes dictated by __init__)
# ---------------------------------------------------------------------------
def _bn_to_affine(key, c):
    k1, k2, k3, k4 = jax.random.split(key, 4)
    gamma = 1.0 + 0.1 * jax.random.normal(k1, (c,), jnp.float32)
    beta = 0.1 * jax.random.normal(k2, (c,), jnp.float32)
    mean = 0.1 * jax.random.normal(k3, (c,), jnp.float32)
    var = 1.0 + 0.1 * jax.random.uniform(k4, (c,), jnp.float32)
    scale = gamma * jax.lax.rsqrt(var + EPS)
    shift = beta - mean * scale
    return scale, shift


def _conv_init(key, k, cin, cout):
    kw, kb = jax.random.split(key)
    wgt = jax.random.normal(kw, (k, k, cin, cout), jnp.float32) / math.sqrt(k * k * cin)
    b = 0.01 * jax.random.normal(kb, (cout,), jnp.float32)
    return wgt, b


def init_generator_params(key):
    num_blocks = int(math.log(IMAGE_SIZE // TEX_INPUT_TENSOR_SIZE, 2))
    out_channels = min(int(TEX_NUM_CHANNELS * 2 ** num_blocks), TEX_MAX_CHANNELS)
    blocks = []
    for i in range(num_blocks - 1, -1, -1):
        in_channels = out_channels
        out_channels = min(int(TEX_NUM_CHANNELS * 2 ** i), TEX_MAX_CHANNELS)
        key, k1, k2, k3, k4, k5 = jax.random.split(key, 6)
        scale1, shift1 = _bn_to_affine(k1, in_channels)
        w1, b1 = _conv_init(k2, 3, in_channels, out_channels)
        scale2, shift2 = _bn_to_affine(k3, out_channels)
        w2, b2 = _conv_init(k4, 3, out_channels, out_channels)
        w_skip, b_skip = _conv_init(k5, 1, in_channels, out_channels)
        blocks.append(dict(scale1=scale1, shift1=shift1, w1=w1, b1=b1,
                           scale2=scale2, shift2=shift2, w2=w2, b2=b2,
                           w_skip=w_skip, b_skip=b_skip))
    key, kf, kh = jax.random.split(key, 3)
    final_scale, final_shift = _bn_to_affine(kf, out_channels)
    head_w, head_b = _conv_init(kh, 3, out_channels, TEXTURE_OUTPUT_DIM)
    return dict(blocks=blocks, final_scale=final_scale, final_shift=final_shift,
                head_w=head_w, head_b=head_b)


# ---------------------------------------------------------------------------
if __name__ == "__main__":
    key = jax.random.PRNGKey(0)
    pkey, xkey = jax.random.split(key)

    num_blocks = int(math.log(IMAGE_SIZE // TEX_INPUT_TENSOR_SIZE, 2))
    in_ch = min(int(TEX_NUM_CHANNELS * 2 ** num_blocks), TEX_MAX_CHANNELS)   # 32

    params = init_generator_params(pkey)
    batch = 2 * BATCH_TILE           # 8: two grid steps of 4 lane-stacked elements
    inputs = jax.random.normal(
        xkey, (batch, in_ch, TEX_INPUT_TENSOR_SIZE, TEX_INPUT_TENSOR_SIZE), jnp.float32)

    out = jax.block_until_ready(jax.jit(generator_forward)(params, inputs)[0])
    assert out.shape == (batch, TEXTURE_OUTPUT_DIM, IMAGE_SIZE, IMAGE_SIZE), out.shape
    assert bool(jnp.all(jnp.isfinite(out)))
    assert bool(jnp.all(jnp.abs(out) <= 1.0))   # tanh head

    ref = jax.block_until_ready(jax.jit(generator_reference)(params, inputs))
    max_err = float(jnp.max(jnp.abs(out - ref)))
    assert max_err < 0.06, f"max |pallas - reference| = {max_err}"   # bf16 MXU tolerance

    print("KERNEL_OK")
</pallas_src>

<mosaic_0001>
module attributes {stable_mosaic.version = 11 : i64} {
  func.func @kernel(%arg0: i32, %arg1: memref<1x32x64xf32, #tpu.memory_space<vmem>>, %arg2: memref<32x1xf32, #tpu.memory_space<vmem>>, %arg3: memref<32x1xf32, #tpu.memory_space<vmem>>, %arg4: memref<16x288xbf16, #tpu.memory_space<vmem>>, %arg5: memref<16x1xf32, #tpu.memory_space<vmem>>, %arg6: memref<16x1xf32, #tpu.memory_space<vmem>>, %arg7: memref<16x1xf32, #tpu.memory_space<vmem>>, %arg8: memref<16x144xbf16, #tpu.memory_space<vmem>>, %arg9: memref<16x1xf32, #tpu.memory_space<vmem>>, %arg10: memref<16x32xbf16, #tpu.memory_space<vmem>>, %arg11: memref<16x1xf32, #tpu.memory_space<vmem>>, %arg12: memref<64x256xbf16, #tpu.memory_space<vmem>>, %arg13: memref<288x256xf32, #tpu.memory_space<vmem>>, %arg14: memref<144x256xf32, #tpu.memory_space<vmem>>, %arg15: memref<16x1xf32, #tpu.memory_space<vmem>>, %arg16: memref<16x1xf32, #tpu.memory_space<vmem>>, %arg17: memref<8x144xbf16, #tpu.memory_space<vmem>>, %arg18: memref<8x1xf32, #tpu.memory_space<vmem>>, %arg19: memref<8x1xf32, #tpu.memory_space<vmem>>, %arg20: memref<8x1xf32, #tpu.memory_space<vmem>>, %arg21: memref<8x72xbf16, #tpu.memory_space<vmem>>, %arg22: memref<8x1xf32, #tpu.memory_space<vmem>>, %arg23: memref<8x16xbf16, #tpu.memory_space<vmem>>, %arg24: memref<8x1xf32, #tpu.memory_space<vmem>>, %arg25: memref<256x1024xbf16, #tpu.memory_space<vmem>>, %arg26: memref<144x1024xf32, #tpu.memory_space<vmem>>, %arg27: memref<72x1024xf32, #tpu.memory_space<vmem>>, %arg28: memref<8x1xf32, #tpu.memory_space<vmem>>, %arg29: memref<8x1xf32, #tpu.memory_space<vmem>>, %arg30: memref<8x72xbf16, #tpu.memory_space<vmem>>, %arg31: memref<8x1xf32, #tpu.memory_space<vmem>>, %arg32: memref<1x8x1024xf32, #tpu.memory_space<vmem>>) attributes {dimension_semantics = [#tpu.dimension_semantics<parallel>], iteration_bounds = array<i64: 2>, scalar_prefetch = 0 : i64, scratch_operands = 0 : i64, tpu.core_type = #tpu.core_type<tc>, window_params = [{transform_indices = @transform_0, window_bounds = array<i64: 1, 32, 64>}, {pipeline_mode = #tpu.pipeline_mode<synchronous>, transform_indices = @transform_1, window_bounds = array<i64: 32, 1>}, {pipeline_mode = #tpu.pipeline_mode<synchronous>, transform_indices = @transform_2, window_bounds = array<i64: 32, 1>}, {pipeline_mode = #tpu.pipeline_mode<synchronous>, transform_indices = @transform_3, window_bounds = array<i64: 16, 288>}, {pipeline_mode = #tpu.pipeline_mode<synchronous>, transform_indices = @transform_4, window_bounds = array<i64: 16, 1>}, {pipeline_mode = #tpu.pipeline_mode<synchronous>, transform_indices = @transform_5, window_bounds = array<i64: 16, 1>}, {pipeline_mode = #tpu.pipeline_mode<synchronous>, transform_indices = @transform_6, window_bounds = array<i64: 16, 1>}, {pipeline_mode = #tpu.pipeline_mode<synchronous>, transform_indices = @transform_7, window_bounds = array<i64: 16, 144>}, {pipeline_mode = #tpu.pipeline_mode<synchronous>, transform_indices = @transform_8, window_bounds = array<i64: 16, 1>}, {pipeline_mode = #tpu.pipeline_mode<synchronous>, transform_indices = @transform_9, window_bounds = array<i64: 16, 32>}, {pipeline_mode = #tpu.pipeline_mode<synchronous>, transform_indices = @transform_10, window_bounds = array<i64: 16, 1>}, {pipeline_mode = #tpu.pipeline_mode<synchronous>, transform_indices = @transform_11, window_bounds = array<i64: 64, 256>}, {pipeline_mode = #tpu.pipeline_mode<synchronous>, transform_indices = @transform_12, window_bounds = array<i64: 288, 256>}, {pipeline_mode = #tpu.pipeline_mode<synchronous>, transform_indices = @transform_13, window_bounds = array<i64: 144, 256>}, {pipeline_mode = #tpu.pipeline_mode<synchronous>, transform_indices = @transform_14, window_bounds = array<i64: 16, 1>}, {pipeline_mode = #tpu.pipeline_mode<synchronous>, transform_indices = @transform_15, window_bounds = array<i64: 16, 1>}, {pipeline_mode = #tpu.pipeline_mode<synchronous>, transform_indices = @transform_16, window_bounds = array<i64: 8, 144>}, {pipeline_mode = #tpu.pipeline_mode<synchronous>, transform_indices = @transform_17, window_bounds = array<i64: 8, 1>}, {pipeline_mode = #tpu.pipeline_mode<synchronous>, transform_indices = @transform_18, window_bounds = array<i64: 8, 1>}, {pipeline_mode = #tpu.pipeline_mode<synchronous>, transform_indices = @transform_19, window_bounds = array<i64: 8, 1>}, {pipeline_mode = #tpu.pipeline_mode<synchronous>, transform_indices = @transform_20, window_bounds = array<i64: 8, 72>}, {pipeline_mode = #tpu.pipeline_mode<synchronous>, transform_indices = @transform_21, window_bounds = array<i64: 8, 1>}, {pipeline_mode = #tpu.pipeline_mode<synchronous>, transform_indices = @transform_22, window_bounds = array<i64: 8, 16>}, {pipeline_mode = #tpu.pipeline_mode<synchronous>, transform_indices = @transform_23, window_bounds = array<i64: 8, 1>}, {pipeline_mode = #tpu.pipeline_mode<synchronous>, transform_indices = @transform_24, window_bounds = array<i64: 256, 1024>}, {pipeline_mode = #tpu.pipeline_mode<synchronous>, transform_indices = @transform_25, window_bounds = array<i64: 144, 1024>}, {pipeline_mode = #tpu.pipeline_mode<synchronous>, transform_indices = @transform_26, window_bounds = array<i64: 72, 1024>}, {pipeline_mode = #tpu.pipeline_mode<synchronous>, transform_indices = @transform_27, window_bounds = array<i64: 8, 1>}, {pipeline_mode = #tpu.pipeline_mode<synchronous>, transform_indices = @transform_28, window_bounds = array<i64: 8, 1>}, {pipeline_mode = #tpu.pipeline_mode<synchronous>, transform_indices = @transform_29, window_bounds = array<i64: 8, 72>}, {pipeline_mode = #tpu.pipeline_mode<synchronous>, transform_indices = @transform_30, window_bounds = array<i64: 8, 1>}, {transform_indices = @transform_31, window_bounds = array<i64: 1, 8, 1024>}]} {
    %c0 = arith.constant 0 : index
    %c0_0 = arith.constant 0 : index
    %c0_1 = arith.constant 0 : index
    %0 = vector.load %arg1[%c0, %c0_0, %c0_1] : memref<1x32x64xf32, #tpu.memory_space<vmem>>, vector<1x32x64xf32>
    %1 = vector.shape_cast %0 : vector<1x32x64xf32> to vector<32x64xf32>
    %c0_2 = arith.constant 0 : index
    %c0_3 = arith.constant 0 : index
    %2 = vector.load %arg2[%c0_2, %c0_3] : memref<32x1xf32, #tpu.memory_space<vmem>>, vector<32x1xf32>
    %3 = vector.broadcast %2 : vector<32x1xf32> to vector<32x64xf32>
    %4 = arith.mulf %1, %3 : vector<32x64xf32>
    %c0_4 = arith.constant 0 : index
    %c0_5 = arith.constant 0 : index
    %5 = vector.load %arg3[%c0_4, %c0_5] : memref<32x1xf32, #tpu.memory_space<vmem>>, vector<32x1xf32>
    %6 = vector.broadcast %5 : vector<32x1xf32> to vector<32x64xf32>
    %7 = arith.addf %4, %6 : vector<32x64xf32>
    %cst = arith.constant 0.000000e+00 : f32
    %8 = vector.broadcast %cst : f32 to vector<32x64xf32>
    %9 = arith.maximumf %7, %8 : vector<32x64xf32>
    %c0_6 = arith.constant 0 : index
    %c0_7 = arith.constant 0 : index
    %10 = vector.load %arg10[%c0_6, %c0_7] : memref<16x32xbf16, #tpu.memory_space<vmem>>, vector<16x32xbf16>
    %11 = arith.truncf %1 : vector<32x64xf32> to vector<32x64xbf16>
    %cst_8 = arith.constant dense<0.000000e+00> : vector<16x64xf32>
    %12 = tpu.matmul %10, %11, %cst_8 {dimension_numbers = #tpu.dot_dimension_numbers<[1], [0], [0], [1], [0, 0, 1, 1], [], []>} : vector<16x32xbf16>, vector<32x64xbf16>, vector<16x64xf32> -> vector<16x64xf32>
    %c0_9 = arith.constant 0 : index
    %c0_10 = arith.constant 0 : index
    %13 = vector.load %arg11[%c0_9, %c0_10] : memref<16x1xf32, #tpu.memory_space<vmem>>, vector<16x1xf32>
    %14 = vector.broadcast %13 : vector<16x1xf32> to vector<16x64xf32>
    %15 = arith.addf %12, %14 : vector<16x64xf32>
    %16 = tpu.concatenate %9, %15 in 0 : vector<32x64xf32>, vector<16x64xf32> -> vector<48x64xf32>
    %17 = arith.truncf %16 : vector<48x64xf32> to vector<48x64xbf16>
    %c0_11 = arith.constant 0 : index
    %c0_12 = arith.constant 0 : index
    %18 = vector.load %arg12[%c0_11, %c0_12] : memref<64x256xbf16, #tpu.memory_space<vmem>>, vector<64x256xbf16>
    %cst_13 = arith.constant dense<0.000000e+00> : vector<48x256xf32>
    %19 = tpu.matmul %17, %18, %cst_13 {dimension_numbers = #tpu.dot_dimension_numbers<[1], [0], [0], [1], [0, 0, 1, 1], [], []>} : vector<48x64xbf16>, vector<64x256xbf16>, vector<48x256xf32> -> vector<48x256xf32>
    %20 = vector.extract_strided_slice %19 {offsets = [0, 0], sizes = [32, 256], strides = [1, 1]} : vector<48x256xf32> to vector<32x256xf32>
    %21 = vector.extract_strided_slice %19 {offsets = [32, 0], sizes = [16, 256], strides = [1, 1]} : vector<48x256xf32> to vector<16x256xf32>
    %c9_i32 = arith.constant 9 : i32
    %22 = tpu.dynamic_rotate %20 by %c9_i32 dim 1 : vector<32x256xf32>, i32 -> vector<32x256xf32>
    %c8_i32 = arith.constant 8 : i32
    %23 = tpu.dynamic_rotate %20 by %c8_i32 dim 1 : vector<32x256xf32>, i32 -> vector<32x256xf32>
    %c7_i32 = arith.constant 7 : i32
    %24 = tpu.dynamic_rotate %20 by %c7_i32 dim 1 : vector<32x256xf32>, i32 -> vector<32x256xf32>
    %c1_i32 = arith.constant 1 : i32
    %25 = tpu.dynamic_rotate %20 by %c1_i32 dim 1 : vector<32x256xf32>, i32 -> vector<32x256xf32>
    %c255_i32 = arith.constant 255 : i32
    %26 = tpu.dynamic_rotate %20 by %c255_i32 dim 1 : vector<32x256xf32>, i32 -> vector<32x256xf32>
    %c249_i32 = arith.constant 249 : i32
    %27 = tpu.dynamic_rotate %20 by %c249_i32 dim 1 : vector<32x256xf32>, i32 -> vector<32x256xf32>
    %c248_i32 = arith.constant 248 : i32
    %28 = tpu.dynamic_rotate %20 by %c248_i32 dim 1 : vector<32x256xf32>, i32 -> vector<32x256xf32>
    %c247_i32 = arith.constant 247 : i32
    %29 = tpu.dynamic_rotate %20 by %c247_i32 dim 1 : vector<32x256xf32>, i32 -> vector<32x256xf32>
    %30 = tpu.concatenate %22, %23, %24, %25, %20, %26, %27, %28, %29 in 0 : vector<32x256xf32>, vector<32x256xf32>, vector<32x256xf32>, vector<32x256xf32>, vector<32x256xf32>, vector<32x256xf32>, vector<32x256xf32>, vector<32x256xf32>, vector<32x256xf32> -> vector<288x256xf32>
    %c0_14 = arith.constant 0 : index
    %c0_15 = arith.constant 0 : index
    %31 = vector.load %arg13[%c0_14, %c0_15] : memref<288x256xf32, #tpu.memory_space<vmem>>, vector<288x256xf32>
    %32 = arith.mulf %30, %31 : vector<288x256xf32>
    %33 = arith.truncf %32 : vector<288x256xf32> to vector<288x256xbf16>
    %c0_16 = arith.constant 0 : index
    %c0_17 = arith.constant 0 : index
    %34 = vector.load %arg4[%c0_16, %c0_17] : memref<16x288xbf16, #tpu.memory_space<vmem>>, vector<16x288xbf16>
    %cst_18 = arith.constant dense<0.000000e+00> : vector<16x256xf32>
    %35 = tpu.matmul %34, %33, %cst_18 {dimension_numbers = #tpu.dot_dimension_numbers<[1], [0], [0], [1], [0, 0, 1, 1], [], []>} : vector<16x288xbf16>, vector<288x256xbf16>, vector<16x256xf32> -> vector<16x256xf32>
    %c0_19 = arith.constant 0 : index
    %c0_20 = arith.constant 0 : index
    %36 = vector.load %arg5[%c0_19, %c0_20] : memref<16x1xf32, #tpu.memory_space<vmem>>, vector<16x1xf32>
    %37 = vector.broadcast %36 : vector<16x1xf32> to vector<16x256xf32>
    %38 = arith.addf %35, %37 : vector<16x256xf32>
    %c0_21 = arith.constant 0 : index
    %c0_22 = arith.constant 0 : index
    %39 = vector.load %arg6[%c0_21, %c0_22] : memref<16x1xf32, #tpu.memory_space<vmem>>, vector<16x1xf32>
    %40 = vector.broadcast %39 : vector<16x1xf32> to vector<16x256xf32>
    %41 = arith.mulf %38, %40 : vector<16x256xf32>
    %c0_23 = arith.constant 0 : index
    %c0_24 = arith.constant 0 : index
    %42 = vector.load %arg7[%c0_23, %c0_24] : memref<16x1xf32, #tpu.memory_space<vmem>>, vector<16x1xf32>
    %43 = vector.broadcast %42 : vector<16x1xf32> to vector<16x256xf32>
    %44 = arith.addf %41, %43 : vector<16x256xf32>
    %cst_25 = arith.constant 0.000000e+00 : f32
    %45 = vector.broadcast %cst_25 : f32 to vector<16x256xf32>
    %46 = arith.maximumf %44, %45 : vector<16x256xf32>
    %c9_i32_26 = arith.constant 9 : i32
    %47 = tpu.dynamic_rotate %46 by %c9_i32_26 dim 1 : vector<16x256xf32>, i32 -> vector<16x256xf32>
    %c8_i32_27 = arith.constant 8 : i32
    %48 = tpu.dynamic_rotate %46 by %c8_i32_27 dim 1 : vector<16x256xf32>, i32 -> vector<16x256xf32>
    %c7_i32_28 = arith.constant 7 : i32
    %49 = tpu.dynamic_rotate %46 by %c7_i32_28 dim 1 : vector<16x256xf32>, i32 -> vector<16x256xf32>
    %c1_i32_29 = arith.constant 1 : i32
    %50 = tpu.dynamic_rotate %46 by %c1_i32_29 dim 1 : vector<16x256xf32>, i32 -> vector<16x256xf32>
    %c255_i32_30 = arith.constant 255 : i32
    %51 = tpu.dynamic_rotate %46 by %c255_i32_30 dim 1 : vector<16x256xf32>, i32 -> vector<16x256xf32>
    %c249_i32_31 = arith.constant 249 : i32
    %52 = tpu.dynamic_rotate %46 by %c249_i32_31 dim 1 : vector<16x256xf32>, i32 -> vector<16x256xf32>
    %c248_i32_32 = arith.constant 248 : i32
    %53 = tpu.dynamic_rotate %46 by %c248_i32_32 dim 1 : vector<16x256xf32>, i32 -> vector<16x256xf32>
    %c247_i32_33 = arith.constant 247 : i32
    %54 = tpu.dynamic_rotate %46 by %c247_i32_33 dim 1 : vector<16x256xf32>, i32 -> vector<16x256xf32>
    %55 = tpu.concatenate %47, %48, %49, %50, %46, %51, %52, %53, %54 in 0 : vector<16x256xf32>, vector<16x256xf32>, vector<16x256xf32>, vector<16x256xf32>, vector<16x256xf32>, vector<16x256xf32>, vector<16x256xf32>, vector<16x256xf32>, vector<16x256xf32> -> vector<144x256xf32>
    %c0_34 = arith.constant 0 : index
    %c0_35 = arith.constant 0 : index
    %56 = vector.load %arg14[%c0_34, %c0_35] : memref<144x256xf32, #tpu.memory_space<vmem>>, vector<144x256xf32>
    %57 = arith.mulf %55, %56 : vector<144x256xf32>
    %58 = arith.truncf %57 : vector<144x256xf32> to vector<144x256xbf16>
    %c0_36 = arith.constant 0 : index
    %c0_37 = arith.constant 0 : index
    %59 = vector.load %arg8[%c0_36, %c0_37] : memref<16x144xbf16, #tpu.memory_space<vmem>>, vector<16x144xbf16>
    %cst_38 = arith.constant dense<0.000000e+00> : vector<16x256xf32>
    %60 = tpu.matmul %59, %58, %cst_38 {dimension_numbers = #tpu.dot_dimension_numbers<[1], [0], [0], [1], [0, 0, 1, 1], [], []>} : vector<16x144xbf16>, vector<144x256xbf16>, vector<16x256xf32> -> vector<16x256xf32>
    %c0_39 = arith.constant 0 : index
    %c0_40 = arith.constant 0 : index
    %61 = vector.load %arg9[%c0_39, %c0_40] : memref<16x1xf32, #tpu.memory_space<vmem>>, vector<16x1xf32>
    %62 = vector.broadcast %61 : vector<16x1xf32> to vector<16x256xf32>
    %63 = arith.addf %60, %62 : vector<16x256xf32>
    %64 = arith.addf %63, %21 : vector<16x256xf32>
    %c0_41 = arith.constant 0 : index
    %c0_42 = arith.constant 0 : index
    %65 = vector.load %arg15[%c0_41, %c0_42] : memref<16x1xf32, #tpu.memory_space<vmem>>, vector<16x1xf32>
    %66 = vector.broadcast %65 : vector<16x1xf32> to vector<16x256xf32>
    %67 = arith.mulf %64, %66 : vector<16x256xf32>
    %c0_43 = arith.constant 0 : index
    %c0_44 = arith.constant 0 : index
    %68 = vector.load %arg16[%c0_43, %c0_44] : memref<16x1xf32, #tpu.memory_space<vmem>>, vector<16x1xf32>
    %69 = vector.broadcast %68 : vector<16x1xf32> to vector<16x256xf32>
    %70 = arith.addf %67, %69 : vector<16x256xf32>
    %cst_45 = arith.constant 0.000000e+00 : f32
    %71 = vector.broadcast %cst_45 : f32 to vector<16x256xf32>
    %72 = arith.maximumf %70, %71 : vector<16x256xf32>
    %c0_46 = arith.constant 0 : index
    %c0_47 = arith.constant 0 : index
    %73 = vector.load %arg23[%c0_46, %c0_47] : memref<8x16xbf16, #tpu.memory_space<vmem>>, vector<8x16xbf16>
    %74 = arith.truncf %64 : vector<16x256xf32> to vector<16x256xbf16>
    %cst_48 = arith.constant dense<0.000000e+00> : vector<8x256xf32>
    %75 = tpu.matmul %73, %74, %cst_48 {dimension_numbers = #tpu.dot_dimension_numbers<[1], [0], [0], [1], [0, 0, 1, 1], [], []>} : vector<8x16xbf16>, vector<16x256xbf16>, vector<8x256xf32> -> vector<8x256xf32>
    %c0_49 = arith.constant 0 : index
    %c0_50 = arith.constant 0 : index
    %76 = vector.load %arg24[%c0_49, %c0_50] : memref<8x1xf32, #tpu.memory_space<vmem>>, vector<8x1xf32>
    %77 = vector.broadcast %76 : vector<8x1xf32> to vector<8x256xf32>
    %78 = arith.addf %75, %77 : vector<8x256xf32>
    %79 = tpu.concatenate %72, %78 in 0 : vector<16x256xf32>, vector<8x256xf32> -> vector<24x256xf32>
    %80 = arith.truncf %79 : vector<24x256xf32> to vector<24x256xbf16>
    %c0_51 = arith.constant 0 : index
    %c0_52 = arith.constant 0 : index
    %81 = vector.load %arg25[%c0_51, %c0_52] : memref<256x1024xbf16, #tpu.memory_space<vmem>>, vector<256x1024xbf16>
    %cst_53 = arith.constant dense<0.000000e+00> : vector<24x1024xf32>
    %82 = tpu.matmul %80, %81, %cst_53 {dimension_numbers = #tpu.dot_dimension_numbers<[1], [0], [0], [1], [0, 0, 1, 1], [], []>} : vector<24x256xbf16>, vector<256x1024xbf16>, vector<24x1024xf32> -> vector<24x1024xf32>
    %83 = vector.extract_strided_slice %82 {offsets = [0, 0], sizes = [16, 1024], strides = [1, 1]} : vector<24x1024xf32> to vector<16x1024xf32>
    %84 = vector.extract_strided_slice %82 {offsets = [16, 0], sizes = [8, 1024], strides = [1, 1]} : vector<24x1024xf32> to vector<8x1024xf32>
    %c17_i32 = arith.constant 17 : i32
    %85 = tpu.dynamic_rotate %83 by %c17_i32 dim 1 : vector<16x1024xf32>, i32 -> vector<16x1024xf32>
    %c16_i32 = arith.constant 16 : i32
    %86 = tpu.dynamic_rotate %83 by %c16_i32 dim 1 : vector<16x1024xf32>, i32 -> vector<16x1024xf32>
    %c15_i32 = arith.constant 15 : i32
    %87 = tpu.dynamic_rotate %83 by %c15_i32 dim 1 : vector<16x1024xf32>, i32 -> vector<16x1024xf32>
    %c1_i32_54 = arith.constant 1 : i32
    %88 = tpu.dynamic_rotate %83 by %c1_i32_54 dim 1 : vector<16x1024xf32>, i32 -> vector<16x1024xf32>
    %c1023_i32 = arith.constant 1023 : i32
    %89 = tpu.dynamic_rotate %83 by %c1023_i32 dim 1 : vector<16x1024xf32>, i32 -> vector<16x1024xf32>
    %c1009_i32 = arith.constant 1009 : i32
    %90 = tpu.dynamic_rotate %83 by %c1009_i32 dim 1 : vector<16x1024xf32>, i32 -> vector<16x1024xf32>
    %c1008_i32 = arith.constant 1008 : i32
    %91 = tpu.dynamic_rotate %83 by %c1008_i32 dim 1 : vector<16x1024xf32>, i32 -> vector<16x1024xf32>
    %c1007_i32 = arith.constant 1007 : i32
    %92 = tpu.dynamic_rotate %83 by %c1007_i32 dim 1 : vector<16x1024xf32>, i32 -> vector<16x1024xf32>
    %93 = tpu.concatenate %85, %86, %87, %88, %83, %89, %90, %91, %92 in 0 : vector<16x1024xf32>, vector<16x1024xf32>, vector<16x1024xf32>, vector<16x1024xf32>, vector<16x1024xf32>, vector<16x1024xf32>, vector<16x1024xf32>, vector<16x1024xf32>, vector<16x1024xf32> -> vector<144x1024xf32>
    %c0_55 = arith.constant 0 : index
    %c0_56 = arith.constant 0 : index
    %94 = vector.load %arg26[%c0_55, %c0_56] : memref<144x1024xf32, #tpu.memory_space<vmem>>, vector<144x1024xf32>
    %95 = arith.mulf %93, %94 : vector<144x1024xf32>
    %96 = arith.truncf %95 : vector<144x1024xf32> to vector<144x1024xbf16>
    %c0_57 = arith.constant 0 : index
    %c0_58 = arith.constant 0 : index
    %97 = vector.load %arg17[%c0_57, %c0_58] : memref<8x144xbf16, #tpu.memory_space<vmem>>, vector<8x144xbf16>
    %cst_59 = arith.constant dense<0.000000e+00> : vector<8x1024xf32>
    %98 = tpu.matmul %97, %96, %cst_59 {dimension_numbers = #tpu.dot_dimension_numbers<[1], [0], [0], [1], [0, 0, 1, 1], [], []>} : vector<8x144xbf16>, vector<144x1024xbf16>, vector<8x1024xf32> -> vector<8x1024xf32>
    %c0_60 = arith.constant 0 : index
    %c0_61 = arith.constant 0 : index
    %99 = vector.load %arg18[%c0_60, %c0_61] : memref<8x1xf32, #tpu.memory_space<vmem>>, vector<8x1xf32>
    %100 = vector.broadcast %99 : vector<8x1xf32> to vector<8x1024xf32>
    %101 = arith.addf %98, %100 : vector<8x1024xf32>
    %c0_62 = arith.constant 0 : index
    %c0_63 = arith.constant 0 : index
    %102 = vector.load %arg19[%c0_62, %c0_63] : memref<8x1xf32, #tpu.memory_space<vmem>>, vector<8x1xf32>
    %103 = vector.broadcast %102 : vector<8x1xf32> to vector<8x1024xf32>
    %104 = arith.mulf %101, %103 : vector<8x1024xf32>
    %c0_64 = arith.constant 0 : index
    %c0_65 = arith.constant 0 : index
    %105 = vector.load %arg20[%c0_64, %c0_65] : memref<8x1xf32, #tpu.memory_space<vmem>>, vector<8x1xf32>
    %106 = vector.broadcast %105 : vector<8x1xf32> to vector<8x1024xf32>
    %107 = arith.addf %104, %106 : vector<8x1024xf32>
    %cst_66 = arith.constant 0.000000e+00 : f32
    %108 = vector.broadcast %cst_66 : f32 to vector<8x1024xf32>
    %109 = arith.maximumf %107, %108 : vector<8x1024xf32>
    %c17_i32_67 = arith.constant 17 : i32
    %110 = tpu.dynamic_rotate %109 by %c17_i32_67 dim 1 : vector<8x1024xf32>, i32 -> vector<8x1024xf32>
    %c16_i32_68 = arith.constant 16 : i32
    %111 = tpu.dynamic_rotate %109 by %c16_i32_68 dim 1 : vector<8x1024xf32>, i32 -> vector<8x1024xf32>
    %c15_i32_69 = arith.constant 15 : i32
    %112 = tpu.dynamic_rotate %109 by %c15_i32_69 dim 1 : vector<8x1024xf32>, i32 -> vector<8x1024xf32>
    %c1_i32_70 = arith.constant 1 : i32
    %113 = tpu.dynamic_rotate %109 by %c1_i32_70 dim 1 : vector<8x1024xf32>, i32 -> vector<8x1024xf32>
    %c1023_i32_71 = arith.constant 1023 : i32
    %114 = tpu.dynamic_rotate %109 by %c1023_i32_71 dim 1 : vector<8x1024xf32>, i32 -> vector<8x1024xf32>
    %c1009_i32_72 = arith.constant 1009 : i32
    %115 = tpu.dynamic_rotate %109 by %c1009_i32_72 dim 1 : vector<8x1024xf32>, i32 -> vector<8x1024xf32>
    %c1008_i32_73 = arith.constant 1008 : i32
    %116 = tpu.dynamic_rotate %109 by %c1008_i32_73 dim 1 : vector<8x1024xf32>, i32 -> vector<8x1024xf32>
    %c1007_i32_74 = arith.constant 1007 : i32
    %117 = tpu.dynamic_rotate %109 by %c1007_i32_74 dim 1 : vector<8x1024xf32>, i32 -> vector<8x1024xf32>
    %118 = tpu.concatenate %110, %111, %112, %113, %109, %114, %115, %116, %117 in 0 : vector<8x1024xf32>, vector<8x1024xf32>, vector<8x1024xf32>, vector<8x1024xf32>, vector<8x1024xf32>, vector<8x1024xf32>, vector<8x1024xf32>, vector<8x1024xf32>, vector<8x1024xf32> -> vector<72x1024xf32>
    %c0_75 = arith.constant 0 : index
    %c0_76 = arith.constant 0 : index
    %119 = vector.load %arg27[%c0_75, %c0_76] : memref<72x1024xf32, #tpu.memory_space<vmem>>, vector<72x1024xf32>
    %120 = arith.mulf %118, %119 : vector<72x1024xf32>
    %121 = arith.truncf %120 : vector<72x1024xf32> to vector<72x1024xbf16>
    %c0_77 = arith.constant 0 : index
    %c0_78 = arith.constant 0 : index
    %122 = vector.load %arg21[%c0_77, %c0_78] : memref<8x72xbf16, #tpu.memory_space<vmem>>, vector<8x72xbf16>
    %cst_79 = arith.constant dense<0.000000e+00> : vector<8x1024xf32>
    %123 = tpu.matmul %122, %121, %cst_79 {dimension_numbers = #tpu.dot_dimension_numbers<[1], [0], [0], [1], [0, 0, 1, 1], [], []>} : vector<8x72xbf16>, vector<72x1024xbf16>, vector<8x1024xf32> -> vector<8x1024xf32>
    %c0_80 = arith.constant 0 : index
    %c0_81 = arith.constant 0 : index
    %124 = vector.load %arg22[%c0_80, %c0_81] : memref<8x1xf32, #tpu.memory_space<vmem>>, vector<8x1xf32>
    %125 = vector.broadcast %124 : vector<8x1xf32> to vector<8x1024xf32>
    %126 = arith.addf %123, %125 : vector<8x1024xf32>
    %127 = arith.addf %126, %84 : vector<8x1024xf32>
    %c0_82 = arith.constant 0 : index
    %c0_83 = arith.constant 0 : index
    %128 = vector.load %arg28[%c0_82, %c0_83] : memref<8x1xf32, #tpu.memory_space<vmem>>, vector<8x1xf32>
    %129 = vector.broadcast %128 : vector<8x1xf32> to vector<8x1024xf32>
    %130 = arith.mulf %127, %129 : vector<8x1024xf32>
    %c0_84 = arith.constant 0 : index
    %c0_85 = arith.constant 0 : index
    %131 = vector.load %arg29[%c0_84, %c0_85] : memref<8x1xf32, #tpu.memory_space<vmem>>, vector<8x1xf32>
    %132 = vector.broadcast %131 : vector<8x1xf32> to vector<8x1024xf32>
    %133 = arith.addf %130, %132 : vector<8x1024xf32>
    %cst_86 = arith.constant 0.000000e+00 : f32
    %134 = vector.broadcast %cst_86 : f32 to vector<8x1024xf32>
    %135 = arith.maximumf %133, %134 : vector<8x1024xf32>
    %c17_i32_87 = arith.constant 17 : i32
    %136 = tpu.dynamic_rotate %135 by %c17_i32_87 dim 1 : vector<8x1024xf32>, i32 -> vector<8x1024xf32>
    %c16_i32_88 = arith.constant 16 : i32
    %137 = tpu.dynamic_rotate %135 by %c16_i32_88 dim 1 : vector<8x1024xf32>, i32 -> vector<8x1024xf32>
    %c15_i32_89 = arith.constant 15 : i32
    %138 = tpu.dynamic_rotate %135 by %c15_i32_89 dim 1 : vector<8x1024xf32>, i32 -> vector<8x1024xf32>
    %c1_i32_90 = arith.constant 1 : i32
    %139 = tpu.dynamic_rotate %135 by %c1_i32_90 dim 1 : vector<8x1024xf32>, i32 -> vector<8x1024xf32>
    %c1023_i32_91 = arith.constant 1023 : i32
    %140 = tpu.dynamic_rotate %135 by %c1023_i32_91 dim 1 : vector<8x1024xf32>, i32 -> vector<8x1024xf32>
    %c1009_i32_92 = arith.constant 1009 : i32
    %141 = tpu.dynamic_rotate %135 by %c1009_i32_92 dim 1 : vector<8x1024xf32>, i32 -> vector<8x1024xf32>
    %c1008_i32_93 = arith.constant 1008 : i32
    %142 = tpu.dynamic_rotate %135 by %c1008_i32_93 dim 1 : vector<8x1024xf32>, i32 -> vector<8x1024xf32>
    %c1007_i32_94 = arith.constant 1007 : i32
    %143 = tpu.dynamic_rotate %135 by %c1007_i32_94 dim 1 : vector<8x1024xf32>, i32 -> vector<8x1024xf32>
    %144 = tpu.concatenate %136, %137, %138, %139, %135, %140, %141, %142, %143 in 0 : vector<8x1024xf32>, vector<8x1024xf32>, vector<8x1024xf32>, vector<8x1024xf32>, vector<8x1024xf32>, vector<8x1024xf32>, vector<8x1024xf32>, vector<8x1024xf32>, vector<8x1024xf32> -> vector<72x1024xf32>
    %c0_95 = arith.constant 0 : index
    %c0_96 = arith.constant 0 : index
    %145 = vector.load %arg27[%c0_95, %c0_96] : memref<72x1024xf32, #tpu.memory_space<vmem>>, vector<72x1024xf32>
    %146 = arith.mulf %144, %145 : vector<72x1024xf32>
    %147 = arith.truncf %146 : vector<72x1024xf32> to vector<72x1024xbf16>
    %c0_97 = arith.constant 0 : index
    %c0_98 = arith.constant 0 : index
    %148 = vector.load %arg30[%c0_97, %c0_98] : memref<8x72xbf16, #tpu.memory_space<vmem>>, vector<8x72xbf16>
    %cst_99 = arith.constant dense<0.000000e+00> : vector<8x1024xf32>
    %149 = tpu.matmul %148, %147, %cst_99 {dimension_numbers = #tpu.dot_dimension_numbers<[1], [0], [0], [1], [0, 0, 1, 1], [], []>} : vector<8x72xbf16>, vector<72x1024xbf16>, vector<8x1024xf32> -> vector<8x1024xf32>
    %c0_100 = arith.constant 0 : index
    %c0_101 = arith.constant 0 : index
    %150 = vector.load %arg31[%c0_100, %c0_101] : memref<8x1xf32, #tpu.memory_space<vmem>>, vector<8x1xf32>
    %151 = vector.broadcast %150 : vector<8x1xf32> to vector<8x1024xf32>
    %152 = arith.addf %149, %151 : vector<8x1024xf32>
    %153 = math.tanh %152 : vector<8x1024xf32>
    %c0_102 = arith.constant 0 : index
    %c0_103 = arith.constant 0 : index
    %c0_104 = arith.constant 0 : index
    %154 = vector.load %arg32[%c0_102, %c0_103, %c0_104] : memref<1x8x1024xf32, #tpu.memory_space<vmem>>, vector<1x8x1024xf32>
    %155 = vector.shape_cast %154 : vector<1x8x1024xf32> to vector<8x1024xf32>
    %156 = vector.shape_cast %153 : vector<8x1024xf32> to vector<1x8x1024xf32>
    tpu.vector_store %arg32[%c0_102, %c0_103, %c0_104], %156 {strides = array<i32>} : memref<1x8x1024xf32, #tpu.memory_space<vmem>>, vector<1x8x1024xf32>,
    return
  }
  func.func @transform_0(%arg0: i32) -> (i32, i32, i32) {
    %c0_i32 = arith.constant 0 : i32
    %c0_i32_0 = arith.constant 0 : i32
    %c0_i32_1 = arith.constant 0 : i32
    return %arg0, %c0_i32, %c0_i32_0 : i32, i32, i32
  }
  func.func @transform_1(%arg0: i32) -> (i32, i32) {
    %c0_i32 = arith.constant 0 : i32
    %c0_i32_0 = arith.constant 0 : i32
    %c0_i32_1 = arith.constant 0 : i32
    return %c0_i32, %c0_i32_0 : i32, i32
  }
  func.func @transform_2(%arg0: i32) -> (i32, i32) {
    %c0_i32 = arith.constant 0 : i32
    %c0_i32_0 = arith.constant 0 : i32
    %c0_i32_1 = arith.constant 0 : i32
    return %c0_i32, %c0_i32_0 : i32, i32
  }
  func.func @transform_3(%arg0: i32) -> (i32, i32) {
    %c0_i32 = arith.constant 0 : i32
    %c0_i32_0 = arith.constant 0 : i32
    %c0_i32_1 = arith.constant 0 : i32
    return %c0_i32, %c0_i32_0 : i32, i32
  }
  func.func @transform_4(%arg0: i32) -> (i32, i32) {
    %c0_i32 = arith.constant 0 : i32
    %c0_i32_0 = arith.constant 0 : i32
    %c0_i32_1 = arith.constant 0 : i32
    return %c0_i32, %c0_i32_0 : i32, i32
  }
  func.func @transform_5(%arg0: i32) -> (i32, i32) {
    %c0_i32 = arith.constant 0 : i32
    %c0_i32_0 = arith.constant 0 : i32
    %c0_i32_1 = arith.constant 0 : i32
    return %c0_i32, %c0_i32_0 : i32, i32
  }
  func.func @transform_6(%arg0: i32) -> (i32, i32) {
    %c0_i32 = arith.constant 0 : i32
    %c0_i32_0 = arith.constant 0 : i32
    %c0_i32_1 = arith.constant 0 : i32
    return %c0_i32, %c0_i32_0 : i32, i32
  }
  func.func @transform_7(%arg0: i32) -> (i32, i32) {
    %c0_i32 = arith.constant 0 : i32
    %c0_i32_0 = arith.constant 0 : i32
    %c0_i32_1 = arith.constant 0 : i32
    return %c0_i32, %c0_i32_0 : i32, i32
  }
  func.func @transform_8(%arg0: i32) -> (i32, i32) {
    %c0_i32 = arith.constant 0 : i32
    %c0_i32_0 = arith.constant 0 : i32
    %c0_i32_1 = arith.constant 0 : i32
    return %c0_i32, %c0_i32_0 : i32, i32
  }
  func.func @transform_9(%arg0: i32) -> (i32, i32) {
    %c0_i32 = arith.constant 0 : i32
    %c0_i32_0 = arith.constant 0 : i32
    %c0_i32_1 = arith.constant 0 : i32
    return %c0_i32, %c0_i32_0 : i32, i32
  }
  func.func @transform_10(%arg0: i32) -> (i32, i32) {
    %c0_i32 = arith.constant 0 : i32
    %c0_i32_0 = arith.constant 0 : i32
    %c0_i32_1 = arith.constant 0 : i32
    return %c0_i32, %c0_i32_0 : i32, i32
  }
  func.func @transform_11(%arg0: i32) -> (i32, i32) {
    %c0_i32 = arith.constant 0 : i32
    %c0_i32_0 = arith.constant 0 : i32
    %c0_i32_1 = arith.constant 0 : i32
    return %c0_i32, %c0_i32_0 : i32, i32
  }
  func.func @transform_12(%arg0: i32) -> (i32, i32) {
    %c0_i32 = arith.constant 0 : i32
    %c0_i32_0 = arith.constant 0 : i32
    %c0_i32_1 = arith.constant 0 : i32
    return %c0_i32, %c0_i32_0 : i32, i32
  }
  func.func @transform_13(%arg0: i32) -> (i32, i32) {
    %c0_i32 = arith.constant 0 : i32
    %c0_i32_0 = arith.constant 0 : i32
    %c0_i32_1 = arith.constant 0 : i32
    return %c0_i32, %c0_i32_0 : i32, i32
  }
  func.func @transform_14(%arg0: i32) -> (i32, i32) {
    %c0_i32 = arith.constant 0 : i32
    %c0_i32_0 = arith.constant 0 : i32
    %c0_i32_1 = arith.constant 0 : i32
    return %c0_i32, %c0_i32_0 : i32, i32
  }
  func.func @transform_15(%arg0: i32) -> (i32, i32) {
    %c0_i32 = arith.constant 0 : i32
    %c0_i32_0 = arith.constant 0 : i32
    %c0_i32_1 = arith.constant 0 : i32
    return %c0_i32, %c0_i32_0 : i32, i32
  }
  func.func @transform_16(%arg0: i32) -> (i32, i32) {
    %c0_i32 = arith.constant 0 : i32
    %c0_i32_0 = arith.constant 0 : i32
    %c0_i32_1 = arith.constant 0 : i32
    return %c0_i32, %c0_i32_0 : i32, i32
  }
  func.func @transform_17(%arg0: i32) -> (i32, i32) {
    %c0_i32 = arith.constant 0 : i32
    %c0_i32_0 = arith.constant 0 : i32
    %c0_i32_1 = arith.constant 0 : i32
    return %c0_i32, %c0_i32_0 : i32, i32
  }
  func.func @transform_18(%arg0: i32) -> (i32, i32) {
    %c0_i32 = arith.constant 0 : i32
    %c0_i32_0 = arith.constant 0 : i32
    %c0_i32_1 = arith.constant 0 : i32
    return %c0_i32, %c0_i32_0 : i32, i32
  }
  func.func @transform_19(%arg0: i32) -> (i32, i32) {
    %c0_i32 = arith.constant 0 : i32
    %c0_i32_0 = arith.constant 0 : i32
    %c0_i32_1 = arith.constant 0 : i32
    return %c0_i32, %c0_i32_0 : i32, i32
  }
  func.func @transform_20(%arg0: i32) -> (i32, i32) {
    %c0_i32 = arith.constant 0 : i32
    %c0_i32_0 = arith.constant 0 : i32
    %c0_i32_1 = arith.constant 0 : i32
    return %c0_i32, %c0_i32_0 : i32, i32
  }
  func.func @transform_21(%arg0: i32) -> (i32, i32) {
    %c0_i32 = arith.constant 0 : i32
    %c0_i32_0 = arith.constant 0 : i32
    %c0_i32_1 = arith.constant 0 : i32
    return %c0_i32, %c0_i32_0 : i32, i32
  }
  func.func @transform_22(%arg0: i32) -> (i32, i32) {
    %c0_i32 = arith.constant 0 : i32
    %c0_i32_0 = arith.constant 0 : i32
    %c0_i32_1 = arith.constant 0 : i32
    return %c0_i32, %c0_i32_0 : i32, i32
  }
  func.func @transform_23(%arg0: i32) -> (i32, i32) {
    %c0_i32 = arith.constant 0 : i32
    %c0_i32_0 = arith.constant 0 : i32
    %c0_i32_1 = arith.constant 0 : i32
    return %c0_i32, %c0_i32_0 : i32, i32
  }
  func.func @transform_24(%arg0: i32) -> (i32, i32) {
    %c0_i32 = arith.constant 0 : i32
    %c0_i32_0 = arith.constant 0 : i32
    %c0_i32_1 = arith.constant 0 : i32
    return %c0_i32, %c0_i32_0 : i32, i32
  }
  func.func @transform_25(%arg0: i32) -> (i32, i32) {
    %c0_i32 = arith.constant 0 : i32
    %c0_i32_0 = arith.constant 0 : i32
    %c0_i32_1 = arith.constant 0 : i32
    return %c0_i32, %c0_i32_0 : i32, i32
  }
  func.func @transform_26(%arg0: i32) -> (i32, i32) {
    %c0_i32 = arith.constant 0 : i32
    %c0_i32_0 = arith.constant 0 : i32
    %c0_i32_1 = arith.constant 0 : i32
    return %c0_i32, %c0_i32_0 : i32, i32
  }
  func.func @transform_27(%arg0: i32) -> (i32, i32) {
    %c0_i32 = arith.constant 0 : i32
    %c0_i32_0 = arith.constant 0 : i32
    %c0_i32_1 = arith.constant 0 : i32
    return %c0_i32, %c0_i32_0 : i32, i32
  }
  func.func @transform_28(%arg0: i32) -> (i32, i32) {
    %c0_i32 = arith.constant 0 : i32
    %c0_i32_0 = arith.constant 0 : i32
    %c0_i32_1 = arith.constant 0 : i32
    return %c0_i32, %c0_i32_0 : i32, i32
  }
  func.func @transform_29(%arg0: i32) -> (i32, i32) {
    %c0_i32 = arith.constant 0 : i32
    %c0_i32_0 = arith.constant 0 : i32
    %c0_i32_1 = arith.constant 0 : i32
    return %c0_i32, %c0_i32_0 : i32, i32
  }
  func.func @transform_30(%arg0: i32) -> (i32, i32) {
    %c0_i32 = arith.constant 0 : i32
    %c0_i32_0 = arith.constant 0 : i32
    %c0_i32_1 = arith.constant 0 : i32
    return %c0_i32, %c0_i32_0 : i32, i32
  }
  func.func @transform_31(%arg0: i32) -> (i32, i32, i32) {
    %c0_i32 = arith.constant 0 : i32
    %c0_i32_0 = arith.constant 0 : i32
    %c0_i32_1 = arith.constant 0 : i32
    return %arg0, %c0_i32, %c0_i32_0 : i32, i32, i32
  }
}

</mosaic_0001>

<bundles_post_ra>
// kernel: generator_forward.1
= control target key start
LH: loop header
LB: loop body
LE: loop exit
PB: predicated region body
PF: predicated region fallthrough
CT: control target
= control target key end

     0   :  { %s5788_s6 = smov 1   ;;  %s5789_s10 = smov 2   ;;  %s9326_s0 = inlined_call_operand.smem [shape: u32[32], index: -1, kind: input, shape index: {}] }
   0x1   :  { %s5853_s5 = sld [smem:[%s9326_s0]]   ;;  %s5790_s14 = smov 3  }
   0x2   :  { %s5858_s9 = sld [smem:[%s9326_s0 + %s5788_s6]]   ;;  %s5791_s18 = smov 4  }
   0x3   :  { %s5863_s13 = sld [smem:[%s9326_s0 + %s5789_s10]]   ;;  %s5792_s22 = smov 5  }
   0x4   :  { %s5868_s17 = sld [smem:[%s9326_s0 + %s5790_s14]]   ;;  %s5793_s26 = smov 6  }
   0x5   :  { %s5873_s21 = sld [smem:[%s9326_s0 + %s5791_s18]]   ;;  %s5794_s30 = smov 7  }
   0x6   :  { %s5878_s25 = sld [smem:[%s9326_s0 + %s5792_s22]]   ;;  %s5795_s4 = smov 8  }
   0x7   :  { %9437 = sst [smem:[#allocation9_spill]] %s5853_s5  ;;  %s5796_s10 = smov 9  }
   0x8   :  { %s5883_s29 = sld [smem:[%s9326_s0 + %s5793_s26]]   ;;  %s5797_s15 = smov 10  }
   0x9   :  { %s5888_s3 = sld [smem:[%s9326_s0 + %s5794_s30]]   ;;  %s5798_s20 = smov 11  }
   0xa   :  { %s5893_s8 = sld [smem:[%s9326_s0 + %s5795_s4]]   ;;  %s5799_s26 = smov 12  }
   0xb   :  { %s5898_s14 = sld [smem:[%s9326_s0 + %s5796_s10]]   ;;  %s5800_s1 = smov 13  }
   0xc   :  { %s5903_s19 = sld [smem:[%s9326_s0 + %s5797_s15]]   ;;  %s5801_s7 = smov 14  }
   0xd   :  { %s5908_s24 = sld [smem:[%s9326_s0 + %s5798_s20]]   ;;  %s5802_s15 = smov 15  }
   0xe   :  { %s5913_s30 = sld [smem:[%s9326_s0 + %s5799_s26]]   ;;  %s5803_s22 = smov 16  }
   0xf   :  { %9438 = sst [smem:[#allocation10_spill]] %s5888_s3  ;;  %s5804_s28 = smov 17  }
  0x10   :  { %9439 = sst [smem:[#allocation11_spill]] %s5893_s8 }
  0x11   :  { %s5918_s6 = sld [smem:[%s9326_s0 + %s5800_s1]]  }
  0x12   :  { %s5923_s12 = sld [smem:[%s9326_s0 + %s5801_s7]]   ;;  %s5805_s7 = smov 18  }
  0x13   :  { %s5928_s20 = sld [smem:[%s9326_s0 + %s5802_s15]]   ;;  %s5806_s15 = smov 19  }
  0x14   :  { %s5933_s27 = sld [smem:[%s9326_s0 + %s5803_s22]]   ;;  %s5807_s22 = smov 20  }
  0x15   :  { %s5938_s4 = sld [smem:[%s9326_s0 + %s5804_s28]]   ;;  %s5808_s28 = smov 21  }
  0x18   :  { %9440 = sst [smem:[#allocation12_spill]] %s5923_s12 }
  0x19   :  { %9441 = sst [smem:[#allocation13_spill]] %s5928_s20 }
  0x1a   :  { %9442 = sst [smem:[#allocation14_spill]] %s5933_s27 }
  0x1b   :  { %9443 = sst [smem:[#allocation15_spill]] %s5938_s4 }
  0x1c   :  { %s5943_s12 = sld [smem:[%s9326_s0 + %s5805_s7]]   ;;  %s5809_s7 = smov 22  }
  0x1d   :  { %s5948_s20 = sld [smem:[%s9326_s0 + %s5806_s15]]   ;;  %s5810_s15 = smov 23  }
  0x1e   :  { %s5953_s27 = sld [smem:[%s9326_s0 + %s5807_s22]]   ;;  %s5811_s22 = smov 24  }
  0x1f   :  { %s5958_s4 = sld [smem:[%s9326_s0 + %s5808_s28]]   ;;  %s5812_s28 = smov 25  }
  0x22   :  { %9444 = sst [smem:[#allocation16_spill]] %s5943_s12 }
  0x23   :  { %9445 = sst [smem:[#allocation17_spill]] %s5948_s20 }
  0x24   :  { %9446 = sst [smem:[#allocation18_spill]] %s5953_s27 }
  0x25   :  { %9447 = sst [smem:[#allocation19_spill]] %s5958_s4 }
  0x26   :  { %s5963_s12 = sld [smem:[%s9326_s0 + %s5809_s7]]   ;;  %s5813_s7 = smov 26  }
  0x27   :  { %s5968_s20 = sld [smem:[%s9326_s0 + %s5810_s15]]   ;;  %s5814_s15 = smov 27  }
  0x28   :  { %s5973_s27 = sld [smem:[%s9326_s0 + %s5811_s22]]   ;;  %s5815_s22 = smov 28  }
  0x29   :  { %s5978_s4 = sld [smem:[%s9326_s0 + %s5812_s28]]   ;;  %s5816_s28 = smov 29  }
  0x2a   :  { %s5993_s8 = sld [smem:[%s9326_s0 + %s5815_s22]]  }
  0x2c   :  { %9448 = sst [smem:[#allocation20_spill]] %s5963_s12 }
  0x2d   :  { %9449 = sst [smem:[#allocation21_spill]] %s5968_s20 }
  0x2e   :  { %s5983_s12 = sld [smem:[%s9326_s0 + %s5813_s7]]   ;;  %s5817_s7 = smov 30  }
  0x2f   :  { %9450 = sst [smem:[#allocation22_spill]] %s5978_s4 }
  0x30   :  { %s5988_s20 = sld [smem:[%s9326_s0 + %s5814_s15]]   ;;  %s5818_s15 = smov 31  }
  0x31   :  { %s5998_s4 = sld [smem:[%s9326_s0 + %s5816_s28]]  }
  0x34   :  { %9451 = sst [smem:[#allocation23_spill]] %s5983_s12 }
  0x35   :  { %s6003_s12 = sld [smem:[%s9326_s0 + %s5817_s7]]  }
  0x36   :  { %9452 = sst [smem:[#allocation24_spill]] %s5988_s20 }
  0x37   :  { %s6008_s20 = sld [smem:[%s9326_s0 + %s5818_s15]]  }
  0x38   :  { %68 = vsyncpa [#allocation3], 0 }
  0x39   :  { %69 = vsyncpa [#allocation5], 0  ;;  %s6010_s22 = smov 0  }
  0x3a LB: > { %s9453_s3 = sld [smem:[#allocation10_spill]]  ;;  %s5819_s23 = smov [#allocation4]   ;;  %s5786_s22 = sphi %s6010_s22, %s75_s22  }
  0x3b   : > { %s817_s26 = sshll.u32 %s5819_s23, 4  ;;  %s6016_s28 = sadd.s32 4294967295, %s5786_s22   ;;  %s818_s26 = int_to_ptr.vmem [resolvable:$true] %s817_s26 }
  0x3c   : > { %p5344_p0 = scmp.ge.s32.totalorder %s5786_s22, 1  ;;  %p762_p1 = scmp.lt.s32.totalorder %s5786_s22, 3 }
  0x3d   : > { %p5565_p2 = scmp.eq.s32.totalorder %s6016_s28, 0  ;;  %s5820_s1 = smov [#allocation2]  }
  0x3e   : > { %p6021_p3 = pnand %p5344_p0, %p762_p1  ;;  %s804_s2 = sshll.u32 %s5820_s1, 4  ;;  %s6027_s2 = int_to_ptr.vmem [resolvable:$true] %s804_s2 }
  0x3f   : > { %s5821_s10 = smov [#allocation6]   ;;  %s5705_s15 = scalar_lea.vmem %s818_s26, 9216 }
  0x40   : > { %p5555_p4 = pneg %p6021_p3  ;;  %s6035_s11 = sshll.u32 %s5821_s10, 4  ;;  %s864_s11 = int_to_ptr.vmem [resolvable:$true] %s6035_s11 }
  0x41   : > { %p5706_p7 = scmp.ne.s32.totalorder %s818_s26, %s5705_s15  ;;  %p5713_p10 = scmp.lt.s32.totalorder %s818_s26, %s818_s26 }
  0x42   : > { %p6031_p5 = pnand %p5565_p2, %p5555_p4  ;;  %p5714_p11 = scmp.lt.s32.totalorder %s5705_s15, %s5705_s15 }
  0x44   : > { %p5696_p6 = pneg %p6031_p5  ;;  %p5715_p12 = por %p5714_p11, %p5713_p10 }
  0x46   : > { %p5708_p8 = pnand %p5706_p7, %p5696_p6 }
  0x48   : > { %p5709_p9 = pneg %p5708_p8 }
  0x4a   : > { %p5716_p13 = pnand %p5715_p12, %p5709_p9 }
  0x4c   : > { %5719 = shalt.err (!%p5716_p13)
}
  0x4d   : > { %s5822_s16 = smov 256   ;;  %s5823_s18 = smov 16  }
  0x4e   : > { %5561 = dma.hbm_to_vmem [thread:$0]  (!%p6031_p5), %s5913_s30, 9216, %s818_s26, [#allocation5], %s5822_s16, %s5822_s16, %s5823_s18  }
  0x4f   : > { %s5731_s23 = scalar_lea.vmem %s6027_s2, 1024  ;;  %p5739_p7 = scmp.lt.s32.totalorder %s6027_s2, %s6027_s2 }
  0x50   : > { %p5732_p0 = scmp.ne.s32.totalorder %s6027_s2, %s5731_s23  ;;  %p5740_p8 = scmp.lt.s32.totalorder %s5731_s23, %s5731_s23 }
  0x52   : > { %p5734_p1 = pnand %p5732_p0, %p5696_p6  ;;  %p5741_p9 = por %p5740_p8, %p5739_p7 }
  0x54   : > { %p5735_p4 = pneg %p5734_p1 }
  0x56   : > { %p5742_p10 = pnand %p5741_p9, %p5735_p4 }
  0x58   : > { %5745 = shalt.err (!%p5742_p10)
}
  0x59   : > { %s5824_s1 = smov 128   ;;  %s5825_s10 = smov 8  }
  0x5a   : > { %5558 = dma.hbm_to_vmem [thread:$0]  (!%p6031_p5), %s5908_s24, 1024, %s6027_s2, [#allocation3], %s5824_s1, %s5824_s1, %s5825_s10  }
  0x5b   : > { %s5757_s26 = scalar_lea.vmem %s864_s11, 16384  ;;  %p5765_p0 = scmp.lt.s32.totalorder %s864_s11, %s864_s11 }
  0x5c   : > { %p5758_p11 = scmp.ne.s32.totalorder %s864_s11, %s5757_s26  ;;  %p5766_p1 = scmp.lt.s32.totalorder %s5757_s26, %s5757_s26 }
  0x5e   : > { %p5760_p12 = pnand %p5758_p11, %p5696_p6  ;;  %p5767_p4 = por %p5766_p1, %p5765_p0 }
  0x60   : > { %p5761_p13 = pneg %p5760_p12 }
  0x62   : > { %p5768_p7 = pnand %p5767_p4, %p5761_p13 }
  0x64   : > { %5771 = shalt.err (!%p5768_p7)
}
  0x65   : > { %s5826_s15 = smov 512   ;;  %s5827_s16 = smov 32  }
  0x66   : > { %5564 = dma.hbm_to_vmem [thread:$0]  (!%p6031_p5), %s5973_s27, 16384, %s864_s11, [#allocation5], %s5826_s15, %s5826_s15, %s5827_s16  }
  0x67   : > { %905 = sbr.rel (%p6021_p3) target bundleno = 2980 (0xba4), region = 144 }
  0x6c   : > { %5777 = dma.done.wait (%p5565_p2), [#allocation3], 1024  }
  0x6d   : > { %5779 = vsyncadd (%p5565_p2), [#allocation3], 4294966272 }
  0x6e   : > { %5781 = dma.done.wait (%p5565_p2), [#allocation5], 25600  }
  0x6f   : > { %5783 = vsyncadd (%p5565_p2), [#allocation5], 4294941696  ;;  %v9332_v0 = vmov 0   ;;  %v1036_v1 = vld [vmem:[%s5863_s13] sm:$0xff]  ;;  %v1037_v3 = vld [vmem:[%s5863_s13 + $0x8] sm:$0xff]  ;;  %s9456_s5 = sld [smem:[#allocation9_spill]] }
  0x70   : > { %5637 = vset.pattern.permute.xlu1 %v9332_v0  ;;  %5636 = vset.pattern.permute.xlu0 %v9332_v0  ;;  %v1008_v2 = vld [vmem:[%s5858_s9] sm:$0xff]  ;;  %v1009_v4 = vld [vmem:[%s5858_s9 + $0x8] sm:$0xff]  ;;  %v5638_v5 = vld [vmem:[#allocation2 + $0x34] ss:$8 sps:$4 sm:$0xff]   ;;  %p993_p2 = scmp.lt.s32.totalorder %s6016_s28, 1  ;;  %vm1185_vm0 = vcmask 523264  }
  0x71   : > { %1227 = vmatprep.mubr.bf16.mxu1 %v9332_v0  ;;  %1042 = vperm.xlu1 %5637, %v1036_v1   ;;  %v5640_v6 = vld [vmem:[#allocation2 + $0x30] ss:$8 sps:$4 sm:$0xff]   ;;  %v5641_v8 = vld [vmem:[#allocation2 + $0x24] ss:$8 sps:$4 sm:$0xff]   ;;  %v5643_v10 = vld [vmem:[#allocation2 + $0x20] ss:$8 sps:$4 sm:$0xff]  }
  0x72   : > { %1014 = vperm.xlu0 %5636, %v1008_v2   ;;  %v1011_v7 = vld [vmem:[%s5858_s9 + $0x18] sm:$0xff]  ;;  %v1010_v9 = vld [vmem:[%s5858_s9 + $0x10] sm:$0xff]  ;;  %1203 = vmatprep.subr.bf16.mxu1 %v5638_v5  ;;  %v5647_v15 = vld [vmem:[#allocation2 + $0x4] ss:$8 sps:$4 sm:$0xff]   ;;  %s9674_s28 = smov (!%p993_p2, %s6016_s28), 1  ;;  %v5829_v44 = vmov 0.0  }
  0x73   : > { %1204 = vmatpush1.bf16.msra.mxu1 %v5640_v6  ;;  %v1039_v11 = vld [vmem:[%s5863_s13 + $0x18] sm:$0xff]  ;;  %v1038_v12 = vld [vmem:[%s5863_s13 + $0x10] sm:$0xff]  ;;  %v5649_v16 = vld [vmem:[#allocation2] ss:$8 sps:$4 sm:$0xff]   ;;  %s5530_s0 = sshll.u32 %s9674_s28, 5  ;;  %5535 = vmatprep.subr.bf16.mxu0 %v5829_v44  ;;  %vm1089_vm1 = vcmask 261120  }
  0x74   : > { %1205 = vmatprep.subr.bf16.mxu1 %v5641_v8  ;;  %v5644_v13 = vld [vmem:[#allocation2 + $0x14] ss:$8 sps:$4 sm:$0xff]   ;;  %v5646_v14 = vld [vmem:[#allocation2 + $0x10] ss:$8 sps:$4 sm:$0xff]   ;;  %v5650_v46 = vld [vmem:[%s5898_s14] sm:$0xff]   ;;  %vm5830_vm2 = vmmov 0  }
  0x75   : > { %1047 = vperm.xlu1 %5637, %v1037_v3   ;;  %s997_s2 = scalar_lea.vmem %s9456_s5, %s5530_s0  ;;  %5539 = vmatprep.mubr.msk.bf16.mxu0 %vm5830_vm2, %v5829_v44  ;;  %s9344_s7 = smov 1   ;;  %v1072_v59 = vld [vmem:[%s5903_s19] sm:$0xff]  ;;  %v1073_v60 = vld [vmem:[%s5903_s19 + $0x8] sm:$0xff]  ;;  %vm2005_vm11 = vcmask 130048   ;;  %vm4474_vm2 = vcmask 1043456  }
  0x76   : > { %1019 = vperm.xlu0 %5636, %v1009_v4   ;;  %v1004_v17 = vld [vmem:[%s997_s2] sm:$0xff]  ;;  %v1005_v21 = vld [vmem:[%s997_s2 + $0x8] sm:$0xff]  ;;  %v1007_v28 = vld [vmem:[%s997_s2 + $0x18] sm:$0xff]  ;;  %s5832_s11 = smov 7   ;;  %s5833_s18 = smov 8  }
  0x77   : > { %1206 = vmatpush1.bf16.msra.mxu1 %v5643_v10  ;;  %v1006_v30 = vld [vmem:[%s997_s2 + $0x10] sm:$0xff]  ;;  %v1070_v45 = vpack.c.bf16 %v1005_v21, %v1004_v17  ;;  %s5834_s23 = smov 9   ;;  %s5835_s1 = smov 120   ;;  %v1644_v5 = vld [vmem:[%s5873_s21] sm:$0xff]  ;;  %v1645_v10 = vld [vmem:[%s5873_s21 + $0x8] sm:$0xff] }
  0x78   : > { %1207 = vmatprep.subr.bf16.mxu1 %v5644_v13  ;;  %v1071_v43 = vpack.c.bf16 %v1007_v28, %v1006_v30  ;;  %s5836_s10 = smov 121   ;;  %s9338_s26 = smov 127   ;;  %v5653_v8 = vld [vmem:[%s5868_s17 + $0x4] ss:$12 sps:$4 sm:$0xff]  }
  0x79   : > { %1029 = vperm.xlu1 %5637, %v1011_v7   ;;  %s5838_s15 = smov 119   ;;  %v1776_v13 = vld [vmem:[%s5883_s29] sm:$0xff]  ;;  %s9466_s16 = sld [smem:[#allocation11_spill]] }
  0x7a   : > { %1024 = vperm.xlu0 %5636, %v1010_v9   ;;  %5536 = vmatpush3.bf16.msra.mxu0 %v1071_v43  ;;  %v1760_v9 = vld [vmem:[%s5878_s25] sm:$0xff]  ;;  %v1489_v43 = vld [vmem:[#allocation4 + $0xe8] sm:$0xff]  ;;  %s9467_s0 = sld [smem:[#allocation12_spill]] }
  0x7b   : > { %1208 = vmatpush1.bf16.msra.mxu1 %v5646_v14  ;;  %5537 = vmatprep.subr.bf16.mxu0 %v5829_v44  ;;  %s9468_s2 = sld [smem:[#allocation13_spill]] }
  0x7c   : > { %1209 = vmatprep.subr.bf16.mxu1 %v5647_v15  ;;  %s9581_s5 = sld [smem:[#allocation23_spill]] }
  0x7d   : > { %1057 = vperm.xlu1 %5637, %v1039_v11  }
  0x7e   : > { %1052 = vperm.xlu0 %5636, %v1038_v12   ;;  %5538 = vmatpush3.bf16.msra.mxu0 %v1070_v45 }
  0x7f   : > { %1210 = vmatpush1.bf16.msra.mxu1 %v5649_v16  ;;  %v1761_v16 = vld [vmem:[%s5878_s25 + $0x8] sm:$0xff] }
  0x81   : > { %5540 = vmatmul.mubr.msk.bf16.vlgmr.msra.gmra.mxu0 %vm1089_vm1, %v5650_v46  ;;  %v1490_v46 = vld [vmem:[#allocation4 + $0xf0] sm:$0xff] }
  0x82   : > { %1706 = vmatprep.mubr.bf16.mxu0 %v5653_v8  ;;  %v1486_v8 = vld [vmem:[#allocation4 + $0xd0] sm:$0xff] }
  0xec   : > { %v1043_v18 = vpop.permute.xlu1 %1042 }
  0xed   : > { %v1015_v19 = vpop.permute.xlu0 %1014 }
  0xee   : > { %v1032_v20 = vmul.f32 %v1015_v19, %v1004_v17  ;;  %v1777_v19 = vld [vmem:[%s5883_s29 + $0x8] sm:$0xff] }
  0xf0   : > { %v1048_v22 = vpop.permute.xlu1 %1047  ;;  %v1060_v24 = vadd.f32 %v1043_v18, %v1032_v20 }
  0xf1   : > { %v1020_v23 = vpop.permute.xlu0 %1019 }
  0xf2   : > { %v1033_v25 = vmul.f32 %v1020_v23, %v1005_v21  ;;  %v1064_v31 = vmax.f32 %v1060_v24, 0.0 }
  0xf4   : > { %v1061_v26 = vadd.f32 %v1048_v22, %v1033_v25  ;;  %v1030_v27 = vpop.permute.xlu1 %1029 }
  0xf5   : > { %v1025_v29 = vpop.permute.xlu0 %1024  ;;  %v1035_v34 = vmul.f32 %v1030_v27, %v1007_v28 }
  0xf6   : > { %v1065_v32 = vmax.f32 %v1061_v26, 0.0  ;;  %v1034_v35 = vmul.f32 %v1025_v29, %v1006_v30 }
  0xf8   : > { %v1134_v33 = vpack.c.bf16 %v1065_v32, %v1064_v31  ;;  %v1058_v36 = vpop.permute.xlu1 %1057 }
  0xf9   : > { %v1053_v37 = vpop.permute.xlu0 %1052  ;;  %v1063_v38 = vadd.f32 %v1058_v36, %v1035_v34  ;;  %v1274_v34 = vlaneseq }
  0xfa   : > { %v1062_v39 = vadd.f32 %v1053_v37, %v1034_v35  ;;  %5367 = vmatmul.mubr.msk.bf16.vlgmr.msra.gmra.mxu1 %vm1185_vm0, %v1134_v33 }
  0xfb   : > { %1237 = vmatprep.mubr.bf16.mxu1 %v9332_v0  ;;  %v1067_v40 = vmax.f32 %v1063_v38, 0.0  ;;  %v6305_v37 = vand.u32 127, %v1274_v34 }
  0xfc   : > { %v1066_v41 = vmax.f32 %v1062_v39, 0.0 }
  0xfd   : > { %vm1351_vm3 = vcmp.lt.s32.totalorder %v6305_v37, 1  ;;  %vm1326_vm4 = vcmp.lt.s32.totalorder %v6305_v37, 7  ;;  %vm1301_vm5 = vcmp.lt.s32.totalorder %v6305_v37, 8  ;;  %vm1276_vm6 = vcmp.lt.s32.totalorder %v6305_v37, 9 }
  0xfe   : > { %v1135_v42 = vpack.c.bf16 %v1067_v40, %v1066_v41  ;;  %v1487_v40 = vld [vmem:[#allocation4 + $0xd8] sm:$0xff]  ;;  %vm1426_vm7 = vcmp.lt.s32.totalorder %v6305_v37, 120  ;;  %vm1401_vm8 = vcmp.lt.s32.totalorder %v6305_v37, 121  ;;  %vm1376_vm9 = vcmp.lt.s32.totalorder %v6305_v37, 127 }
  0xff   : > { %vm1451_vm10 = vcmp.lt.s32.totalorder %v6305_v37, 119  ;;  %vm3445_vm12 = vcmp.lt.s32.totalorder %v6305_v37, 112  ;;  %vm3396_vm13 = vcmp.lt.s32.totalorder %v6305_v37, 113  ;;  %vm3251_vm14 = vcmp.lt.s32.totalorder %v6305_v37, 15 }
 0x100   : > { %vm3202_vm15 = vcmp.lt.s32.totalorder %v6305_v37, 16 }
 0x102   : > { %5368 = vmatmul.mubr.msk.bf16.gmra.mxu1 %vm1185_vm0, %v1135_v42  ;;  %v1488_v42 = vld [vmem:[#allocation4 + $0xe0] sm:$0xff] }
 0x103   : > { %1247 = vmatprep.mubr.bf16.mxu1 %v9332_v0  ;;  %v1484_v0 = vld [vmem:[#allocation4 + $0xc0] sm:$0xff] }
 0x141   : > { %v6214_v55 = vpop.f32.mrf.mxu0 }
 0x143   : > { %v5541_v56 = vpop.f32.mrf.mxu0 }
 0x144   : > { %v1491_v56 = vld [vmem:[#allocation4 + $0xf8] sm:$0xff] }
 0x145   : > { %v6220_v57 = vpop.f32.mrf.mxu0 }
 0x147   : > { %v5542_v58 = vpop.f32.mrf.mxu0 }
 0x1ba   : > { %v6096_v47 = vpop.f32.mrf.mxu1 }
 0x1bb   : > { %9457 = vst [vmem:[#allocation25_spill] sm:$0xff] %v6096_v47  ;;  %1335 = vrot.lane.b32.xlu0 %v6096_v47, %s9344_s7 }
 0x1bc   : > { %v6100_v48 = vpop.f32.mrf.mxu1 }
 0x1bd   : > { %9458 = vst [vmem:[#allocation26_spill] sm:$0xff] %v6100_v48 }
 0x1be   : > { %v6102_v49 = vpop.f32.mrf.mxu1 }
 0x1bf   : > { %9459 = vst [vmem:[#allocation27_spill] sm:$0xff] %v6102_v49  ;;  %1310 = vrot.lane.b32.xlu0 %v6096_v47, %s5832_s11  ;;  %1337 = vrot.lane.b32.xlu1 %v6102_v49, %s9344_s7 }
 0x1c0   : > { %v6124_v50 = vpop.f32.mrf.mxu1 }
 0x1c2   : > { %v6138_v51 = vpop.f32.mrf.mxu1 }
 0x1c3   : > { %1285 = vrot.lane.b32.xlu0 %v6096_v47, %s5833_s18  ;;  %1312 = vrot.lane.b32.xlu1 %v6102_v49, %s5832_s11  ;;  %9460 = vst [vmem:[#allocation28_spill] sm:$0xff] %v6138_v51 }
 0x1c4   : > { %v6144_v52 = vpop.f32.mrf.mxu1 }
 0x1c6   : > { %v6150_v53 = vpop.f32.mrf.mxu1 }
 0x1c7   : > { %1258 = vrot.lane.b32.xlu0 %v6096_v47, %s5834_s23  ;;  %1287 = vrot.lane.b32.xlu1 %v6102_v49, %s5833_s18 }
 0x1c8   : > { %v6176_v54 = vpop.f32.mrf.mxu1 }
 0x1cb   : > { %1410 = vrot.lane.b32.xlu0 %v6096_v47, %s5835_s1  ;;  %1260 = vrot.lane.b32.xlu1 %v6102_v49, %s5834_s23 }
 0x1cf   : > { %1343 = vrot.lane.b32.xlu0 %v6100_v48, %s9344_s7  ;;  %1412 = vrot.lane.b32.xlu1 %v6102_v49, %s5835_s1 }
 0x1d3   : > { %1318 = vrot.lane.b32.xlu0 %v6100_v48, %s5832_s11  ;;  %1345 = vrot.lane.b32.xlu1 %v6124_v50, %s9344_s7 }
 0x1d7   : > { %1293 = vrot.lane.b32.xlu0 %v6100_v48, %s5833_s18  ;;  %1320 = vrot.lane.b32.xlu1 %v6124_v50, %s5832_s11 }
 0x1db   : > { %1266 = vrot.lane.b32.xlu0 %v6100_v48, %s5834_s23  ;;  %1295 = vrot.lane.b32.xlu1 %v6124_v50, %s5833_s18 }
 0x1df   : > { %1418 = vrot.lane.b32.xlu0 %v6100_v48, %s5835_s1  ;;  %1268 = vrot.lane.b32.xlu1 %v6124_v50, %s5834_s23 }
 0x1e3   : > { %1420 = vrot.lane.b32.xlu1 %v6124_v50, %s5835_s1  ;;  %1339 = vrot.lane.b32.xlu0 %v6138_v51, %s9344_s7 }
 0x1e7   : > { %1314 = vrot.lane.b32.xlu0 %v6138_v51, %s5832_s11  ;;  %1341 = vrot.lane.b32.xlu1 %v6150_v53, %s9344_s7 }
 0x1eb   : > { %1289 = vrot.lane.b32.xlu0 %v6138_v51, %s5833_s18  ;;  %1316 = vrot.lane.b32.xlu1 %v6150_v53, %s5832_s11 }
 0x1ef   : > { %1262 = vrot.lane.b32.xlu0 %v6138_v51, %s5834_s23  ;;  %1291 = vrot.lane.b32.xlu1 %v6150_v53, %s5833_s18 }
 0x1f3   : > { %1414 = vrot.lane.b32.xlu0 %v6138_v51, %s5835_s1  ;;  %1264 = vrot.lane.b32.xlu1 %v6150_v53, %s5834_s23 }
 0x1f7   : > { %1389 = vrot.lane.b32.xlu0 %v6138_v51, %s5836_s10  ;;  %1416 = vrot.lane.b32.xlu1 %v6150_v53, %s5835_s1 }
 0x1fb   : > { %1347 = vrot.lane.b32.xlu0 %v6144_v52, %s9344_s7  ;;  %1391 = vrot.lane.b32.xlu1 %v6150_v53, %s5836_s10 }
 0x1ff   : > { %1385 = vrot.lane.b32.xlu0 %v6096_v47, %s5836_s10  ;;  %1349 = vrot.lane.b32.xlu1 %v6176_v54, %s9344_s7 }
 0x203   : > { %1322 = vrot.lane.b32.xlu0 %v6144_v52, %s5832_s11  ;;  %1387 = vrot.lane.b32.xlu1 %v6102_v49, %s5836_s10 }
 0x207   : > { %1297 = vrot.lane.b32.xlu0 %v6144_v52, %s5833_s18  ;;  %1324 = vrot.lane.b32.xlu1 %v6176_v54, %s5832_s11 }
 0x20b   : > { %1270 = vrot.lane.b32.xlu0 %v6144_v52, %s5834_s23  ;;  %1395 = vrot.lane.b32.xlu1 %v6124_v50, %s5836_s10 }
 0x20f   : > { %1422 = vrot.lane.b32.xlu0 %v6144_v52, %s5835_s1  ;;  %1299 = vrot.lane.b32.xlu1 %v6176_v54, %s5833_s18 }
 0x213   : > { %1397 = vrot.lane.b32.xlu0 %v6144_v52, %s5836_s10  ;;  %1366 = vrot.lane.b32.xlu1 %v6150_v53, %s9338_s26 }
 0x217   : > { %1393 = vrot.lane.b32.xlu0 %v6100_v48, %s5836_s10  ;;  %1272 = vrot.lane.b32.xlu1 %v6176_v54, %s5834_s23 }
 0x21b   : > { %1364 = vrot.lane.b32.xlu0 %v6138_v51, %s9338_s26  ;;  %1362 = vrot.lane.b32.xlu1 %v6102_v49, %s9338_s26 }
 0x21f   : > { %1372 = vrot.lane.b32.xlu0 %v6144_v52, %s9338_s26  ;;  %1424 = vrot.lane.b32.xlu1 %v6176_v54, %s5835_s1 }
 0x223   : > { %1360 = vrot.lane.b32.xlu0 %v6096_v47, %s9338_s26  ;;  %1370 = vrot.lane.b32.xlu1 %v6124_v50, %s9338_s26 }
 0x227   : > { %1368 = vrot.lane.b32.xlu0 %v6100_v48, %s9338_s26  ;;  %1399 = vrot.lane.b32.xlu1 %v6176_v54, %s5836_s10 }
 0x22b   : > { %1076 = vperm.xlu0 %5636, %v1072_v59   ;;  %1081 = vperm.xlu1 %5637, %v1073_v60  }
 0x22d   : > { %v6228_v61 = vpop.permute.xlu0 %1335 }
 0x22f   : > { %1439 = vrot.lane.b32.xlu0 %v6138_v51, %s5838_s15  ;;  %1374 = vrot.lane.b32.xlu1 %v6176_v54, %s9338_s26 }
 0x231   : > { %v6234_v62 = vpop.permute.xlu0 %1310  ;;  %v6236_v63 = vpop.permute.xlu1 %1337 }
 0x233   : > { %1447 = vrot.lane.b32.xlu0 %v6144_v52, %s5838_s15  ;;  %1441 = vrot.lane.b32.xlu1 %v6150_v53, %s5838_s15 }
 0x235   : > { %v6242_v1 = vpop.permute.xlu0 %1285  ;;  %v6244_v2 = vpop.permute.xlu1 %1312 }
 0x237   : > { %1435 = vrot.lane.b32.xlu0 %v6096_v47, %s5838_s15  ;;  %1437 = vrot.lane.b32.xlu1 %v6102_v49, %s5838_s15 }
 0x239   : > { %v6250_v3 = vpop.permute.xlu0 %1258  ;;  %v6252_v4 = vpop.permute.xlu1 %1287 }
 0x23b   : > { %1443 = vrot.lane.b32.xlu0 %v6100_v48, %s5838_s15  ;;  %1449 = vrot.lane.b32.xlu1 %v6176_v54, %s5838_s15 }
 0x23d   : > { %v6259_v6 = vpop.permute.xlu0 %1410  ;;  %v6261_v7 = vpop.permute.xlu1 %1260 }
 0x23f   : > { %1648 = vperm.xlu0 %5636, %v1644_v5   ;;  %1445 = vrot.lane.b32.xlu1 %v6124_v50, %s5838_s15  ;;  %v1485_v5 = vld [vmem:[#allocation4 + $0xc8] sm:$0xff] }
 0x241   : > { %v1344_v11 = vpop.permute.xlu0 %1343  ;;  %v6268_v12 = vpop.permute.xlu1 %1412 }
 0x242   : > { %v1352_v58 = vsel %vm1351_vm3, %v6228_v61, %v1344_v11  ;;  %v1356_v47 = vsel %vm1351_vm3, %v1344_v11, %v6228_v61  ;;  %v1481_v61 = vld [vmem:[#allocation4 + $0xa8] sm:$0xff] }
 0x243   : > { %1764 = vperm.xlu0 %5636, %v1760_v9   ;;  %1653 = vperm.xlu1 %5637, %v1645_v10   ;;  %v1557_v49 = vmul.f32 %v1485_v5, %v1352_v58  ;;  %v1478_v5 = vld [vmem:[#allocation4 + $0x90] sm:$0xff] }
 0x245   : > { %v6271_v14 = vpop.permute.xlu0 %1318  ;;  %v1346_v15 = vpop.permute.xlu1 %1345 }
 0x246   : > { %v1353_v41 = vsel %vm1351_vm3, %v6236_v63, %v1346_v15  ;;  %v1357_v9 = vsel %vm1351_vm3, %v1346_v15, %v6236_v63 }
 0x247   : > { %1780 = vperm.xlu0 %5636, %v1776_v13   ;;  %1769 = vperm.xlu1 %5637, %v1761_v16   ;;  %v1559_v10 = vmul.f32 %v1487_v40, %v1353_v41  ;;  %v1558_v48 = vmul.f32 %v1486_v8, %v1357_v9  ;;  %v1556_v41 = vmul.f32 %v1484_v0, %v1356_v47 }
 0x248   : > { %v1327_v0 = vsel %vm1326_vm4, %v6234_v62, %v6271_v14 }
 0x249   : > { %v6274_v17 = vpop.permute.xlu0 %1293  ;;  %v6276_v18 = vpop.permute.xlu1 %1320  ;;  %v1616_v47 = vpack.c.bf16 %v1558_v48, %v1556_v41  ;;  %v1471_v41 = vld [vmem:[#allocation4 + $0x58] sm:$0xff] }
 0x24a   : > { %v1332_v8 = vsel %vm1326_vm4, %v6276_v18, %v6244_v2 }
 0x24b   : > { %1785 = vperm.xlu1 %5637, %v1777_v19  }
 0x24d   : > { %v6279_v20 = vpop.permute.xlu0 %1266  ;;  %v6281_v21 = vpop.permute.xlu1 %1295 }
 0x251   : > { %v6283_v22 = vpop.permute.xlu0 %1418  ;;  %v6285_v23 = vpop.permute.xlu1 %1268 }
 0x255   : > { %v6287_v24 = vpop.permute.xlu1 %1420  ;;  %v1340_v25 = vpop.permute.xlu0 %1339 }
 0x259   : > { %v1315_v26 = vpop.permute.xlu0 %1314  ;;  %v1342_v27 = vpop.permute.xlu1 %1341 }
 0x25d   : > { %v6289_v28 = vpop.permute.xlu0 %1289  ;;  %v6291_v29 = vpop.permute.xlu1 %1316 }
 0x261   : > { %v6293_v30 = vpop.permute.xlu0 %1262  ;;  %v6295_v31 = vpop.permute.xlu1 %1291 }
 0x265   : > { %v6297_v32 = vpop.permute.xlu0 %1414  ;;  %v6299_v33 = vpop.permute.xlu1 %1264 }
 0x269   : > { %v6301_v35 = vpop.permute.xlu0 %1389  ;;  %v6303_v36 = vpop.permute.xlu1 %1416 }
 0x26d   : > { %v1348_v38 = vpop.permute.xlu0 %1347  ;;  %v6307_v39 = vpop.permute.xlu1 %1391 }
 0x26e   : > { %v1354_v44 = vsel %vm1351_vm3, %v1340_v25, %v1348_v38  ;;  %v1358_v45 = vsel %vm1351_vm3, %v1348_v38, %v1340_v25 }
 0x26f   : > { %v1560_v19 = vmul.f32 %v1488_v42, %v1358_v45  ;;  %v1561_v25 = vmul.f32 %v1489_v43, %v1354_v44  ;;  %v1328_v42 = vsel %vm1326_vm4, %v6244_v2, %v6276_v18  ;;  %v1480_v43 = vld [vmem:[#allocation4 + $0xa0] sm:$0xff]  ;;  %v1617_v44 = vpack.c.bf16 %v1559_v10, %v1557_v49  ;;  %v1477_v49 = vld [vmem:[#allocation4 + $0x88] sm:$0xff] }
 0x270   : > { %v1549_v2 = vmul.f32 %v1477_v49, %v1327_v0  ;;  %v1550_v18 = vmul.f32 %v1478_v5, %v1332_v8 }
 0x271   : > { %v6320_v59 = vpop.permute.xlu0 %1385  ;;  %v1350_v60 = vpop.permute.xlu1 %1349 }
 0x272   : > { %v1355_v13 = vsel %vm1351_vm3, %v1342_v27, %v1350_v60  ;;  %v1359_v16 = vsel %vm1351_vm3, %v1350_v60, %v1342_v27  ;;  %v1479_v27 = vld [vmem:[#allocation4 + $0x98] sm:$0xff] }
 0x273   : > { %v1562_v34 = vmul.f32 %v1490_v46, %v1359_v16  ;;  %v1563_v38 = vmul.f32 %v1491_v56, %v1355_v13  ;;  %v1482_v46 = vld [vmem:[#allocation4 + $0xb0] sm:$0xff]  ;;  %v1483_v56 = vld [vmem:[#allocation4 + $0xb8] sm:$0xff] }
 0x275   : > { %v1618_v51 = vpack.c.bf16 %v1562_v34, %v1560_v19  ;;  %v1323_v63 = vpop.permute.xlu0 %1322  ;;  %v6332_v15 = vpop.permute.xlu1 %1387  ;;  %v1619_v40 = vpack.c.bf16 %v1563_v38, %v1561_v25  ;;  %v1476_v19 = vld [vmem:[#allocation4 + $0x80] sm:$0xff]  ;;  %v1331_v25 = vsel %vm1326_vm4, %v6271_v14, %v6234_v62  ;;  %v1473_v14 = vld [vmem:[#allocation4 + $0x68] sm:$0xff] }
 0x276   : > { %v1329_v11 = vsel %vm1326_vm4, %v1315_v26, %v1323_v63  ;;  %v1333_v45 = vsel %vm1326_vm4, %v1323_v63, %v1315_v26  ;;  %v1551_v26 = vmul.f32 %v1479_v27, %v1328_v42  ;;  %v1303_v27 = vsel %vm1301_vm5, %v6252_v4, %v6281_v21  ;;  %v1472_v42 = vld [vmem:[#allocation4 + $0x60] sm:$0xff] }
 0x277   : > { %1674 = vmatprep.subr.bf16.mxu0 %v1619_v40  ;;  %v1552_v48 = vmul.f32 %v1480_v43, %v1333_v45  ;;  %v1553_v10 = vmul.f32 %v1481_v61, %v1329_v11  ;;  %v1474_v61 = vld [vmem:[#allocation4 + $0x70] sm:$0xff]  ;;  %v1475_v11 = vld [vmem:[#allocation4 + $0x78] sm:$0xff]  ;;  %v1302_v45 = vsel %vm1301_vm5, %v6242_v1, %v6274_v17 }
 0x278   : > { %1675 = vmatpush1.bf16.msra.mxu0 %v1618_v51  ;;  %v1613_v62 = vpack.c.bf16 %v1551_v26, %v1549_v2  ;;  %v1463_v2 = vld [vmem:[#allocation4 + $0x18] sm:$0xff] }
 0x279   : > { %v1298_v58 = vpop.permute.xlu0 %1297  ;;  %1676 = vmatprep.subr.bf16.mxu0 %v1617_v44  ;;  %v1325_v60 = vpop.permute.xlu1 %1324 }
 0x27a   : > { %v1330_v51 = vsel %vm1326_vm4, %v6291_v29, %v1325_v60  ;;  %v1334_v9 = vsel %vm1326_vm4, %v1325_v60, %v6291_v29  ;;  %v1548_v29 = vmul.f32 %v1476_v19, %v1331_v25  ;;  %v1304_v43 = vsel %vm1301_vm5, %v6289_v28, %v1298_v58  ;;  %v1470_v60 = vld [vmem:[#allocation4 + $0x50] sm:$0xff] }
 0x27b   : > { %v1554_v13 = vmul.f32 %v1482_v46, %v1334_v9  ;;  %v1555_v16 = vmul.f32 %v1483_v56, %v1330_v51  ;;  %v1308_v44 = vsel %vm1301_vm5, %v1298_v58, %v6289_v28  ;;  %v1307_v28 = vsel %vm1301_vm5, %v6281_v21, %v6252_v4 }
 0x27c   : > { %1677 = vmatpush1.bf16.msra.mxu0 %v1616_v47  ;;  %v1612_v46 = vpack.c.bf16 %v1550_v18, %v1548_v29  ;;  %v1469_v47 = vld [vmem:[#allocation4 + $0x48] sm:$0xff]  ;;  %v1543_v58 = vmul.f32 %v1471_v41, %v1303_v27  ;;  %v1544_v8 = vmul.f32 %v1472_v42, %v1308_v44  ;;  %v1545_v26 = vmul.f32 %v1473_v14, %v1304_v43  ;;  %v1466_v41 = vld [vmem:[#allocation4 + $0x30] sm:$0xff]  ;;  %v1467_v27 = vld [vmem:[#allocation4 + $0x38] sm:$0xff] }
 0x27d   : > { %v1614_v34 = vpack.c.bf16 %v1554_v13, %v1552_v48  ;;  %v1271_v38 = vpop.permute.xlu0 %1270  ;;  %v6361_v63 = vpop.permute.xlu1 %1395  ;;  %v1615_v40 = vpack.c.bf16 %v1555_v16, %v1553_v10  ;;  %v1468_v48 = vld [vmem:[#allocation4 + $0x40] sm:$0xff]  ;;  %v1306_v10 = vsel %vm1301_vm5, %v6274_v17, %v6242_v1  ;;  %v1541_v4 = vmul.f32 %v1469_v47, %v1302_v45  ;;  %v1465_v17 = vld [vmem:[#allocation4 + $0x28] sm:$0xff]  ;;  %v1462_v44 = vld [vmem:[#allocation4 + $0x10] sm:$0xff] }
 0x27e   : > { %v1542_v21 = vmul.f32 %v1470_v60, %v1307_v28  ;;  %v1278_v18 = vsel %vm1276_vm6, %v6261_v7, %v6285_v23  ;;  %v1283_v29 = vsel %vm1276_vm6, %v1271_v38, %v6293_v30  ;;  %v1277_v42 = vsel %vm1276_vm6, %v6250_v3, %v6279_v20  ;;  %v1461_v43 = vld [vmem:[#allocation4 + $0x8] sm:$0xff]  ;;  %v1460_v28 = vld [vmem:[#allocation4] sm:$0xff] }
 0x27f   : > { %1678 = vmatprep.subr.bf16.mxu0 %v1615_v40  ;;  %v1609_v1 = vpack.c.bf16 %v1543_v58, %v1541_v4  ;;  %v1279_v40 = vsel %vm1276_vm6, %v6293_v30, %v1271_v38 }
 0x280   : > { %1679 = vmatpush1.bf16.msra.mxu0 %v1614_v34  ;;  %v1464_v34 = vld [vmem:[#allocation4 + $0x20] sm:$0xff] }
 0x281   : > { %v6378_v56 = vpop.permute.xlu0 %1422  ;;  %1680 = vmatprep.subr.bf16.mxu0 %v1613_v62  ;;  %v1300_v0 = vpop.permute.xlu1 %1299 }
 0x282   : > { %v1305_v49 = vsel %vm1301_vm5, %v6295_v31, %v1300_v0  ;;  %v1309_v5 = vsel %vm1301_vm5, %v1300_v0, %v6295_v31  ;;  %v1540_v31 = vmul.f32 %v1468_v48, %v1306_v10  ;;  %v1537_v0 = vmul.f32 %v1465_v17, %v1279_v40 }
 0x283   : > { %v1546_v51 = vmul.f32 %v1474_v61, %v1309_v5  ;;  %v1547_v9 = vmul.f32 %v1475_v11, %v1305_v49  ;;  %v1282_v61 = vsel %vm1276_vm6, %v6285_v23, %v6261_v7  ;;  %v1535_v11 = vmul.f32 %v1463_v2, %v1278_v18  ;;  %v1517_v18 = vld [vmem:[#allocation4 + $0x1c8] sm:$0xff] }
 0x284   : > { %1681 = vmatpush1.bf16.msra.mxu0 %v1612_v46  ;;  %v1608_v62 = vpack.c.bf16 %v1542_v21, %v1540_v31  ;;  %v1536_v46 = vmul.f32 %v1464_v34, %v1283_v29  ;;  %v1281_v7 = vsel %vm1276_vm6, %v6279_v20, %v6250_v3  ;;  %v1533_v23 = vmul.f32 %v1461_v43, %v1277_v42  ;;  %v1521_v3 = vld [vmem:[#allocation4 + $0x1e8] sm:$0xff]  ;;  %v1522_v21 = vld [vmem:[#allocation4 + $0x1f0] sm:$0xff]  ;;  %v1516_v42 = vld [vmem:[#allocation4 + $0x1c0] sm:$0xff] }
 0x285   : > { %v1610_v13 = vpack.c.bf16 %v1546_v51, %v1544_v8  ;;  %v6394_v16 = vpop.permute.xlu0 %1397  ;;  %v6396_v19 = vpop.permute.xlu1 %1366  ;;  %v1611_v25 = vpack.c.bf16 %v1547_v9, %v1545_v26  ;;  %v1534_v58 = vmul.f32 %v1462_v44, %v1282_v61  ;;  %v1519_v26 = vld [vmem:[#allocation4 + $0x1d8] sm:$0xff]  ;;  %v1432_v51 = vsel %vm1426_vm7, %v6287_v24, %v6268_v12  ;;  %v1520_v9 = vld [vmem:[#allocation4 + $0x1e0] sm:$0xff]  ;;  %v1518_v34 = vld [vmem:[#allocation4 + $0x1d0] sm:$0xff] }
 0x286   : > { %v1605_v48 = vpack.c.bf16 %v1535_v11, %v1533_v23  ;;  %v1429_v20 = vsel %vm1426_vm7, %v6297_v32, %v6378_v56  ;;  %v1433_v10 = vsel %vm1426_vm7, %v6378_v56, %v6297_v32  ;;  %v1428_v32 = vsel %vm1426_vm7, %v6268_v12, %v6287_v24  ;;  %v1512_v11 = vld [vmem:[#allocation4 + $0x1a0] sm:$0xff] }
 0x287   : > { %1682 = vmatprep.subr.bf16.mxu0 %v1611_v25  ;;  %v1431_v25 = vsel %vm1426_vm7, %v6283_v22, %v6259_v6  ;;  %v1591_v56 = vmul.f32 %v1519_v26, %v1432_v51  ;;  %v1592_v40 = vmul.f32 %v1520_v9, %v1429_v20  ;;  %v1593_v29 = vmul.f32 %v1521_v3, %v1433_v10  ;;  %v1510_v20 = vld [vmem:[#allocation4 + $0x190] sm:$0xff] }
 0x288   : > { %1683 = vmatpush1.bf16.msra.mxu0 %v1610_v13  ;;  %v1523_v13 = vld [vmem:[#allocation4 + $0x1f8] sm:$0xff]  ;;  %v1589_v12 = vmul.f32 %v1517_v18, %v1431_v25  ;;  %v1590_v24 = vmul.f32 %v1518_v34, %v1428_v32  ;;  %v1403_v10 = vsel %vm1401_vm8, %v6332_v15, %v6361_v63  ;;  %v1504_v32 = vld [vmem:[#allocation4 + $0x160] sm:$0xff] }
 0x289   : > { %1684 = vmatprep.subr.bf16.mxu0 %v1609_v1  ;;  %v1273_v14 = vpop.permute.xlu1 %1272  ;;  %v6417_v30 = vpop.permute.xlu0 %1393 }
 0x28a   : > { %v1280_v38 = vsel %vm1276_vm6, %v6299_v33, %v1273_v14  ;;  %v1284_v45 = vsel %vm1276_vm6, %v1273_v14, %v6299_v33  ;;  %v1532_v33 = vmul.f32 %v1460_v28, %v1281_v7  ;;  %v1407_v7 = vsel %vm1401_vm8, %v6361_v63, %v6332_v15 }
 0x28b   : > { %v1538_v47 = vmul.f32 %v1466_v41, %v1284_v45  ;;  %v1539_v60 = vmul.f32 %v1467_v27, %v1280_v38  ;;  %v1513_v38 = vld [vmem:[#allocation4 + $0x1a8] sm:$0xff]  ;;  %v1404_v45 = vsel %vm1401_vm8, %v6301_v35, %v6394_v16  ;;  %v1402_v26 = vsel %vm1401_vm8, %v6320_v59, %v6417_v30 }
 0x28c   : > { %1685 = vmatpush1.bf16.msra.mxu0 %v1608_v62  ;;  %v1604_v31 = vpack.c.bf16 %v1534_v58, %v1532_v33  ;;  %v1427_v62 = vsel %vm1426_vm7, %v6259_v6, %v6283_v22  ;;  %v1408_v6 = vsel %vm1401_vm8, %v6394_v16, %v6301_v35  ;;  %v1633_v22 = vpack.c.bf16 %v1591_v56, %v1589_v12  ;;  %v1511_v35 = vld [vmem:[#allocation4 + $0x198] sm:$0xff]  ;;  %v1508_v33 = vld [vmem:[#allocation4 + $0x180] sm:$0xff] }
 0x28d   : > { %v1606_v49 = vpack.c.bf16 %v1538_v47, %v1536_v46  ;;  %v6429_v5 = vpop.permute.xlu1 %1362  ;;  %v1607_v8 = vpack.c.bf16 %v1539_v60, %v1537_v0  ;;  %v6444_v4 = vpop.permute.xlu0 %1364  ;;  %v1588_v61 = vmul.f32 %v1516_v42, %v1427_v62  ;;  %v1509_v46 = vld [vmem:[#allocation4 + $0x188] sm:$0xff]  ;;  %v1406_v0 = vsel %vm1401_vm8, %v6417_v30, %v6320_v59  ;;  %v1514_v47 = vld [vmem:[#allocation4 + $0x1b0] sm:$0xff]  ;;  %v1515_v60 = vld [vmem:[#allocation4 + $0x1b8] sm:$0xff] }
 0x28e   : > { %v1584_v16 = vmul.f32 %v1512_v11, %v1404_v45  ;;  %v1585_v58 = vmul.f32 %v1513_v38, %v1408_v6  ;;  %v1581_v51 = vmul.f32 %v1509_v46, %v1406_v0  ;;  %v1580_v25 = vmul.f32 %v1508_v33, %v1402_v26  ;;  %v1507_v42 = vld [vmem:[#allocation4 + $0x178] sm:$0xff]  ;;  %v1502_v46 = vld [vmem:[#allocation4 + $0x150] sm:$0xff] }
 0x28f   : > { %1686 = vmatprep.subr.bf16.mxu0 %v1607_v8  ;;  %v1632_v28 = vpack.c.bf16 %v1590_v24, %v1588_v61  ;;  %v9461_v6 = vmov 0  }
 0x290   : > { %1687 = vmatpush1.bf16.msra.mxu0 %v1606_v49 }
 0x291   : > { %1688 = vmatprep.subr.bf16.mxu0 %v1605_v48  ;;  %v1425_v2 = vpop.permute.xlu1 %1424 }
 0x292   : > { %v1430_v1 = vsel %vm1426_vm7, %v6303_v36, %v1425_v2  ;;  %v1434_v17 = vsel %vm1426_vm7, %v1425_v2, %v6303_v36  ;;  %v1373_v36 = vpop.permute.xlu0 %1372  ;;  %v1582_v2 = vmul.f32 %v1510_v20, %v1403_v10  ;;  %v1494_v10 = vld [vmem:[#allocation4 + $0x110] sm:$0xff] }
 0x293   : > { %v1594_v41 = vmul.f32 %v1522_v21, %v1430_v1  ;;  %v1595_v27 = vmul.f32 %v1523_v13, %v1434_v17  ;;  %v1583_v21 = vmul.f32 %v1511_v35, %v1407_v7  ;;  %v1379_v15 = vsel %vm1376_vm9, %v6444_v4, %v1373_v36  ;;  %v1505_v1 = vld [vmem:[#allocation4 + $0x168] sm:$0xff] }
 0x294   : > { %1689 = vmatpush1.bf16.msra.mxu0 %v1604_v31  ;;  %v1628_v59 = vpack.c.bf16 %v1582_v2, %v1580_v25  ;;  %v1383_v17 = vsel %vm1376_vm9, %v1373_v36, %v6444_v4  ;;  %v1576_v62 = vmul.f32 %v1504_v32, %v1379_v15  ;;  %v1500_v36 = vld [vmem:[#allocation4 + $0x140] sm:$0xff]  ;;  %v1497_v35 = vld [vmem:[#allocation4 + $0x128] sm:$0xff]  ;;  %v9462_v2 = vld [vmem:[#allocation28_spill] sm:$0xff] }
 0x295   : > { %v1634_v14 = vpack.c.bf16 %v1594_v41, %v1592_v40  ;;  %v6464_v43 = vpop.permute.xlu1 %1370  ;;  %v1635_v44 = vpack.c.bf16 %v1595_v27, %v1593_v29  ;;  %v1629_v31 = vpack.c.bf16 %v1583_v21, %v1581_v51  ;;  %v1501_v40 = vld [vmem:[#allocation4 + $0x148] sm:$0xff]  ;;  %v1506_v27 = vld [vmem:[#allocation4 + $0x170] sm:$0xff]  ;;  %v1496_v51 = vld [vmem:[#allocation4 + $0x120] sm:$0xff] }
 0x296   : > { %v1361_v3 = vpop.permute.xlu0 %1360  ;;  %v1378_v0 = vsel %vm1376_vm9, %v6429_v5, %v6464_v43  ;;  %v9464_v32 = vld [vmem:[#allocation27_spill] sm:$0xff] }
 0x297   : > { %1690 = vmatprep.subr.bf16.mxu0 %v1635_v44  ;;  %v1503_v44 = vld [vmem:[#allocation4 + $0x158] sm:$0xff]  ;;  %v1574_v33 = vmul.f32 %v1502_v46, %v1378_v0  ;;  %v1566_v15 = vmul.f32 %v1494_v10, %v9464_v32 }
 0x298   : > { %1691 = vmatpush2.bf16.msra.mxu0 %v1634_v14  ;;  %v1577_v14 = vmul.f32 %v1505_v1, %v1383_v17 }
 0x299   : > { %1692 = vmatprep.subr.bf16.mxu0 %v1633_v22  ;;  %v1400_v23 = vpop.permute.xlu1 %1399  ;;  %v1499_v22 = vld [vmem:[#allocation4 + $0x138] sm:$0xff] }
 0x29a   : > { %v1405_v49 = vsel %vm1401_vm8, %v6307_v39, %v1400_v23  ;;  %v1409_v8 = vsel %vm1401_vm8, %v1400_v23, %v6307_v39  ;;  %v1369_v30 = vpop.permute.xlu0 %1368 }
 0x29b   : > { %v1586_v9 = vmul.f32 %v1514_v47, %v1405_v49  ;;  %v1587_v48 = vmul.f32 %v1515_v60, %v1409_v8  ;;  %v1381_v29 = vsel %vm1376_vm9, %v1369_v30, %v1361_v3  ;;  %v1377_v61 = vsel %vm1376_vm9, %v1361_v3, %v1369_v30  ;;  %v1498_v49 = vld [vmem:[#allocation4 + $0x130] sm:$0xff]  ;;  %v1495_v8 = vld [vmem:[#allocation4 + $0x118] sm:$0xff]  ;;  %v9463_v30 = vld [vmem:[#allocation26_spill] sm:$0xff] }
 0x29c   : > { %1693 = vmatpush2.bf16.msra.mxu0 %v1632_v28  ;;  %v1573_v11 = vmul.f32 %v1501_v40, %v1381_v29  ;;  %v1572_v23 = vmul.f32 %v1500_v36, %v1377_v61  ;;  %v1570_v3 = vmul.f32 %v1498_v49, %v6150_v53  ;;  %v1567_v20 = vmul.f32 %v1495_v8, %v6124_v50  ;;  %v1492_v50 = vld [vmem:[#allocation4 + $0x100] sm:$0xff] }
 0x29d   : > { %v1630_v13 = vpack.c.bf16 %v1586_v9, %v1584_v16  ;;  %v1631_v39 = vpack.c.bf16 %v1587_v48, %v1585_v58  ;;  %v1571_v58 = vmul.f32 %v1499_v22, %v6176_v54  ;;  %v1493_v9 = vld [vmem:[#allocation4 + $0x108] sm:$0xff]  ;;  %v1528_v54 = vld [vmem:[#allocation4 + $0x220] sm:$0xff] }
 0x29e   : > { %v1624_v48 = vpack.c.bf16 %v1574_v33, %v1572_v23 }
 0x29f   : > { %1694 = vmatprep.subr.bf16.mxu0 %v1631_v39 }
 0x2a0   : > { %1695 = vmatpush2.bf16.msra.mxu0 %v1630_v13  ;;  %v1529_v13 = vld [vmem:[#allocation4 + $0x228] sm:$0xff] }
 0x2a1   : > { %1696 = vmatprep.subr.bf16.mxu0 %v1629_v31  ;;  %v1530_v31 = vld [vmem:[#allocation4 + $0x230] sm:$0xff] }
 0x2a4   : > { %1697 = vmatpush2.bf16.msra.mxu0 %v1628_v59  ;;  %v1568_v59 = vmul.f32 %v1496_v51, %v9462_v2 }
 0x2a6   : > { %v1077_v18 = vpop.permute.xlu0 %1076  ;;  %v1082_v34 = vpop.permute.xlu1 %1081  ;;  %v1622_v1 = vpack.c.bf16 %v1570_v3, %v1568_v59 }
 0x2a7   : > { %v1128_v63 = vadd.f32 %v6214_v55, %v1077_v18  ;;  %v1131_v56 = vadd.f32 %v6220_v57, %v1082_v34  ;;  %v1382_v55 = vsel %vm1376_vm9, %v6464_v43, %v6429_v5  ;;  %v1569_v43 = vmul.f32 %v1497_v35, %v6144_v52  ;;  %v1531_v52 = vld [vmem:[#allocation4 + $0x238] sm:$0xff] }
 0x2a8   : > { %v1575_v47 = vmul.f32 %v1503_v44, %v1382_v55  ;;  %v1565_v18 = vmul.f32 %v1493_v9, %v9463_v30  ;;  %v1527_v44 = vld [vmem:[#allocation4 + $0x218] sm:$0xff]  ;;  %v9465_v55 = vld [vmem:[#allocation25_spill] sm:$0xff] }
 0x2a9   : > { %v1136_v41 = vpack.c.bf16 %v1131_v56, %v1128_v63  ;;  %v1623_v21 = vpack.c.bf16 %v1571_v58, %v1569_v43 }
 0x2aa   : > { %v1440_v12 = vpop.permute.xlu0 %1439  ;;  %v1375_v24 = vpop.permute.xlu1 %1374  ;;  %v1625_v16 = vpack.c.bf16 %v1575_v47, %v1573_v11  ;;  %v1621_v17 = vpack.c.bf16 %v1567_v20, %v1565_v18 }
 0x2ab   : > { %v1380_v57 = vsel %vm1376_vm9, %v6396_v19, %v1375_v24  ;;  %v1384_v4 = vsel %vm1376_vm9, %v1375_v24, %v6396_v19  ;;  %5369 = vmatmul.mubr.msk.bf16.gmra.mxu1 %vm1185_vm0, %v1136_v41  ;;  %v1524_v41 = vld [vmem:[#allocation4 + $0x200] sm:$0xff]  ;;  %vm3153_vm0 = vcmp.lt.s32.totalorder %v6305_v37, 17 }
 0x2ac   : > { %v1578_v38 = vmul.f32 %v1506_v27, %v1380_v57  ;;  %v1579_v45 = vmul.f32 %v1507_v42, %v1384_v4  ;;  %1749 = vmatprep.mubr.bf16.mxu1 %v9461_v6  ;;  %v1564_v57 = vmul.f32 %v1492_v50, %v9465_v55 }
 0x2ae   : > { %v1626_v19 = vpack.c.bf16 %v1578_v38, %v1576_v62  ;;  %v1448_v60 = vpop.permute.xlu0 %1447  ;;  %v1442_v28 = vpop.permute.xlu1 %1441  ;;  %v1627_v7 = vpack.c.bf16 %v1579_v45, %v1577_v14  ;;  %v1525_v62 = vld [vmem:[#allocation4 + $0x208] sm:$0xff]  ;;  %v1526_v14 = vld [vmem:[#allocation4 + $0x210] sm:$0xff]  ;;  %v1620_v45 = vpack.c.bf16 %v1566_v15, %v1564_v57 }
 0x2af   : > { %v1454_v39 = vsel %vm1451_vm10, %v1440_v12, %v1448_v60  ;;  %v1458_v25 = vsel %vm1451_vm10, %v1448_v60, %v1440_v12 }
 0x2b0   : > { %1698 = vmatprep.subr.bf16.mxu0 %v1627_v7  ;;  %v1600_v40 = vmul.f32 %v1528_v54, %v1454_v39  ;;  %v1601_v29 = vmul.f32 %v1529_v13, %v1458_v25  ;;  %v5654_v7 = vld [vmem:[%s5868_s17 + $0x8] ss:$12 sps:$4 sm:$0xff]  }
 0x2b1   : > { %1699 = vmatpush2.bf16.msra.mxu0 %v1626_v19  ;;  %v5651_v19 = vld [vmem:[%s5868_s17] ss:$12 sps:$4 sm:$0xff]  }
 0x2b2   : > { %v1436_v26 = vpop.permute.xlu0 %1435  ;;  %1700 = vmatprep.subr.bf16.mxu0 %v1625_v16  ;;  %v1438_v5 = vpop.permute.xlu1 %1437 }
 0x2b5   : > { %1701 = vmatpush2.bf16.msra.mxu0 %v1624_v48 }
 0x2b6   : > { %v1444_v53 = vpop.permute.xlu0 %1443  ;;  %v1450_v34 = vpop.permute.xlu1 %1449  ;;  %1702 = vmatprep.subr.bf16.mxu0 %v1623_v21 }
 0x2b7   : > { %v1455_v63 = vsel %vm1451_vm10, %v1442_v28, %v1450_v34  ;;  %v1459_v56 = vsel %vm1451_vm10, %v1450_v34, %v1442_v28  ;;  %v1452_v12 = vsel %vm1451_vm10, %v1436_v26, %v1444_v53  ;;  %v1456_v24 = vsel %vm1451_vm10, %v1444_v53, %v1436_v26 }
 0x2b8   : > { %v1602_v27 = vmul.f32 %v1530_v31, %v1455_v63  ;;  %v1603_v42 = vmul.f32 %v1531_v52, %v1459_v56  ;;  %v1596_v22 = vmul.f32 %v1524_v41, %v1452_v12  ;;  %v1597_v46 = vmul.f32 %v1525_v62, %v1456_v24 }
 0x2b9   : > { %1703 = vmatpush2.bf16.msra.mxu0 %v1622_v1  ;;  %v1908_v1 = vld [vmem:[%s5918_s6 + $0x80] sm:$0xff] }
 0x2ba   : > { %v1638_v4 = vpack.c.bf16 %v1602_v27, %v1600_v40  ;;  %v1446_v36 = vpop.permute.xlu1 %1445  ;;  %1704 = vmatprep.subr.bf16.mxu0 %v1621_v17  ;;  %v1639_v61 = vpack.c.bf16 %v1603_v42, %v1601_v29  ;;  %v1649_v16 = vpop.permute.xlu0 %1648  ;;  %v1910_v17 = vld [vmem:[%s5918_s6 + $0x90] sm:$0xff]  ;;  %v1909_v27 = vld [vmem:[%s5918_s6 + $0x88] sm:$0xff]  ;;  %v1911_v42 = vld [vmem:[%s5918_s6 + $0x98] sm:$0xff] }
 0x2bb   : > { %v1453_v11 = vsel %vm1451_vm10, %v1438_v5, %v1446_v36  ;;  %v1457_v38 = vsel %vm1451_vm10, %v1446_v36, %v1438_v5  ;;  %v1984_v36 = vld [vmem:[%s9466_s16] sm:$0xff] }
 0x2bc   : > { %v1598_v0 = vmul.f32 %v1526_v14, %v1453_v11  ;;  %v1599_v47 = vmul.f32 %v1527_v44, %v1457_v38  ;;  %1729 = vmatprep.subr.bf16.mxu1 %v1639_v61  ;;  %v1985_v61 = vld [vmem:[%s9466_s16 + $0x8] sm:$0xff]  ;;  %v2056_v11 = vld [vmem:[%s9467_s0] sm:$0xff] }
 0x2bd   : > { %1705 = vmatpush2.bf16.msra.mxu0 %v1620_v45  ;;  %1730 = vmatpush1.bf16.msra.mxu1 %v1638_v4  ;;  %v5655_v4 = vld [vmem:[%s9453_s3 + $0x4] ss:$8 sps:$4 sm:$0xff]  }
 0x2be   : > { %v1636_v60 = vpack.c.bf16 %v1598_v0, %v1596_v22  ;;  %v1637_v28 = vpack.c.bf16 %v1599_v47, %v1597_v46  ;;  %v1654_v49 = vpop.permute.xlu1 %1653  ;;  %v1765_v33 = vpop.permute.xlu0 %1764  ;;  %v2057_v38 = vld [vmem:[%s9467_s0 + $0x8] sm:$0xff]  ;;  %v2072_v45 = vld [vmem:[%s9468_s2] sm:$0xff]  ;;  %s9477_s0 = smov 111  }
 0x2bf   : > { %v2073_v22 = vld [vmem:[%s9468_s2 + $0x8] sm:$0xff]  ;;  %s9519_s2 = sld [smem:[#allocation15_spill]] }
 0x2c0   : > { %1707 = vmatmul.mubr.bf16.vlgmr.msra.gmra.mxu0 %v5651_v19  ;;  %1731 = vmatprep.subr.bf16.mxu1 %v1637_v28 }
 0x2c1   : > { %1732 = vmatpush1.bf16.msra.mxu1 %v1636_v60  ;;  %2136 = vmatprep.mubr.bf16.mxu0 %v9461_v6 }
 0x2c2   : > { %v1770_v48 = vpop.permute.xlu1 %1769  ;;  %v1781_v25 = vpop.permute.xlu0 %1780 }
 0x2c4   : > { %5373 = vmatmul.mubr.msk.bf16.vlgmr.msra.gmra.mxu1 %vm1089_vm1, %v5654_v7  ;;  %vm3494_vm1 = vcmp.lt.s32.totalorder %v6305_v37, 111 }
 0x2c5   : > { %5376 = vmatprep.mubr.msk.bf16.mxu1 %vm2005_vm11, %v5655_v4 }
 0x2c6   : > { %v1786_v15 = vpop.permute.xlu1 %1785 }
 0x36b   : > { %v6555_v23 = vpop.f32.mrf.mxu1 }
 0x36d   : > { %v6557_v35 = vpop.f32.mrf.mxu1 }
 0x36f   : > { %v6559_v58 = vpop.f32.mrf.mxu1 }
 0x371   : > { %v6561_v26 = vpop.f32.mrf.mxu1 }
 0x380   : > { %v1708_v8 = vpop.f32.mrf.mxu0 }
 0x381   : > { %v1709_v43 = vadd.f32 %v1708_v8, %v1649_v16 }
 0x382   : > { %v1710_v5 = vpop.f32.mrf.mxu0 }
 0x383   : > { %v1711_v3 = vadd.f32 %v1710_v5, %v1649_v16 }
 0x384   : > { %v1712_v51 = vpop.f32.mrf.mxu0  ;;  %v1751_v9 = vpop.f32.mrf.mxu1 }
 0x385   : > { %v1752_v20 = vadd.f32 %v1751_v9, %v1709_v43  ;;  %v1713_v21 = vadd.f32 %v1712_v51, %v1654_v49 }
 0x386   : > { %v1714_v10 = vpop.f32.mrf.mxu0  ;;  %v1753_v54 = vpop.f32.mrf.mxu1 }
 0x387   : > { %v1772_v13 = vmul.f32 %v1765_v33, %v1752_v20  ;;  %v1754_v39 = vadd.f32 %v1753_v54, %v1711_v3  ;;  %v1715_v2 = vadd.f32 %v1714_v10, %v1654_v49  ;;  %v1920_v3 = vld [vmem:[%s5918_s6 + $0xe0] sm:$0xff]  ;;  %v1921_v20 = vld [vmem:[%s5918_s6 + $0xe8] sm:$0xff] }
 0x388   : > { %v1755_v31 = vpop.f32.mrf.mxu1 }
 0x389   : > { %v1788_v52 = vadd.f32 %v1781_v25, %v1772_v13  ;;  %v1773_v59 = vmul.f32 %v1765_v33, %v1754_v39  ;;  %v1756_v30 = vadd.f32 %v1755_v31, %v1713_v21  ;;  %v1922_v21 = vld [vmem:[%s5918_s6 + $0xf0] sm:$0xff]  ;;  %v1923_v13 = vld [vmem:[%s5918_s6 + $0xf8] sm:$0xff] }
 0x38a   : > { %v1757_v18 = vpop.f32.mrf.mxu1 }
 0x38b   : > { %v1792_v53 = vmax.f32 %v1788_v52, 0.0  ;;  %v1789_v34 = vadd.f32 %v1781_v25, %v1773_v59  ;;  %v1774_v50 = vmul.f32 %v1770_v48, %v1756_v30  ;;  %v1758_v32 = vadd.f32 %v1757_v18, %v1715_v2 }
 0x38d   : > { %v1790_v63 = vadd.f32 %v1786_v15, %v1774_v50  ;;  %v1775_v56 = vmul.f32 %v1770_v48, %v1758_v32  ;;  %1868 = vrot.lane.b32.xlu0 %v1792_v53, %s5835_s1  ;;  %v1793_v40 = vmax.f32 %v1789_v34, 0.0  ;;  %v6570_v12 = vmul.f32 %v1908_v1, %v1792_v53  ;;  %v1917_v34 = vld [vmem:[%s5918_s6 + $0xc8] sm:$0xff] }
 0x38f   : > { %v1794_v29 = vmax.f32 %v1790_v63, 0.0  ;;  %v1791_v41 = vadd.f32 %v1786_v15, %v1775_v56  ;;  %v6574_v14 = vmul.f32 %v1909_v27, %v1793_v40  ;;  %v1918_v15 = vld [vmem:[%s5918_s6 + $0xd0] sm:$0xff]  ;;  %v1919_v63 = vld [vmem:[%s5918_s6 + $0xd8] sm:$0xff] }
 0x391   : > { %v1795_v62 = vmax.f32 %v1791_v41, 0.0  ;;  %1870 = vrot.lane.b32.xlu1 %v1794_v29, %s5835_s1  ;;  %1856 = vrot.lane.b32.xlu0 %v1792_v53, %s5836_s10  ;;  %v6572_v24 = vmul.f32 %v1910_v17, %v1794_v29 }
 0x393   : > { %v6576_v44 = vmul.f32 %v1911_v42, %v1795_v62  ;;  %v1972_v55 = vpack.c.bf16 %v6572_v24, %v6570_v12 }
 0x395   : > { %1858 = vrot.lane.b32.xlu1 %v1794_v29, %s5836_s10  ;;  %1844 = vrot.lane.b32.xlu0 %v1792_v53, %s9338_s26  ;;  %v1973_v57 = vpack.c.bf16 %v6576_v44, %v6574_v14 }
 0x399   : > { %1846 = vrot.lane.b32.xlu1 %v1794_v29, %s9338_s26  ;;  %1832 = vrot.lane.b32.xlu0 %v1792_v53, %s9344_s7 }
 0x39d   : > { %1834 = vrot.lane.b32.xlu1 %v1794_v29, %s9344_s7  ;;  %1820 = vrot.lane.b32.xlu0 %v1792_v53, %s5832_s11 }
 0x3a1   : > { %1822 = vrot.lane.b32.xlu1 %v1794_v29, %s5832_s11  ;;  %1808 = vrot.lane.b32.xlu0 %v1792_v53, %s5833_s18 }
 0x3a5   : > { %1810 = vrot.lane.b32.xlu1 %v1794_v29, %s5833_s18  ;;  %1796 = vrot.lane.b32.xlu0 %v1792_v53, %s5834_s23 }
 0x3a9   : > { %1798 = vrot.lane.b32.xlu1 %v1794_v29, %s5834_s23  ;;  %1872 = vrot.lane.b32.xlu0 %v1793_v40, %s5835_s1 }
 0x3ad   : > { %1874 = vrot.lane.b32.xlu1 %v1795_v62, %s5835_s1  ;;  %1860 = vrot.lane.b32.xlu0 %v1793_v40, %s5836_s10  ;;  %s9469_s1 = sld [smem:[#allocation21_spill]] }
 0x3b1   : > { %1862 = vrot.lane.b32.xlu1 %v1795_v62, %s5836_s10  ;;  %1848 = vrot.lane.b32.xlu0 %v1793_v40, %s9338_s26  ;;  %s9355_s10 = smov 113  }
 0x3b3   : > { %v2095_v46 = vld [vmem:[%s9469_s1] sm:$0xff]  ;;  %s9340_s1 = smov 16  }
 0x3b5   : > { %1850 = vrot.lane.b32.xlu1 %v1795_v62, %s9338_s26  ;;  %1880 = vrot.lane.b32.xlu0 %v1792_v53, %s5838_s15  ;;  %v1916_v53 = vld [vmem:[%s5918_s6 + $0xc0] sm:$0xff] }
 0x3b9   : > { %1882 = vrot.lane.b32.xlu1 %v1794_v29, %s5838_s15  ;;  %1836 = vrot.lane.b32.xlu0 %v1793_v40, %s9344_s7 }
 0x3bd   : > { %1838 = vrot.lane.b32.xlu1 %v1795_v62, %s9344_s7  ;;  %1824 = vrot.lane.b32.xlu0 %v1793_v40, %s5832_s11 }
 0x3c1   : > { %1826 = vrot.lane.b32.xlu1 %v1795_v62, %s5832_s11  ;;  %1812 = vrot.lane.b32.xlu0 %v1793_v40, %s5833_s18  ;;  %s9470_s11 = sld [smem:[#allocation20_spill]] }
 0x3c5   : > { %1814 = vrot.lane.b32.xlu1 %v1795_v62, %s5833_s18  ;;  %1800 = vrot.lane.b32.xlu0 %v1793_v40, %s5834_s23  ;;  %s9471_s18 = sld [smem:[#allocation22_spill]] }
 0x3c9   : > { %1802 = vrot.lane.b32.xlu1 %v1795_v62, %s5834_s23  ;;  %1884 = vrot.lane.b32.xlu0 %v1793_v40, %s5838_s15  ;;  %s9342_s23 = smov 112  }
 0x3cb   : > { %v3592_v6 = vld [vmem:[%s9471_s18 + $0x288] sm:$0xff] }
 0x3cd   : > { %1886 = vrot.lane.b32.xlu1 %v1795_v62, %s5838_s15  ;;  %1988 = vperm.xlu0 %5636, %v1984_v36   ;;  %v1912_v36 = vld [vmem:[%s5918_s6 + $0xa0] sm:$0xff]  ;;  %s9353_s15 = smov 15  }
 0x3d1   : > { %1993 = vperm.xlu1 %5637, %v1985_v61   ;;  %2060 = vperm.xlu0 %5636, %v2056_v11   ;;  %v1913_v61 = vld [vmem:[%s5918_s6 + $0xa8] sm:$0xff] }
 0x3d5   : > { %2065 = vperm.xlu1 %5637, %v2057_v38   ;;  %2076 = vperm.xlu0 %5636, %v2072_v45   ;;  %v1914_v45 = vld [vmem:[%s5918_s6 + $0xb0] sm:$0xff] }
 0x3d9   : > { %2081 = vperm.xlu1 %5637, %v2073_v22   ;;  %2098 = vperm.xlu0 %5636, %v2095_v46   ;;  %v1915_v22 = vld [vmem:[%s5918_s6 + $0xb8] sm:$0xff] }
 0x3ff   : > { %v1869_v0 = vpop.permute.xlu0 %1868 }
 0x403   : > { %v1871_v47 = vpop.permute.xlu1 %1870  ;;  %v1857_v19 = vpop.permute.xlu0 %1856 }
 0x407   : > { %v1859_v60 = vpop.permute.xlu1 %1858  ;;  %v1845_v28 = vpop.permute.xlu0 %1844 }
 0x40b   : > { %v1847_v7 = vpop.permute.xlu1 %1846  ;;  %v6620_v16 = vpop.permute.xlu0 %1832 }
 0x40f   : > { %v6622_v49 = vpop.permute.xlu1 %1834  ;;  %v6624_v8 = vpop.permute.xlu0 %1820 }
 0x413   : > { %v6626_v33 = vpop.permute.xlu1 %1822  ;;  %v6628_v5 = vpop.permute.xlu0 %1808 }
 0x417   : > { %v6630_v43 = vpop.permute.xlu1 %1810  ;;  %v6632_v51 = vpop.permute.xlu0 %1796 }
 0x41b   : > { %v6634_v9 = vpop.permute.xlu1 %1798  ;;  %v1873_v48 = vpop.permute.xlu0 %1872 }
 0x41c   : > { %v1876_v10 = vsel %vm1426_vm7, %v1869_v0, %v1873_v48  ;;  %v1878_v54 = vsel %vm1426_vm7, %v1873_v48, %v1869_v0 }
 0x41d   : > { %v1956_v2 = vmul.f32 %v1920_v3, %v1876_v10  ;;  %v1957_v59 = vmul.f32 %v1921_v20, %v1878_v54 }
 0x41f   : > { %v1875_v39 = vpop.permute.xlu1 %1874  ;;  %v1861_v25 = vpop.permute.xlu0 %1860 }
 0x420   : > { %v1877_v31 = vsel %vm1426_vm7, %v1871_v47, %v1875_v39  ;;  %v1879_v52 = vsel %vm1426_vm7, %v1875_v39, %v1871_v47  ;;  %v1864_v50 = vsel %vm1401_vm8, %v1857_v19, %v1861_v25  ;;  %v1866_v32 = vsel %vm1401_vm8, %v1861_v25, %v1857_v19  ;;  %v1904_v25 = vld [vmem:[%s5918_s6 + $0x60] sm:$0xff] }
 0x421   : > { %v1958_v30 = vmul.f32 %v1922_v21, %v1877_v31  ;;  %v1959_v18 = vmul.f32 %v1923_v13, %v1879_v52  ;;  %v1952_v27 = vmul.f32 %v1916_v53, %v1864_v50  ;;  %v1953_v42 = vmul.f32 %v1917_v34, %v1866_v32  ;;  %v1905_v31 = vld [vmem:[%s5918_s6 + $0x68] sm:$0xff] }
 0x423   : > { %v1978_v56 = vpack.c.bf16 %v1958_v30, %v1956_v2  ;;  %v1863_v1 = vpop.permute.xlu1 %1862  ;;  %v1849_v17 = vpop.permute.xlu0 %1848  ;;  %v1979_v40 = vpack.c.bf16 %v1959_v18, %v1957_v59  ;;  %v1906_v2 = vld [vmem:[%s5918_s6 + $0x70] sm:$0xff]  ;;  %v1907_v59 = vld [vmem:[%s5918_s6 + $0x78] sm:$0xff] }
 0x424   : > { %v1865_v29 = vsel %vm1401_vm8, %v1859_v60, %v1863_v1  ;;  %v1867_v41 = vsel %vm1401_vm8, %v1863_v1, %v1859_v60  ;;  %v1852_v11 = vsel %vm1376_vm9, %v1845_v28, %v1849_v17  ;;  %v1854_v38 = vsel %vm1376_vm9, %v1849_v17, %v1845_v28 }
 0x425   : > { %v1954_v62 = vmul.f32 %v1918_v15, %v1865_v29  ;;  %v1955_v4 = vmul.f32 %v1919_v63, %v1867_v41  ;;  %2009 = vmatprep.subr.bf16.mxu1 %v1979_v40  ;;  %v1948_v3 = vmul.f32 %v1912_v36, %v1852_v11  ;;  %v1949_v20 = vmul.f32 %v1913_v61, %v1854_v38  ;;  %v1900_v63 = vld [vmem:[%s5918_s6 + $0x40] sm:$0xff]  ;;  %v1898_v61 = vld [vmem:[%s5918_s6 + $0x30] sm:$0xff] }
 0x426   : > { %2010 = vmatpush1.bf16.msra.mxu1 %v1978_v56  ;;  %v1901_v56 = vld [vmem:[%s5918_s6 + $0x48] sm:$0xff] }
 0x427   : > { %v1976_v46 = vpack.c.bf16 %v1954_v62, %v1952_v27  ;;  %v1851_v0 = vpop.permute.xlu1 %1850  ;;  %v6668_v47 = vpop.permute.xlu0 %1880  ;;  %v1977_v19 = vpack.c.bf16 %v1955_v4, %v1953_v42  ;;  %v1896_v42 = vld [vmem:[%s5918_s6 + $0x20] sm:$0xff]  ;;  %v1897_v62 = vld [vmem:[%s5918_s6 + $0x28] sm:$0xff] }
 0x428   : > { %v1853_v60 = vsel %vm1376_vm9, %v1847_v7, %v1851_v0  ;;  %v1855_v48 = vsel %vm1376_vm9, %v1851_v0, %v1847_v7 }
 0x429   : > { %v1950_v28 = vmul.f32 %v1914_v45, %v1853_v60  ;;  %v1951_v10 = vmul.f32 %v1915_v22, %v1855_v48  ;;  %2011 = vmatprep.subr.bf16.mxu1 %v1977_v19 }
 0x42a   : > { %2012 = vmatpush1.bf16.msra.mxu1 %v1976_v46 }
 0x42b   : > { %v1974_v54 = vpack.c.bf16 %v1950_v28, %v1948_v3  ;;  %v6674_v21 = vpop.permute.xlu1 %1882  ;;  %v1837_v13 = vpop.permute.xlu0 %1836  ;;  %v1975_v39 = vpack.c.bf16 %v1951_v10, %v1949_v20  ;;  %v1892_v3 = vld [vmem:[%s5918_s6] sm:$0xff]  ;;  %v1893_v20 = vld [vmem:[%s5918_s6 + $0x8] sm:$0xff] }
 0x42c   : > { %v1840_v7 = vsel %vm1351_vm3, %v6620_v16, %v1837_v13  ;;  %v1842_v52 = vsel %vm1351_vm3, %v1837_v13, %v6620_v16 }
 0x42d   : > { %2013 = vmatprep.subr.bf16.mxu1 %v1975_v39  ;;  %v1940_v16 = vmul.f32 %v1904_v25, %v1842_v52  ;;  %v1941_v50 = vmul.f32 %v1905_v31, %v1840_v7 }
 0x42e   : > { %2014 = vmatpush1.bf16.msra.mxu1 %v1974_v54  ;;  %v1894_v54 = vld [vmem:[%s5918_s6 + $0x10] sm:$0xff] }
 0x42f   : > { %v1839_v30 = vpop.permute.xlu1 %1838  ;;  %2015 = vmatprep.subr.bf16.mxu1 %v1973_v57  ;;  %v1825_v18 = vpop.permute.xlu0 %1824  ;;  %v1902_v57 = vld [vmem:[%s5918_s6 + $0x50] sm:$0xff] }
 0x430   : > { %v1841_v53 = vsel %vm1351_vm3, %v6622_v49, %v1839_v30  ;;  %v1843_v34 = vsel %vm1351_vm3, %v1839_v30, %v6622_v49  ;;  %v1828_v14 = vsel %vm1326_vm4, %v6624_v8, %v1825_v18  ;;  %v1830_v44 = vsel %vm1326_vm4, %v1825_v18, %v6624_v8  ;;  %v1903_v49 = vld [vmem:[%s5918_s6 + $0x58] sm:$0xff]  ;;  %v1924_v18 = vld [vmem:[%s5918_s6 + $0x100] sm:$0xff] }
 0x431   : > { %v1942_v32 = vmul.f32 %v1906_v2, %v1843_v34  ;;  %v1943_v15 = vmul.f32 %v1907_v59, %v1841_v53  ;;  %v1936_v27 = vmul.f32 %v1900_v63, %v1830_v44  ;;  %v1937_v12 = vmul.f32 %v1901_v56, %v1828_v14  ;;  %v1925_v53 = vld [vmem:[%s5918_s6 + $0x108] sm:$0xff]  ;;  %v2205_v44 = vld [vmem:[#allocation6 + $0x1c0] sm:$0xff] }
 0x432   : > { %2016 = vmatpush1.bf16.msra.mxu1 %v1972_v55 }
 0x433   : > { %v1970_v1 = vpack.c.bf16 %v1942_v32, %v1940_v16  ;;  %v1827_v17 = vpop.permute.xlu1 %1826  ;;  %v1813_v40 = vpop.permute.xlu0 %1812  ;;  %v1971_v29 = vpack.c.bf16 %v1943_v15, %v1941_v50  ;;  %v1926_v50 = vld [vmem:[%s5918_s6 + $0x110] sm:$0xff]  ;;  %v1927_v32 = vld [vmem:[%s5918_s6 + $0x118] sm:$0xff] }
 0x434   : > { %v1829_v41 = vsel %vm1326_vm4, %v6626_v33, %v1827_v17  ;;  %v1831_v8 = vsel %vm1326_vm4, %v1827_v17, %v6626_v33  ;;  %v1816_v4 = vsel %vm1301_vm5, %v6628_v5, %v1813_v40  ;;  %v1818_v36 = vsel %vm1301_vm5, %v1813_v40, %v6628_v5  ;;  %v1899_v33 = vld [vmem:[%s5918_s6 + $0x38] sm:$0xff] }
 0x435   : > { %v1938_v24 = vmul.f32 %v1902_v57, %v1831_v8  ;;  %v1939_v55 = vmul.f32 %v1903_v49, %v1829_v41  ;;  %2017 = vmatprep.subr.bf16.mxu1 %v1971_v29  ;;  %v1932_v19 = vmul.f32 %v1896_v42, %v1818_v36  ;;  %v1933_v5 = vmul.f32 %v1897_v62, %v1816_v4  ;;  %v2209_v57 = vld [vmem:[#allocation6 + $0x1e0] sm:$0xff] }
 0x436   : > { %2018 = vmatpush1.bf16.msra.mxu1 %v1970_v1  ;;  %v5435_v41 = vcombine.high %v2205_v44, %v2209_v57  ;;  %v2197_v8 = vld [vmem:[#allocation6 + $0x180] sm:$0xff]  ;;  %vm4470_vm4 = vcmask 588800  }
 0x437   : > { %v1968_v11 = vpack.c.bf16 %v1938_v24, %v1936_v27  ;;  %v1815_v38 = vpop.permute.xlu1 %1814  ;;  %v1801_v45 = vpop.permute.xlu0 %1800  ;;  %v1969_v22 = vpack.c.bf16 %v1939_v55, %v1937_v12  ;;  %v2201_v27 = vld [vmem:[#allocation6 + $0x1a0] sm:$0xff]  ;;  %v5434_v24 = vcombine.low %v2205_v44, %v2209_v57 }
 0x438   : > { %v1817_v46 = vsel %vm1301_vm5, %v6630_v43, %v1815_v38  ;;  %v1819_v0 = vsel %vm1301_vm5, %v1815_v38, %v6630_v43  ;;  %v1804_v28 = vsel %vm1276_vm6, %v6632_v51, %v1801_v45  ;;  %v1806_v10 = vsel %vm1276_vm6, %v1801_v45, %v6632_v51  ;;  %v1895_v43 = vld [vmem:[%s5918_s6 + $0x18] sm:$0xff]  ;;  %v5657_v12 = vld [vmem:[%s9453_s3] ss:$8 sps:$4 sm:$0xff]   ;;  %s9521_s3 = sld [smem:[#allocation17_spill]] }
 0x439   : > { %v1934_v60 = vmul.f32 %v1898_v61, %v1819_v0  ;;  %v1935_v48 = vmul.f32 %v1899_v33, %v1817_v46  ;;  %2019 = vmatprep.subr.bf16.mxu1 %v1969_v22  ;;  %v1928_v2 = vmul.f32 %v1892_v3, %v1806_v10  ;;  %v1929_v51 = vmul.f32 %v1893_v20, %v1804_v28  ;;  %v2193_v42 = vld [vmem:[#allocation6 + $0x160] sm:$0xff] }
 0x43a   : > { %2020 = vmatpush1.bf16.msra.mxu1 %v1968_v11  ;;  %v5427_v55 = vcombine.high %v2197_v8, %v2201_v27  ;;  %v5426_v62 = vcombine.low %v2197_v8, %v2201_v27  ;;  %v2181_v36 = vld [vmem:[#allocation6 + $0x100] sm:$0xff] }
 0x43b   : > { %v1966_v13 = vpack.c.bf16 %v1934_v60, %v1932_v19  ;;  %v1803_v39 = vpop.permute.xlu1 %1802  ;;  %v1885_v25 = vpop.permute.xlu0 %1884  ;;  %v1967_v31 = vpack.c.bf16 %v1935_v48, %v1933_v5  ;;  %v2185_v61 = vld [vmem:[#allocation6 + $0x120] sm:$0xff] }
 0x43c   : > { %v1805_v7 = vsel %vm1276_vm6, %v6634_v9, %v1803_v39  ;;  %v1807_v52 = vsel %vm1276_vm6, %v1803_v39, %v6634_v9  ;;  %v1888_v34 = vsel %vm1451_vm10, %v6668_v47, %v1885_v25  ;;  %v1890_v16 = vsel %vm1451_vm10, %v1885_v25, %v6668_v47  ;;  %v2173_v38 = vld [vmem:[#allocation6 + $0xc0] sm:$0xff] }
 0x43d   : > { %v1930_v59 = vmul.f32 %v1894_v54, %v1807_v52  ;;  %v1931_v30 = vmul.f32 %v1895_v43, %v1805_v7  ;;  %2021 = vmatprep.subr.bf16.mxu1 %v1967_v31  ;;  %v1960_v49 = vmul.f32 %v1924_v18, %v1888_v34  ;;  %v1961_v1 = vmul.f32 %v1925_v53, %v1890_v16  ;;  %v2177_v45 = vld [vmem:[#allocation6 + $0xe0] sm:$0xff] }
 0x43e   : > { %2022 = vmatpush1.bf16.msra.mxu1 %v1966_v13  ;;  %v5411_v11 = vcombine.high %v2181_v36, %v2185_v61  ;;  %v5410_v22 = vcombine.low %v2181_v36, %v2185_v61  ;;  %v5403_v46 = vcombine.high %v2173_v38, %v2177_v45  ;;  %v2165_v0 = vld [vmem:[#allocation6 + $0x80] sm:$0xff]  ;;  %v5402_v5 = vcombine.low %v2173_v38, %v2177_v45 }
 0x43f   : > { %v1964_v15 = vpack.c.bf16 %v1930_v59, %v1928_v2  ;;  %v1887_v9 = vpop.permute.xlu1 %1886  ;;  %v1965_v63 = vpack.c.bf16 %v1931_v30, %v1929_v51  ;;  %v2169_v19 = vld [vmem:[#allocation6 + $0xa0] sm:$0xff] }
 0x440   : > { %v1889_v56 = vsel %vm1451_vm10, %v6674_v21, %v1887_v9  ;;  %v1891_v14 = vsel %vm1451_vm10, %v1887_v9, %v6674_v21  ;;  %v2189_v21 = vld [vmem:[#allocation6 + $0x140] sm:$0xff]  ;;  %v5395_v60 = vcombine.high %v2165_v0, %v2169_v19  ;;  %v5394_v20 = vcombine.low %v2165_v0, %v2169_v19 }
 0x441   : > { %v1962_v47 = vmul.f32 %v1926_v50, %v1889_v56  ;;  %v1963_v17 = vmul.f32 %v1927_v32, %v1891_v14  ;;  %2023 = vmatprep.subr.bf16.mxu1 %v1965_v63  ;;  %v5419_v4 = vcombine.high %v2189_v21, %v2193_v42  ;;  %v5418_v33 = vcombine.low %v2189_v21, %v2193_v42  ;;  %v2157_v48 = vld [vmem:[#allocation6 + $0x40] sm:$0xff]  ;;  %v6765_v21 = vld [vmem:[#allocation6 + $0x1f0] sm:$0xff] }
 0x442   : > { %2024 = vmatpush1.bf16.msra.mxu1 %v1964_v15  ;;  %v2161_v3 = vld [vmem:[#allocation6 + $0x60] sm:$0xff] }
 0x443   : > { %v1980_v40 = vpack.c.bf16 %v1962_v47, %v1960_v49  ;;  %v1981_v29 = vpack.c.bf16 %v1963_v17, %v1961_v1  ;;  %v5387_v28 = vcombine.high %v2157_v48, %v2161_v3  ;;  %v2149_v10 = vld [vmem:[#allocation6] sm:$0xff]  ;;  %v5386_v43 = vcombine.low %v2157_v48, %v2161_v3 }
 0x444   : > { %v2153_v54 = vld [vmem:[#allocation6 + $0x20] sm:$0xff] }
 0x445   : > { %2039 = vmatprep.subr.bf16.mxu1 %v1981_v29  ;;  %v5379_v13 = vcombine.high %v2149_v10, %v2153_v54  ;;  %v2269_v39 = vld [vmem:[#allocation6 + $0x3c0] sm:$0xff]  ;;  %v5378_v31 = vcombine.low %v2149_v10, %v2153_v54  ;;  %v2206_v54 = vld [vmem:[#allocation6 + $0x1c8] sm:$0xff] }
 0x446   : > { %2040 = vmatpush2.bf16.msra.mxu1 %v1980_v40  ;;  %v2273_v25 = vld [vmem:[#allocation6 + $0x3e0] sm:$0xff] }
 0x447   : > { %2917 = vmatprep.subr.bf16.mxu1 %v5435_v41  ;;  %v5499_v7 = vcombine.high %v2269_v39, %v2273_v25  ;;  %v2261_v52 = vld [vmem:[#allocation6 + $0x380] sm:$0xff]  ;;  %v5498_v51 = vcombine.low %v2269_v39, %v2273_v25 }
 0x448   : > { %v2265_v2 = vld [vmem:[#allocation6 + $0x3a0] sm:$0xff]  ;;  %v1989_v36 = vpop.permute.xlu0 %1988 }
 0x449   : > { %2042 = vmatmul.mubr.bf16.vlgmr.msra.gmra.mxu1 %v5657_v12  ;;  %v5491_v59 = vcombine.high %v2261_v52, %v2265_v2  ;;  %v2253_v30 = vld [vmem:[#allocation6 + $0x340] sm:$0xff]  ;;  %v5490_v53 = vcombine.low %v2261_v52, %v2265_v2 }
 0x44a   : > { %2918 = vmatpush1.bf16.msra.mxu1 %v5434_v24  ;;  %v2257_v18 = vld [vmem:[#allocation6 + $0x360] sm:$0xff] }
 0x44b   : > { %2919 = vmatprep.subr.bf16.mxu1 %v5427_v55  ;;  %v5483_v34 = vcombine.high %v2253_v30, %v2257_v18  ;;  %v5482_v16 = vcombine.low %v2253_v30, %v2257_v18  ;;  %v2245_v50 = vld [vmem:[#allocation6 + $0x300] sm:$0xff]  ;;  %v6763_v55 = vld [vmem:[#allocation6 + $0x1d0] sm:$0xff]  ;;  %v2202_v30 = vld [vmem:[#allocation6 + $0x1a8] sm:$0xff] }
 0x44c   : > { %v2249_v32 = vld [vmem:[#allocation6 + $0x320] sm:$0xff]  ;;  %v5438_v42 = vcombine.low %v6763_v55, %v6765_v21 }
 0x44d   : > { %v5475_v15 = vcombine.high %v2245_v50, %v2249_v32  ;;  %v5474_v9 = vcombine.low %v2245_v50, %v2249_v32  ;;  %v2237_v63 = vld [vmem:[#allocation6 + $0x2c0] sm:$0xff]  ;;  %v2203_v32 = vld [vmem:[#allocation6 + $0x1b0] sm:$0xff] }
 0x44e   : > { %2920 = vmatpush1.bf16.msra.mxu1 %v5426_v62  ;;  %v2241_v56 = vld [vmem:[#allocation6 + $0x2e0] sm:$0xff]  ;;  %v5439_v62 = vcombine.high %v6763_v55, %v6765_v21  ;;  %v2175_v21 = vld [vmem:[#allocation6 + $0xd0] sm:$0xff] }
 0x44f   : > { %2921 = vmatprep.subr.bf16.mxu1 %v5419_v4  ;;  %v5467_v14 = vcombine.high %v2237_v63, %v2241_v56  ;;  %v5466_v44 = vcombine.low %v2237_v63, %v2241_v56  ;;  %v2229_v57 = vld [vmem:[#allocation6 + $0x280] sm:$0xff]  ;;  %v1994_v4 = vpop.permute.xlu1 %1993  ;;  %v2190_v63 = vld [vmem:[#allocation6 + $0x148] sm:$0xff] }
 0x450   : > { %v2233_v49 = vld [vmem:[#allocation6 + $0x2a0] sm:$0xff]  ;;  %v2194_v56 = vld [vmem:[#allocation6 + $0x168] sm:$0xff] }
 0x451   : > { %v5459_v1 = vcombine.high %v2229_v57, %v2233_v49  ;;  %v5458_v47 = vcombine.low %v2229_v57, %v2233_v49  ;;  %v2221_v17 = vld [vmem:[#allocation6 + $0x240] sm:$0xff] }
 0x452   : > { %2922 = vmatpush1.bf16.msra.mxu1 %v5418_v33  ;;  %v2225_v40 = vld [vmem:[#allocation6 + $0x260] sm:$0xff] }
 0x453   : > { %2923 = vmatprep.subr.bf16.mxu1 %v5411_v11  ;;  %v5451_v29 = vcombine.high %v2221_v17, %v2225_v40  ;;  %v5450_v41 = vcombine.low %v2221_v17, %v2225_v40  ;;  %v2213_v8 = vld [vmem:[#allocation6 + $0x200] sm:$0xff]  ;;  %v2066_v45 = vpop.permute.xlu1 %2065  ;;  %v2195_v17 = vld [vmem:[#allocation6 + $0x170] sm:$0xff]  ;;  %v2182_v40 = vld [vmem:[#allocation6 + $0x108] sm:$0xff] }
 0x454   : > { %v2217_v27 = vld [vmem:[#allocation6 + $0x220] sm:$0xff] }
 0x455   : > { %v5443_v12 = vcombine.high %v2213_v8, %v2217_v27  ;;  %v5442_v24 = vcombine.low %v2213_v8, %v2217_v27  ;;  %v5420_v8 = vcombine.low %v2190_v63, %v2194_v56 }
 0x456   : > { %2924 = vmatpush1.bf16.msra.mxu1 %v5410_v22 }
 0x457   : > { %2925 = vmatprep.subr.bf16.mxu1 %v5403_v46  ;;  %v2061_v46 = vpop.permute.xlu0 %2060 }
 0x45a   : > { %2926 = vmatpush1.bf16.msra.mxu1 %v5402_v5 }
 0x45b   : > { %2927 = vmatprep.subr.bf16.mxu1 %v5395_v60  ;;  %v2077_v25 = vpop.permute.xlu0 %2076 }
 0x45e   : > { %2928 = vmatpush1.bf16.msra.mxu1 %v5394_v20 }
 0x45f   : > { %2929 = vmatprep.subr.bf16.mxu1 %v5387_v28 }
 0x462   : > { %2930 = vmatpush1.bf16.msra.mxu1 %v5386_v43  ;;  %v2210_v43 = vld [vmem:[#allocation6 + $0x1e8] sm:$0xff] }
 0x463   : > { %2931 = vmatprep.subr.bf16.mxu1 %v5379_v13  ;;  %v2082_v13 = vpop.permute.xlu1 %2081 }
 0x466   : > { %2932 = vmatpush1.bf16.msra.mxu1 %v5378_v31 }
 0x467   : > { %2933 = vmatprep.subr.bf16.mxu1 %v5499_v7 }
 0x46a   : > { %2934 = vmatpush2.bf16.msra.mxu1 %v5498_v51 }
 0x46b   : > { %2935 = vmatprep.subr.bf16.mxu1 %v5491_v59 }
 0x46e   : > { %2936 = vmatpush2.bf16.msra.mxu1 %v5490_v53  ;;  %v2092_v53 = vld [vmem:[%s9470_s11] sm:$0xf]  ;;  %s9346_s11 = smov 17  }
 0x46f   : > { %2937 = vmatprep.subr.bf16.mxu1 %v5483_v34  ;;  %v5436_v34 = vcombine.low %v2206_v54, %v2210_v43 }
 0x472   : > { %2938 = vmatpush2.bf16.msra.mxu1 %v5482_v16 }
 0x473   : > { %2939 = vmatprep.subr.bf16.mxu1 %v5475_v15 }
 0x476   : > { %2940 = vmatpush2.bf16.msra.mxu1 %v5474_v9 }
 0x477   : > { %2941 = vmatprep.subr.bf16.mxu1 %v5467_v14 }
 0x47a   : > { %2942 = vmatpush2.bf16.msra.mxu1 %v5466_v44 }
 0x47b   : > { %2943 = vmatprep.subr.bf16.mxu1 %v5459_v1  ;;  %v5421_v1 = vcombine.high %v2190_v63, %v2194_v56  ;;  %v2263_v56 = vld [vmem:[#allocation6 + $0x390] sm:$0xff] }
 0x47e   : > { %2944 = vmatpush2.bf16.msra.mxu1 %v5458_v47  ;;  %v2191_v47 = vld [vmem:[#allocation6 + $0x150] sm:$0xff] }
 0x47f   : > { %2945 = vmatprep.subr.bf16.mxu1 %v5451_v29  ;;  %v2186_v29 = vld [vmem:[#allocation6 + $0x128] sm:$0xff]  ;;  %v5423_v27 = vcombine.high %v2191_v47, %v2195_v17 }
 0x482   : > { %2946 = vmatpush2.bf16.msra.mxu1 %v5450_v41 }
 0x483   : > { %2947 = vmatprep.subr.bf16.mxu1 %v5443_v12  ;;  %v5413_v12 = vcombine.high %v2182_v40, %v2186_v29 }
 0x486   : > { %2948 = vmatpush2.bf16.msra.mxu1 %v5442_v24  ;;  %v2183_v24 = vld [vmem:[#allocation6 + $0x110] sm:$0xff] }
 0x487   : > { %3019 = vmatprep.subr.bf16.mxu1 %v5439_v62  ;;  %v2187_v62 = vld [vmem:[#allocation6 + $0x130] sm:$0xff] }
 0x509   : > { %v2043_v61 = vpop.f32.mrf.mxu1 }
 0x50a   : > { %v2044_v33 = vadd.f32 %v2043_v61, %v1989_v36  ;;  %v5422_v61 = vcombine.low %v2191_v47, %v2195_v17 }
 0x50b   : > { %v2045_v11 = vpop.f32.mrf.mxu1 }
 0x50c   : > { %v2046_v38 = vadd.f32 %v2045_v11, %v1989_v36  ;;  %v2052_v0 = vadd.f32 %v2044_v33, %v6555_v23  ;;  %v2178_v36 = vld [vmem:[#allocation6 + $0xe8] sm:$0xff]  ;;  %v5412_v33 = vcombine.low %v2182_v40, %v2186_v29  ;;  %v5415_v11 = vcombine.high %v2183_v24, %v2187_v62 }
 0x50d   : > { %v2047_v22 = vpop.f32.mrf.mxu1 }
 0x50e   : > { %v2053_v19 = vadd.f32 %v2046_v38, %v6557_v35  ;;  %v2048_v5 = vadd.f32 %v2047_v22, %v1994_v4  ;;  %v2068_v28 = vmul.f32 %v2061_v46, %v2052_v0  ;;  %v5437_v35 = vcombine.high %v2206_v54, %v2210_v43  ;;  %v2166_v38 = vld [vmem:[#allocation6 + $0x88] sm:$0xff]  ;;  %v2159_v43 = vld [vmem:[#allocation6 + $0x50] sm:$0xff] }
 0x50f   : > { %v2049_v60 = vpop.f32.mrf.mxu1  ;;  %v5414_v22 = vcombine.low %v2183_v24, %v2187_v62 }
 0x510   : > { %v2054_v48 = vadd.f32 %v2048_v5, %v6559_v58  ;;  %v2050_v3 = vadd.f32 %v2049_v60, %v1994_v4  ;;  %v2069_v20 = vmul.f32 %v2061_v46, %v2053_v19  ;;  %v2084_v2 = vadd.f32 %v2077_v25, %v2068_v28  ;;  %v2198_v58 = vld [vmem:[#allocation6 + $0x188] sm:$0xff]  ;;  %v2167_v5 = vld [vmem:[#allocation6 + $0x90] sm:$0xff] }
 0x511   : > { %v5429_v9 = vcombine.high %v2198_v58, %v2202_v30  ;;  %v5428_v57 = vcombine.low %v2198_v58, %v2202_v30  ;;  %v2174_v4 = vld [vmem:[#allocation6 + $0xc8] sm:$0xff]  ;;  %v2171_v60 = vld [vmem:[#allocation6 + $0xb0] sm:$0xff] }
 0x512   : > { %v2070_v10 = vmul.f32 %v2066_v45, %v2054_v48  ;;  %v2055_v39 = vadd.f32 %v2050_v3, %v6561_v26  ;;  %v2085_v7 = vadd.f32 %v2077_v25, %v2069_v20  ;;  %v2093_v51 = vpack.c.bf16 %v2054_v48, %v2052_v0  ;;  %v2199_v26 = vld [vmem:[#allocation6 + $0x190] sm:$0xff]  ;;  %v2158_v48 = vld [vmem:[#allocation6 + $0x48] sm:$0xff] }
 0x513   : > { %v2088_v15 = vmax.f32 %v2084_v2, 0.0  ;;  %v5431_v49 = vcombine.high %v2199_v26, %v2203_v32  ;;  %v5430_v41 = vcombine.low %v2199_v26, %v2203_v32  ;;  %v5405_v55 = vcombine.high %v2174_v4, %v2178_v36  ;;  %v2162_v3 = vld [vmem:[#allocation6 + $0x68] sm:$0xff]  ;;  %v2155_v2 = vld [vmem:[#allocation6 + $0x30] sm:$0xff] }
 0x514   : > { %v2086_v31 = vadd.f32 %v2082_v13, %v2070_v10  ;;  %v2071_v23 = vmul.f32 %v2066_v45, %v2055_v39  ;;  %v2094_v52 = vpack.c.bf16 %v2055_v39, %v2053_v19  ;;  %v2089_v16 = vmax.f32 %v2085_v7, 0.0  ;;  %v2170_v45 = vld [vmem:[#allocation6 + $0xa8] sm:$0xff] }
 0x515   : > { %v5404_v46 = vcombine.low %v2174_v4, %v2178_v36  ;;  %v5397_v19 = vcombine.high %v2166_v38, %v2170_v45  ;;  %v5396_v28 = vcombine.low %v2166_v38, %v2170_v45  ;;  %v5399_v10 = vcombine.high %v2167_v5, %v2171_v60  ;;  %v2150_v39 = vld [vmem:[#allocation6 + $0x8] sm:$0xff] }
 0x516   : > { %v2087_v59 = vadd.f32 %v2082_v13, %v2071_v23  ;;  %2118 = vmatprep.subr.bf16.mxu0 %v2094_v52  ;;  %v2090_v18 = vmax.f32 %v2086_v31, 0.0  ;;  %v5389_v54 = vcombine.high %v2158_v48, %v2162_v3  ;;  %v2163_v13 = vld [vmem:[#allocation6 + $0x70] sm:$0xff]  ;;  %v2154_v25 = vld [vmem:[#allocation6 + $0x28] sm:$0xff]  ;;  %v5398_v31 = vcombine.low %v2167_v5, %v2171_v60 }
 0x517   : > { %2119 = vmatpush1.bf16.msra.mxu0 %v2093_v51  ;;  %v5388_v7 = vcombine.low %v2158_v48, %v2162_v3  ;;  %v5391_v23 = vcombine.high %v2159_v43, %v2163_v13  ;;  %v5381_v52 = vcombine.high %v2150_v39, %v2154_v25  ;;  %v2270_v51 = vld [vmem:[#allocation6 + $0x3c8] sm:$0xff]  ;;  %v5390_v58 = vcombine.low %v2159_v43, %v2163_v13  ;;  %v2208_v13 = vld [vmem:[#allocation6 + $0x1d8] sm:$0xff] }
 0x518   : > { %v2091_v50 = vmax.f32 %v2087_v59, 0.0  ;;  %2968 = vmatprep.subr.bf16.mxu0 %v5437_v35  ;;  %v6779_v44 = vpack.c.bf16 %v2090_v18, %v2088_v15  ;;  %v2151_v35 = vld [vmem:[#allocation6 + $0x10] sm:$0xff]  ;;  %v2274_v59 = vld [vmem:[#allocation6 + $0x3e8] sm:$0xff]  ;;  %v5380_v30 = vcombine.low %v2150_v39, %v2154_v25  ;;  %v2212_v39 = vld [vmem:[#allocation6 + $0x1f8] sm:$0xff] }
 0x519   : > { %v5383_v18 = vcombine.high %v2151_v35, %v2155_v2  ;;  %v2266_v26 = vld [vmem:[#allocation6 + $0x3a8] sm:$0xff]  ;;  %v5382_v32 = vcombine.low %v2151_v35, %v2155_v2  ;;  %v5500_v15 = vcombine.low %v2270_v51, %v2274_v59  ;;  %v2239_v35 = vld [vmem:[#allocation6 + $0x2d0] sm:$0xff] }
 0x51a   : > { %5377 = vmatmul.mubr.msk.bf16.vlgmr.msra.gmra.mxu0 %vm2005_vm11, %v2092_v53  ;;  %v6777_v14 = vpack.c.bf16 %v2091_v50, %v2089_v16  ;;  %v5501_v53 = vcombine.high %v2270_v51, %v2274_v59  ;;  %v2275_v16 = vld [vmem:[#allocation6 + $0x3f0] sm:$0xff]  ;;  %v2262_v50 = vld [vmem:[#allocation6 + $0x388] sm:$0xff] }
 0x51b   : > { %2969 = vmatpush1.bf16.msra.mxu0 %v5436_v34  ;;  %v2271_v34 = vld [vmem:[#allocation6 + $0x3d0] sm:$0xff]  ;;  %v5493_v63 = vcombine.high %v2262_v50, %v2266_v26  ;;  %v5492_v17 = vcombine.low %v2262_v50, %v2266_v26  ;;  %v2222_v60 = vld [vmem:[#allocation6 + $0x248] sm:$0xff] }
 0x51c   : > { %2949 = vmatprep.mubr.bf16.mxu1 %v6777_v14  ;;  %3000 = vmatprep.mubr.bf16.mxu0 %v6777_v14  ;;  %v5502_v47 = vcombine.low %v2271_v34, %v2275_v16  ;;  %v2226_v48 = vld [vmem:[#allocation6 + $0x268] sm:$0xff]  ;;  %v2243_v2 = vld [vmem:[#allocation6 + $0x2f0] sm:$0xff] }
 0x51d   : > { %2950 = vmatmul.mubr.bf16.vlgmr.msra.gmra.mxu1 %v6779_v44  ;;  %2970 = vmatprep.subr.bf16.mxu0 %v5429_v9  ;;  %v5503_v9 = vcombine.high %v2271_v34, %v2275_v16  ;;  %v5471_v59 = vcombine.high %v2239_v35, %v2243_v2  ;;  %v2231_v34 = vld [vmem:[#allocation6 + $0x290] sm:$0xff] }
 0x51e   : > { %3020 = vmatpush1.bf16.msra.mxu1 %v5438_v42  ;;  %v2179_v42 = vld [vmem:[#allocation6 + $0xf0] sm:$0xff] }
 0x51f   : > { %2971 = vmatpush1.bf16.msra.mxu0 %v5428_v57  ;;  %3021 = vmatprep.subr.bf16.mxu1 %v5431_v49  ;;  %v5407_v0 = vcombine.high %v2175_v21, %v2179_v42  ;;  %v5406_v20 = vcombine.low %v2175_v21, %v2179_v42  ;;  %v2267_v57 = vld [vmem:[#allocation6 + $0x3b0] sm:$0xff]  ;;  %v2254_v49 = vld [vmem:[#allocation6 + $0x348] sm:$0xff] }
 0x520   : > { %2972 = vmatprep.subr.bf16.mxu0 %v5421_v1  ;;  %v2258_v1 = vld [vmem:[#allocation6 + $0x368] sm:$0xff]  ;;  %v5495_v40 = vcombine.high %v2263_v56, %v2267_v57  ;;  %v5494_v24 = vcombine.low %v2263_v56, %v2267_v57  ;;  %v2235_v16 = vld [vmem:[#allocation6 + $0x2b0] sm:$0xff] }
 0x521   : > { %v5485_v29 = vcombine.high %v2254_v49, %v2258_v1  ;;  %v5484_v62 = vcombine.low %v2254_v49, %v2258_v1  ;;  %v5463_v26 = vcombine.high %v2231_v34, %v2235_v16  ;;  %v2223_v56 = vld [vmem:[#allocation6 + $0x250] sm:$0xff] }
 0x522   : > { %3022 = vmatpush1.bf16.msra.mxu1 %v5430_v41  ;;  %v2255_v41 = vld [vmem:[#allocation6 + $0x350] sm:$0xff] }
 0x523   : > { %2973 = vmatpush1.bf16.msra.mxu0 %v5420_v8  ;;  %3023 = vmatprep.subr.bf16.mxu1 %v5423_v27  ;;  %v2259_v8 = vld [vmem:[#allocation6 + $0x370] sm:$0xff]  ;;  %v2246_v27 = vld [vmem:[#allocation6 + $0x308] sm:$0xff] }
 0x524   : > { %2974 = vmatprep.subr.bf16.mxu0 %v5413_v12  ;;  %v2250_v12 = vld [vmem:[#allocation6 + $0x328] sm:$0xff]  ;;  %v5487_v4 = vcombine.high %v2255_v41, %v2259_v8  ;;  %v5486_v21 = vcombine.low %v2255_v41, %v2259_v8  ;;  %v2227_v57 = vld [vmem:[#allocation6 + $0x270] sm:$0xff] }
 0x525   : > { %v5477_v36 = vcombine.high %v2246_v27, %v2250_v12  ;;  %v5476_v42 = vcombine.low %v2246_v27, %v2250_v12  ;;  %v5455_v1 = vcombine.high %v2223_v56, %v2227_v57  ;;  %v2215_v8 = vld [vmem:[#allocation6 + $0x210] sm:$0xff]  ;;  %v2168_v12 = vld [vmem:[#allocation6 + $0x98] sm:$0xff] }
 0x526   : > { %3024 = vmatpush1.bf16.msra.mxu1 %v5422_v61  ;;  %v2247_v61 = vld [vmem:[#allocation6 + $0x310] sm:$0xff] }
 0x527   : > { %2975 = vmatpush1.bf16.msra.mxu0 %v5412_v33  ;;  %3025 = vmatprep.subr.bf16.mxu1 %v5415_v11  ;;  %v2251_v33 = vld [vmem:[#allocation6 + $0x330] sm:$0xff]  ;;  %v2238_v11 = vld [vmem:[#allocation6 + $0x2c8] sm:$0xff] }
 0x528   : > { %2976 = vmatprep.subr.bf16.mxu0 %v5405_v55  ;;  %v2242_v55 = vld [vmem:[#allocation6 + $0x2e8] sm:$0xff]  ;;  %v5479_v38 = vcombine.high %v2247_v61, %v2251_v33  ;;  %v2219_v27 = vld [vmem:[#allocation6 + $0x230] sm:$0xff] }
 0x529   : > { %v5469_v45 = vcombine.high %v2238_v11, %v2242_v55 }
 0x52a   : > { %3026 = vmatpush1.bf16.msra.mxu1 %v5414_v22  ;;  %v2230_v22 = vld [vmem:[#allocation6 + $0x288] sm:$0xff] }
 0x52b   : > { %2977 = vmatpush1.bf16.msra.mxu0 %v5404_v46  ;;  %3027 = vmatprep.subr.bf16.mxu1 %v5407_v0  ;;  %v2234_v46 = vld [vmem:[#allocation6 + $0x2a8] sm:$0xff]  ;;  %v5478_v0 = vcombine.low %v2247_v61, %v2251_v33  ;;  %v2160_v33 = vld [vmem:[#allocation6 + $0x58] sm:$0xff] }
 0x52c   : > { %2978 = vmatprep.subr.bf16.mxu0 %v5397_v19  ;;  %v5468_v19 = vcombine.low %v2238_v11, %v2242_v55  ;;  %v5461_v5 = vcombine.high %v2230_v22, %v2234_v46  ;;  %v5460_v3 = vcombine.low %v2230_v22, %v2234_v46  ;;  %v2164_v11 = vld [vmem:[#allocation6 + $0x78] sm:$0xff] }
 0x52d   : > { %v2272_v46 = vld [vmem:[#allocation6 + $0x3d8] sm:$0xff] }
 0x52e   : > { %3028 = vmatpush1.bf16.msra.mxu1 %v5406_v20  ;;  %v5453_v20 = vcombine.high %v2222_v60, %v2226_v48 }
 0x52f   : > { %2979 = vmatpush1.bf16.msra.mxu0 %v5396_v28  ;;  %3029 = vmatprep.subr.bf16.mxu1 %v5399_v10  ;;  %v2214_v28 = vld [vmem:[#allocation6 + $0x208] sm:$0xff] }
 0x530   : > { %2980 = vmatprep.subr.bf16.mxu0 %v5389_v54  ;;  %v2218_v10 = vld [vmem:[#allocation6 + $0x228] sm:$0xff]  ;;  %v5452_v54 = vcombine.low %v2222_v60, %v2226_v48  ;;  %v2264_v60 = vld [vmem:[#allocation6 + $0x398] sm:$0xff] }
 0x531   : > { %v5445_v43 = vcombine.high %v2214_v28, %v2218_v10  ;;  %v5444_v25 = vcombine.low %v2214_v28, %v2218_v10  ;;  %v2268_v48 = vld [vmem:[#allocation6 + $0x3b8] sm:$0xff] }
 0x532   : > { %3030 = vmatpush1.bf16.msra.mxu1 %v5398_v31  ;;  %v5441_v31 = vcombine.high %v2208_v13, %v2212_v39  ;;  %v2256_v28 = vld [vmem:[#allocation6 + $0x358] sm:$0xff] }
 0x533   : > { %2981 = vmatpush1.bf16.msra.mxu0 %v5388_v7  ;;  %3031 = vmatprep.subr.bf16.mxu1 %v5391_v23  ;;  %v2200_v7 = vld [vmem:[#allocation6 + $0x198] sm:$0xff] }
 0x534   : > { %2982 = vmatprep.subr.bf16.mxu0 %v5381_v52  ;;  %v2204_v23 = vld [vmem:[#allocation6 + $0x1b8] sm:$0xff]  ;;  %v5440_v52 = vcombine.low %v2208_v13, %v2212_v39 }
 0x535   : > { %v5433_v51 = vcombine.high %v2200_v7, %v2204_v23  ;;  %v2260_v10 = vld [vmem:[#allocation6 + $0x378] sm:$0xff] }
 0x536   : > { %3032 = vmatpush1.bf16.msra.mxu1 %v5390_v58  ;;  %v2192_v58 = vld [vmem:[#allocation6 + $0x158] sm:$0xff] }
 0x537   : > { %2983 = vmatpush1.bf16.msra.mxu0 %v5380_v30  ;;  %3033 = vmatprep.subr.bf16.mxu1 %v5383_v18  ;;  %v2196_v30 = vld [vmem:[#allocation6 + $0x178] sm:$0xff]  ;;  %v5470_v18 = vcombine.low %v2239_v35, %v2243_v2 }
 0x538   : > { %2984 = vmatprep.subr.bf16.mxu0 %v5501_v53  ;;  %v5432_v53 = vcombine.low %v2200_v7, %v2204_v23  ;;  %v5425_v50 = vcombine.high %v2192_v58, %v2196_v30  ;;  %v2248_v13 = vld [vmem:[#allocation6 + $0x318] sm:$0xff] }
 0x539   : > { %v2252_v39 = vld [vmem:[#allocation6 + $0x338] sm:$0xff] }
 0x53a   : > { %3034 = vmatpush1.bf16.msra.mxu1 %v5382_v32  ;;  %v2184_v32 = vld [vmem:[#allocation6 + $0x118] sm:$0xff] }
 0x53b   : > { %2985 = vmatpush2.bf16.msra.mxu0 %v5500_v15  ;;  %3035 = vmatprep.subr.bf16.mxu1 %v5503_v9  ;;  %v2188_v15 = vld [vmem:[#allocation6 + $0x138] sm:$0xff]  ;;  %v5462_v9 = vcombine.low %v2231_v34, %v2235_v16 }
 0x53c   : > { %2986 = vmatprep.subr.bf16.mxu0 %v5493_v63  ;;  %v5424_v63 = vcombine.low %v2192_v58, %v2196_v30  ;;  %v5417_v49 = vcombine.high %v2184_v32, %v2188_v15  ;;  %v2240_v7 = vld [vmem:[#allocation6 + $0x2d8] sm:$0xff] }
 0x53d   : > { %v2244_v23 = vld [vmem:[#allocation6 + $0x2f8] sm:$0xff] }
 0x53e   : > { %3036 = vmatpush2.bf16.msra.mxu1 %v5502_v47  ;;  %v2176_v47 = vld [vmem:[#allocation6 + $0xd8] sm:$0xff]  ;;  %v5473_v35 = vcombine.high %v2240_v7, %v2244_v23 }
 0x53f   : > { %2987 = vmatpush2.bf16.msra.mxu0 %v5492_v17  ;;  %3037 = vmatprep.subr.bf16.mxu1 %v5495_v40  ;;  %v2180_v17 = vld [vmem:[#allocation6 + $0xf8] sm:$0xff]  ;;  %v5454_v40 = vcombine.low %v2223_v56, %v2227_v57 }
 0x540   : > { %2988 = vmatprep.subr.bf16.mxu0 %v5485_v29  ;;  %v5416_v29 = vcombine.low %v2184_v32, %v2188_v15  ;;  %v5409_v41 = vcombine.high %v2176_v47, %v2180_v17  ;;  %v2232_v2 = vld [vmem:[#allocation6 + $0x298] sm:$0xff] }
 0x541   : > { %v2224_v30 = vld [vmem:[#allocation6 + $0x258] sm:$0xff] }
 0x542   : > { %3038 = vmatpush2.bf16.msra.mxu1 %v5494_v24  ;;  %v2172_v24 = vld [vmem:[#allocation6 + $0xb8] sm:$0xff] }
 0x543   : > { %2989 = vmatpush2.bf16.msra.mxu0 %v5484_v62  ;;  %3039 = vmatprep.subr.bf16.mxu1 %v5487_v4  ;;  %v5446_v62 = vcombine.low %v2215_v8, %v2219_v27  ;;  %v5447_v4 = vcombine.high %v2215_v8, %v2219_v27  ;;  %v5401_v61 = vcombine.high %v2168_v12, %v2172_v24  ;;  %v2216_v16 = vld [vmem:[#allocation6 + $0x218] sm:$0xff] }
 0x544   : > { %2990 = vmatprep.subr.bf16.mxu0 %v5477_v36  ;;  %v5408_v36 = vcombine.low %v2176_v47, %v2180_v17  ;;  %v5400_v55 = vcombine.low %v2168_v12, %v2172_v24 }
 0x546   : > { %3040 = vmatpush2.bf16.msra.mxu1 %v5486_v21  ;;  %v5393_v21 = vcombine.high %v2160_v33, %v2164_v11 }
 0x547   : > { %2991 = vmatpush2.bf16.msra.mxu0 %v5476_v42  ;;  %3041 = vmatprep.subr.bf16.mxu1 %v5479_v38  ;;  %v2152_v42 = vld [vmem:[#allocation6 + $0x18] sm:$0xff] }
 0x548   : > { %2992 = vmatprep.subr.bf16.mxu0 %v5469_v45  ;;  %v2156_v38 = vld [vmem:[#allocation6 + $0x38] sm:$0xff]  ;;  %v5392_v45 = vcombine.low %v2160_v33, %v2164_v11  ;;  %v3585_v33 = vld [vmem:[%s9471_s18 + $0x250] sm:$0xff] }
 0x549   : > { %v5385_v22 = vcombine.high %v2152_v42, %v2156_v38 }
 0x54a   : > { %3042 = vmatpush2.bf16.msra.mxu1 %v5478_v0  ;;  %v2276_v0 = vld [vmem:[#allocation6 + $0x3f8] sm:$0xff] }
 0x54b   : > { %2993 = vmatpush2.bf16.msra.mxu0 %v5468_v19  ;;  %3043 = vmatprep.subr.bf16.mxu1 %v5471_v59  ;;  %v5384_v19 = vcombine.low %v2152_v42, %v2156_v38  ;;  %v5472_v59 = vcombine.low %v2240_v7, %v2244_v23 }
 0x54c   : > { %2994 = vmatprep.subr.bf16.mxu0 %v5461_v5  ;;  %v5505_v5 = vcombine.high %v2272_v46, %v2276_v0 }
 0x54e   : > { %3044 = vmatpush2.bf16.msra.mxu1 %v5470_v18  ;;  %v2228_v18 = vld [vmem:[#allocation6 + $0x278] sm:$0xff] }
 0x54f   : > { %2995 = vmatpush2.bf16.msra.mxu0 %v5460_v3  ;;  %3045 = vmatprep.subr.bf16.mxu1 %v5463_v26  ;;  %v5504_v3 = vcombine.low %v2272_v46, %v2276_v0  ;;  %v5457_v34 = vcombine.high %v2224_v30, %v2228_v18  ;;  %v5456_v26 = vcombine.low %v2224_v30, %v2228_v18 }
 0x550   : > { %2996 = vmatprep.subr.bf16.mxu0 %v5453_v20  ;;  %v5497_v20 = vcombine.high %v2264_v60, %v2268_v48 }
 0x552   : > { %3046 = vmatpush2.bf16.msra.mxu1 %v5462_v9 }
 0x553   : > { %2997 = vmatpush2.bf16.msra.mxu0 %v5452_v54  ;;  %3047 = vmatprep.subr.bf16.mxu1 %v5455_v1  ;;  %v5496_v54 = vcombine.low %v2264_v60, %v2268_v48 }
 0x554   : > { %2998 = vmatprep.subr.bf16.mxu0 %v5445_v43  ;;  %v5489_v43 = vcombine.high %v2256_v28, %v2260_v10 }
 0x556   : > { %3048 = vmatpush2.bf16.msra.mxu1 %v5454_v40 }
 0x557   : > { %2999 = vmatpush2.bf16.msra.mxu0 %v5444_v25  ;;  %3049 = vmatprep.subr.bf16.mxu1 %v5447_v4  ;;  %v5488_v25 = vcombine.low %v2256_v28, %v2260_v10 }
 0x558   : > { %3070 = vmatprep.subr.bf16.mxu0 %v5441_v31  ;;  %v5481_v31 = vcombine.high %v2248_v13, %v2252_v39 }
 0x55a   : > { %3001 = vmatmul.mubr.bf16.vlgmr.msra.gmra.mxu0 %v6779_v44  ;;  %3050 = vmatpush2.bf16.msra.mxu1 %v5446_v62 }
 0x55b   : > { %3071 = vmatpush1.bf16.msra.mxu0 %v5440_v52  ;;  %v5480_v52 = vcombine.low %v2248_v13, %v2252_v39 }
 0x55c   : > { %3072 = vmatprep.subr.bf16.mxu0 %v5433_v51  ;;  %v2236_v51 = vld [vmem:[#allocation6 + $0x2b8] sm:$0xff] }
 0x55d   : > { %v5465_v58 = vcombine.high %v2232_v2, %v2236_v51 }
 0x55f   : > { %3073 = vmatpush1.bf16.msra.mxu0 %v5432_v53  ;;  %v5464_v53 = vcombine.low %v2232_v2, %v2236_v51 }
 0x560   : > { %3074 = vmatprep.subr.bf16.mxu0 %v5425_v50  ;;  %v2220_v50 = vld [vmem:[#allocation6 + $0x238] sm:$0xff] }
 0x561   : > { %v5449_v32 = vcombine.high %v2216_v16, %v2220_v50  ;;  %v5448_v15 = vcombine.low %v2216_v16, %v2220_v50 }
 0x563   : > { %3075 = vmatpush1.bf16.msra.mxu0 %v5424_v63  ;;  %v2099_v63 = vpop.permute.xlu0 %2098 }
 0x564   : > { %3076 = vmatprep.subr.bf16.mxu0 %v5417_v49 }
 0x567   : > { %3077 = vmatpush1.bf16.msra.mxu0 %v5416_v29  ;;  %v3575_v29 = vld [vmem:[%s9471_s18 + $0x200] sm:$0xff] }
 0x568   : > { %3078 = vmatprep.subr.bf16.mxu0 %v5409_v41  ;;  %v3583_v41 = vld [vmem:[%s9471_s18 + $0x240] sm:$0xff] }
 0x56b   : > { %3079 = vmatpush1.bf16.msra.mxu0 %v5408_v36 }
 0x56c   : > { %3080 = vmatprep.subr.bf16.mxu0 %v5401_v61  ;;  %v3577_v61 = vld [vmem:[%s9471_s18 + $0x210] sm:$0xff] }
 0x56f   : > { %3081 = vmatpush1.bf16.msra.mxu0 %v5400_v55 }
 0x570   : > { %3082 = vmatprep.subr.bf16.mxu0 %v5393_v21 }
 0x573   : > { %3083 = vmatpush1.bf16.msra.mxu0 %v5392_v45 }
 0x574   : > { %3084 = vmatprep.subr.bf16.mxu0 %v5385_v22 }
 0x577   : > { %3085 = vmatpush1.bf16.msra.mxu0 %v5384_v19 }
 0x578   : > { %3086 = vmatprep.subr.bf16.mxu0 %v5505_v5 }
 0x57b   : > { %3087 = vmatpush2.bf16.msra.mxu0 %v5504_v3 }
 0x57c   : > { %3088 = vmatprep.subr.bf16.mxu0 %v5497_v20 }
 0x57f   : > { %3089 = vmatpush2.bf16.msra.mxu0 %v5496_v54 }
 0x580   : > { %3090 = vmatprep.subr.bf16.mxu0 %v5489_v43 }
 0x583   : > { %3091 = vmatpush2.bf16.msra.mxu0 %v5488_v25 }
 0x584   : > { %3092 = vmatprep.subr.bf16.mxu0 %v5481_v31 }
 0x587   : > { %3093 = vmatpush2.bf16.msra.mxu0 %v5480_v52 }
 0x588   : > { %3094 = vmatprep.subr.bf16.mxu0 %v5473_v35 }
 0x58b   : > { %3095 = vmatpush2.bf16.msra.mxu0 %v5472_v59 }
 0x58c   : > { %3096 = vmatprep.subr.bf16.mxu0 %v5465_v58 }
 0x58f   : > { %3097 = vmatpush2.bf16.msra.mxu0 %v5464_v53 }
 0x590   : > { %3098 = vmatprep.subr.bf16.mxu0 %v5457_v34 }
 0x593   : > { %3099 = vmatpush2.bf16.msra.mxu0 %v5456_v26 }
 0x594   : > { %3100 = vmatprep.subr.bf16.mxu0 %v5449_v32  ;;  %v3631_v32 = vld [vmem:[%s9471_s18 + $0x3c0] sm:$0xff] }
 0x597   : > { %3101 = vmatpush2.bf16.msra.mxu0 %v5448_v15 }
 0x5da   : > { %v2138_v9 = vpop.f32.mrf.mxu0 }
 0x5db   : > { %v2139_v56 = vadd.f32 %v2138_v9, %v2099_v63  ;;  %v3624_v9 = vld [vmem:[%s9471_s18 + $0x388] sm:$0xff] }
 0x5dc   : > { %v2140_v57 = vpop.f32.mrf.mxu0 }
 0x5dd   : > { %v2141_v49 = vadd.f32 %v2140_v57, %v2099_v63  ;;  %v2951_v1 = vpop.f32.mrf.mxu1  ;;  %v2147_v8 = vpack.c.bf16 %v2139_v56, %v2139_v56  ;;  %v3632_v56 = vld [vmem:[%s9471_s18 + $0x3c8] sm:$0xff]  ;;  %v3623_v57 = vld [vmem:[%s9471_s18 + $0x380] sm:$0xff] }
 0x5de   : > { %3413 = vrot.lane.b32.xlu1 %v2951_v1, %s9342_s23  ;;  %v2142_v47 = vpop.f32.mrf.mxu0  ;;  %v6793_v24 = vmul.f32 %v3575_v29, %v2951_v1 }
 0x5df   : > { %v2148_v17 = vpack.c.bf16 %v2141_v49, %v2141_v49  ;;  %v6789_v40 = vpop.f32.mrf.mxu1 }
 0x5e0   : > { %v2143_v27 = vpop.f32.mrf.mxu0 }
 0x5e1   : > { %v2955_v12 = vpop.f32.mrf.mxu1  ;;  %2959 = vmatprep.mubr.bf16.mxu1 %v2148_v17  ;;  %3010 = vmatprep.mubr.bf16.mxu0 %v2148_v17 }
 0x5e2   : > { %2960 = vmatmul.mubr.bf16.gmra.mxu1 %v2147_v8  ;;  %3011 = vmatmul.mubr.bf16.gmra.mxu0 %v2147_v8  ;;  %v6795_v62 = vmul.f32 %v3583_v41, %v2955_v12  ;;  %v3615_v41 = vld [vmem:[%s9471_s18 + $0x340] sm:$0xff] }
 0x5e3   : > { %3364 = vrot.lane.b32.xlu1 %v2951_v1, %s9355_s10  ;;  %3415 = vrot.lane.b32.xlu0 %v2955_v12, %s9342_s23 }
 0x5e4   : > { %3051 = vmatprep.mubr.bf16.mxu1 %v6777_v14  ;;  %3102 = vmatprep.mubr.bf16.mxu0 %v6777_v14  ;;  %v6820_v14 = vpop.f32.mrf.mxu1 }
 0x5e7   : > { %3316 = vrot.lane.b32.xlu1 %v2951_v1, %s9338_s26  ;;  %3366 = vrot.lane.b32.xlu0 %v2955_v12, %s9355_s10 }
 0x5ea   : > { %3052 = vmatmul.mubr.bf16.vlgmr.msra.gmra.mxu1 %v6779_v44  ;;  %3103 = vmatmul.mubr.bf16.vlgmr.msra.gmra.mxu0 %v6779_v44 }
 0x5eb   : > { %3268 = vrot.lane.b32.xlu1 %v2951_v1, %s9344_s7  ;;  %3318 = vrot.lane.b32.xlu0 %v2955_v12, %s9338_s26  ;;  %s9348_s26 = smov 111  }
 0x5ec   : > { %3061 = vmatprep.mubr.bf16.mxu1 %v2148_v17  ;;  %3112 = vmatprep.mubr.bf16.mxu0 %v2148_v17 }
 0x5ef   : > { %3219 = vrot.lane.b32.xlu1 %v2951_v1, %s9353_s15  ;;  %3270 = vrot.lane.b32.xlu0 %v2955_v12, %s9344_s7 }
 0x5f2   : > { %3062 = vmatmul.mubr.bf16.gmra.mxu1 %v2147_v8  ;;  %3113 = vmatmul.mubr.bf16.gmra.mxu0 %v2147_v8 }
 0x5f3   : > { %3170 = vrot.lane.b32.xlu1 %v2951_v1, %s9340_s1  ;;  %3221 = vrot.lane.b32.xlu0 %v2955_v12, %s9353_s15 }
 0x5f7   : > { %3121 = vrot.lane.b32.xlu1 %v2951_v1, %s9346_s11  ;;  %3172 = vrot.lane.b32.xlu0 %v2955_v12, %s9340_s1  ;;  %s9472_s1 = smov 127  }
 0x5fb   : > { %3462 = vrot.lane.b32.xlu1 %v2951_v1, %s9348_s26  ;;  %3123 = vrot.lane.b32.xlu0 %v2955_v12, %s9346_s11 }
 0x5ff   : > { %3417 = vrot.lane.b32.xlu1 %v6789_v40, %s9342_s23  ;;  %3464 = vrot.lane.b32.xlu0 %v2955_v12, %s9348_s26 }
 0x603   : > { %3368 = vrot.lane.b32.xlu1 %v6789_v40, %s9355_s10  ;;  %3419 = vrot.lane.b32.xlu0 %v6820_v14, %s9342_s23  ;;  %s9473_s23 = smov 16  }
 0x607   : > { %3320 = vrot.lane.b32.xlu1 %v6789_v40, %s9472_s1  ;;  %3370 = vrot.lane.b32.xlu0 %v6820_v14, %s9355_s10 }
 0x60b   : > { %3272 = vrot.lane.b32.xlu1 %v6789_v40, %s9344_s7  ;;  %3322 = vrot.lane.b32.xlu0 %v6820_v14, %s9472_s1 }
 0x60f   : > { %3223 = vrot.lane.b32.xlu1 %v6789_v40, %s9353_s15  ;;  %3274 = vrot.lane.b32.xlu0 %v6820_v14, %s9344_s7  ;;  %s9474_s7 = smov 112  }
 0x613   : > { %3174 = vrot.lane.b32.xlu1 %v6789_v40, %s9473_s23  ;;  %3225 = vrot.lane.b32.xlu0 %v6820_v14, %s9353_s15 }
 0x617   : > { %3125 = vrot.lane.b32.xlu1 %v6789_v40, %s9346_s11  ;;  %3176 = vrot.lane.b32.xlu0 %v6820_v14, %s9473_s23 }
 0x61a   : > { %v3002_v44 = vpop.f32.mrf.mxu0 }
 0x61b   : > { %3466 = vrot.lane.b32.xlu1 %v6789_v40, %s9348_s26  ;;  %3127 = vrot.lane.b32.xlu0 %v6820_v14, %s9346_s11  ;;  %v6857_v55 = vmul.f32 %v3577_v61, %v3002_v44  ;;  %s9475_s11 = smov 1   ;;  %v3608_v61 = vld [vmem:[%s9471_s18 + $0x308] sm:$0xff] }
 0x61c   : > { %v6850_v36 = vpop.f32.mrf.mxu0 }
 0x61e   : > { %v3006_v11 = vpop.f32.mrf.mxu0 }
 0x61f   : > { %3421 = vrot.lane.b32.xlu1 %v3002_v44, %s9474_s7  ;;  %3468 = vrot.lane.b32.xlu0 %v6820_v14, %s9348_s26  ;;  %v6859_v21 = vmul.f32 %v3585_v33, %v3006_v11  ;;  %s9476_s26 = smov 17  }
 0x620   : > { %v6880_v38 = vpop.f32.mrf.mxu0 }
 0x623   : > { %3372 = vrot.lane.b32.xlu1 %v3002_v44, %s9355_s10  ;;  %3423 = vrot.lane.b32.xlu0 %v3006_v11, %s9474_s7 }
 0x627   : > { %3324 = vrot.lane.b32.xlu1 %v3002_v44, %s9472_s1  ;;  %3374 = vrot.lane.b32.xlu0 %v3006_v11, %s9355_s10 }
 0x62b   : > { %3276 = vrot.lane.b32.xlu1 %v3002_v44, %s9475_s11  ;;  %3326 = vrot.lane.b32.xlu0 %v3006_v11, %s9472_s1 }
 0x62f   : > { %3227 = vrot.lane.b32.xlu1 %v3002_v44, %s9353_s15  ;;  %3278 = vrot.lane.b32.xlu0 %v3006_v11, %s9475_s11 }
 0x633   : > { %3178 = vrot.lane.b32.xlu1 %v3002_v44, %s9473_s23  ;;  %3229 = vrot.lane.b32.xlu0 %v3006_v11, %s9353_s15 }
 0x637   : > { %3129 = vrot.lane.b32.xlu1 %v3002_v44, %s9476_s26  ;;  %3180 = vrot.lane.b32.xlu0 %v3006_v11, %s9473_s23 }
 0x63b   : > { %3470 = vrot.lane.b32.xlu1 %v3002_v44, %s9477_s0  ;;  %3131 = vrot.lane.b32.xlu0 %v3006_v11, %s9476_s26 }
 0x63f   : > { %3425 = vrot.lane.b32.xlu1 %v6850_v36, %s9474_s7  ;;  %3472 = vrot.lane.b32.xlu0 %v3006_v11, %s9477_s0  ;;  %v3616_v11 = vld [vmem:[%s9471_s18 + $0x348] sm:$0xff] }
 0x643   : > { %3376 = vrot.lane.b32.xlu1 %v6850_v36, %s9355_s10  ;;  %3427 = vrot.lane.b32.xlu0 %v6880_v38, %s9474_s7 }
 0x647   : > { %3328 = vrot.lane.b32.xlu1 %v6850_v36, %s9472_s1  ;;  %3378 = vrot.lane.b32.xlu0 %v6880_v38, %s9355_s10 }
 0x64b   : > { %3280 = vrot.lane.b32.xlu1 %v6850_v36, %s9475_s11  ;;  %3330 = vrot.lane.b32.xlu0 %v6880_v38, %s9472_s1 }
 0x64f   : > { %3231 = vrot.lane.b32.xlu1 %v6850_v36, %s9353_s15  ;;  %3282 = vrot.lane.b32.xlu0 %v6880_v38, %s9475_s11 }
 0x650   : > { %v6898_v45 = vpop.permute.xlu1 %3413 }
 0x651   : > { %9478 = vst [vmem:[#allocation28_spill] sm:$0xff] %v6898_v45 }
 0x653   : > { %3182 = vrot.lane.b32.xlu1 %v6850_v36, %s9473_s23  ;;  %3233 = vrot.lane.b32.xlu0 %v6880_v38, %s9353_s15  ;;  %s9510_s15 = sld [smem:[#allocation14_spill]] }
 0x655   : > { %v6904_v22 = vpop.permute.xlu1 %3364  ;;  %v6906_v46 = vpop.permute.xlu0 %3415 }
 0x656   : > { %9479 = vst [vmem:[#allocation26_spill] sm:$0xff] %v6904_v22  ;;  %9480 = vst [vmem:[#allocation27_spill] sm:$0xff] %v6906_v46 }
 0x657   : > { %3133 = vrot.lane.b32.xlu1 %v6850_v36, %s9476_s26  ;;  %3184 = vrot.lane.b32.xlu0 %v6880_v38, %s9473_s23 }
 0x659   : > { %v6912_v0 = vpop.permute.xlu1 %3316  ;;  %v6914_v19 = vpop.permute.xlu0 %3366 }
 0x65a   : > { %9481 = vst [vmem:[#allocation25_spill] sm:$0xff] %v6912_v0  ;;  %9482 = vst [vmem:[#allocation29_spill] sm:$0xff] %v6914_v19 }
 0x65b   : > { %3474 = vrot.lane.b32.xlu1 %v6850_v36, %s9477_s0  ;;  %3135 = vrot.lane.b32.xlu0 %v6880_v38, %s9476_s26 }
 0x65d   : > { %v6920_v5 = vpop.permute.xlu1 %3268  ;;  %v6922_v60 = vpop.permute.xlu0 %3318 }
 0x65e   : > { %9483 = vst [vmem:[#allocation30_spill] sm:$0xff] %v6920_v5  ;;  %9484 = vst [vmem:[#allocation31_spill] sm:$0xff] %v6922_v60 }
 0x65f   : > { %3476 = vrot.lane.b32.xlu0 %v6880_v38, %s9477_s0 }
 0x661   : > { %v6926_v48 = vpop.permute.xlu1 %3219  ;;  %v6928_v3 = vpop.permute.xlu0 %3270 }
 0x662   : > { %9485 = vst [vmem:[#allocation32_spill] sm:$0xff] %v6926_v48  ;;  %9486 = vst [vmem:[#allocation33_spill] sm:$0xff] %v6928_v3 }
 0x665   : > { %v6930_v20 = vpop.permute.xlu1 %3170  ;;  %v6932_v28 = vpop.permute.xlu0 %3221 }
 0x666   : > { %9487 = vst [vmem:[#allocation34_spill] sm:$0xff] %v6930_v20  ;;  %9488 = vst [vmem:[#allocation35_spill] sm:$0xff] %v6932_v28 }
 0x669   : > { %v6934_v10 = vpop.permute.xlu1 %3121  ;;  %v6936_v54 = vpop.permute.xlu0 %3172 }
 0x66a   : > { %9489 = vst [vmem:[#allocation36_spill] sm:$0xff] %v6934_v10  ;;  %9490 = vst [vmem:[#allocation37_spill] sm:$0xff] %v6936_v54  ;;  %v3634_v10 = vld [vmem:[%s9471_s18 + $0x3d8] sm:$0xff] }
 0x66d   : > { %v6938_v43 = vpop.permute.xlu1 %3462  ;;  %v6940_v13 = vpop.permute.xlu0 %3123 }
 0x66e   : > { %9491 = vst [vmem:[#allocation38_spill] sm:$0xff] %v6938_v43  ;;  %9492 = vst [vmem:[#allocation39_spill] sm:$0xff] %v6940_v13  ;;  %v3633_v43 = vld [vmem:[%s9471_s18 + $0x3d0] sm:$0xff] }
 0x66f   : > { %v3625_v13 = vld [vmem:[%s9471_s18 + $0x390] sm:$0xff] }
 0x671   : > { %v3418_v39 = vpop.permute.xlu1 %3417  ;;  %v6942_v25 = vpop.permute.xlu0 %3464 }
 0x672   : > { %9493 = vst [vmem:[#allocation40_spill] sm:$0xff] %v6942_v25  ;;  %v3458_v49 = vsel %vm3445_vm12, %v6898_v45, %v3418_v39 }
 0x673   : > { %v3767_v44 = vmul.f32 %v3623_v57, %v3458_v49  ;;  %v3599_v49 = vld [vmem:[%s9471_s18 + $0x2c0] sm:$0xff] }
 0x675   : > { %v3369_v31 = vpop.permute.xlu1 %3368  ;;  %v3420_v7 = vpop.permute.xlu0 %3419 }
 0x676   : > { %v3459_v15 = vsel %vm3445_vm12, %v6906_v46, %v3420_v7 }
 0x677   : > { %v3775_v17 = vmul.f32 %v3631_v32, %v3459_v15 }
 0x679   : > { %v3321_v23 = vpop.permute.xlu1 %3320  ;;  %v3371_v52 = vpop.permute.xlu0 %3370 }
 0x67a   : > { %v3410_v8 = vsel %vm3396_vm13, %v6914_v19, %v3371_v52 }
 0x67d   : > { %v6944_v35 = vpop.permute.xlu1 %3272  ;;  %v3323_v2 = vpop.permute.xlu0 %3322 }
 0x681   : > { %v6946_v51 = vpop.permute.xlu1 %3223  ;;  %v6948_v59 = vpop.permute.xlu0 %3274 }
 0x685   : > { %v6950_v58 = vpop.permute.xlu1 %3174  ;;  %v6952_v30 = vpop.permute.xlu0 %3225 }
 0x689   : > { %v6954_v18 = vpop.permute.xlu1 %3125  ;;  %v6956_v53 = vpop.permute.xlu0 %3176 }
 0x68d   : > { %v6958_v34 = vpop.permute.xlu1 %3466  ;;  %v6960_v16 = vpop.permute.xlu0 %3127 }
 0x68e   : > { %9494 = vst [vmem:[#allocation41_spill] sm:$0xff] %v6958_v34  ;;  %v3626_v34 = vld [vmem:[%s9471_s18 + $0x398] sm:$0xff] }
 0x691   : > { %v6962_v50 = vpop.permute.xlu1 %3421  ;;  %v6964_v26 = vpop.permute.xlu0 %3468 }
 0x692   : > { %9495 = vst [vmem:[#allocation42_spill] sm:$0xff] %v6964_v26  ;;  %v3456_v63 = vsel %vm3445_vm12, %v3418_v39, %v6962_v50  ;;  %v3607_v39 = vld [vmem:[%s9471_s18 + $0x300] sm:$0xff] }
 0x693   : > { %v3768_v27 = vmul.f32 %v3624_v9, %v3456_v63  ;;  %v3855_v63 = vpack.c.bf16 %v3775_v17, %v3767_v44 }
 0x695   : > { %v6980_v1 = vpop.permute.xlu1 %3372  ;;  %v6982_v47 = vpop.permute.xlu0 %3423 }
 0x696   : > { %v3457_v29 = vsel %vm3445_vm12, %v3420_v7, %v6982_v47  ;;  %v3407_v33 = vsel %vm3396_vm13, %v3369_v31, %v6980_v1  ;;  %v3409_v7 = vsel %vm3396_vm13, %v6904_v22, %v3369_v31 }
 0x697   : > { %v3776_v12 = vmul.f32 %v3632_v56, %v3457_v29  ;;  %v3759_v56 = vmul.f32 %v3615_v41, %v3410_v8  ;;  %v3361_v29 = vsel %vm1376_vm9, %v6922_v60, %v3323_v2  ;;  %v3752_v31 = vmul.f32 %v3608_v61, %v3407_v33  ;;  %v3600_v41 = vld [vmem:[%s9471_s18 + $0x2c8] sm:$0xff] }
 0x698   : > { %v3751_v4 = vmul.f32 %v3607_v39, %v3409_v7  ;;  %v3584_v8 = vld [vmem:[%s9471_s18 + $0x248] sm:$0xff]  ;;  %v3743_v33 = vmul.f32 %v3599_v49, %v3361_v29 }
 0x699   : > { %v7001_v32 = vpop.permute.xlu1 %3324  ;;  %v7003_v15 = vpop.permute.xlu0 %3374  ;;  %v3856_v9 = vpack.c.bf16 %v3776_v12, %v3768_v27  ;;  %v3360_v27 = vsel %vm1376_vm9, %v6912_v0, %v3321_v23  ;;  %v3576_v39 = vld [vmem:[%s9471_s18 + $0x208] sm:$0xff] }
 0x69a   : > { %v3408_v57 = vsel %vm3396_vm13, %v3371_v52, %v7003_v15  ;;  %v3358_v17 = vsel %vm1376_vm9, %v3321_v23, %v7001_v32  ;;  %v3591_v52 = vld [vmem:[%s9471_s18 + $0x280] sm:$0xff]  ;;  %v3847_v61 = vpack.c.bf16 %v3759_v56, %v3751_v4  ;;  %v3568_v60 = vld [vmem:[%s9471_s18 + $0x1c8] sm:$0xff]  ;;  %v3313_v23 = vsel %vm1351_vm3, %v6928_v3, %v6948_v59 }
 0x69b   : > { %v3760_v42 = vmul.f32 %v3616_v11, %v3408_v57  ;;  %3887 = vmatprep.subr.bf16.mxu1 %v3856_v9  ;;  %v3736_v7 = vmul.f32 %v3592_v6, %v3358_v17  ;;  %v3735_v57 = vmul.f32 %v3591_v52, %v3360_v27  ;;  %v3560_v56 = vld [vmem:[%s9471_s18 + $0x188] sm:$0xff]  ;;  %v3312_v6 = vsel %vm1351_vm3, %v6920_v5, %v6944_v35  ;;  %v3617_v5 = vld [vmem:[%s9471_s18 + $0x350] sm:$0xff] }
 0x69c   : > { %3888 = vmatpush1.bf16.msra.mxu1 %v3855_v63  ;;  %v3728_v63 = vmul.f32 %v3584_v8, %v6820_v14  ;;  %v3712_v29 = vmul.f32 %v3568_v60, %v3313_v23  ;;  %v3589_v23 = vld [vmem:[%s9471_s18 + $0x270] sm:$0xff] }
 0x69d   : > { %v7022_v12 = vpop.permute.xlu0 %3326  ;;  %v3848_v44 = vpack.c.bf16 %v3760_v42, %v3752_v31  ;;  %v3720_v42 = vmul.f32 %v3576_v39, %v6789_v40  ;;  %v3704_v40 = vmul.f32 %v3560_v56, %v3312_v6 }
 0x69e   : > { %v3359_v11 = vsel %vm1376_vm9, %v3323_v2, %v7022_v12  ;;  %v3839_v2 = vpack.c.bf16 %v3743_v33, %v3735_v57  ;;  %v3581_v57 = vld [vmem:[%s9471_s18 + $0x230] sm:$0xff] }
 0x69f   : > { %v3744_v9 = vmul.f32 %v3600_v41, %v3359_v11  ;;  %3889 = vmatprep.subr.bf16.mxu1 %v3848_v44  ;;  %v3832_v31 = vpack.c.bf16 %v3728_v63, %v3720_v42  ;;  %v3824_v27 = vpack.c.bf16 %v3712_v29, %v3704_v40  ;;  %v9500_v44 = vpack.c.bf16 %v6795_v62, %v6793_v24  ;;  %v3587_v63 = vld [vmem:[%s9471_s18 + $0x260] sm:$0xff] }
 0x6a0   : > { %3890 = vmatpush1.bf16.msra.mxu1 %v3847_v61 }
 0x6a1   : > { %v3840_v4 = vpack.c.bf16 %v3744_v9, %v3736_v7  ;;  %v3579_v9 = vld [vmem:[%s9471_s18 + $0x220] sm:$0xff] }
 0x6a2   : > { %v7040_v49 = vpop.f32.mrf.mxu1  ;;  %v7042_v14 = vpop.f32.mrf.mxu0 }
 0x6a3   : > { %9496 = vst [vmem:[#allocation43_spill] sm:$0xff] %v7040_v49  ;;  %9497 = vst [vmem:[#allocation44_spill] sm:$0xff] %v7042_v14  ;;  %3891 = vmatprep.subr.bf16.mxu1 %v3840_v4 }
 0x6a4   : > { %3892 = vmatpush1.bf16.msra.mxu1 %v3839_v2  ;;  %v7044_v17 = vpop.f32.mrf.mxu0  ;;  %v7046_v41 = vpop.f32.mrf.mxu1 }
 0x6a5   : > { %9498 = vst [vmem:[#allocation45_spill] sm:$0xff] %v7044_v17  ;;  %9499 = vst [vmem:[#allocation46_spill] sm:$0xff] %v7046_v41  ;;  %3893 = vmatprep.subr.bf16.mxu1 %v3832_v31 }
 0x6a6   : > { %v2965_v8 = vpop.f32.mrf.mxu1  ;;  %v3016_v52 = vpop.f32.mrf.mxu0 }
 0x6a8   : > { %3894 = vmatpush1.bf16.msra.mxu1 %v9500_v44  ;;  %v3017_v60 = vpop.f32.mrf.mxu0  ;;  %v2966_v61 = vpop.f32.mrf.mxu1 }
 0x6a9   : > { %3895 = vmatprep.subr.bf16.mxu1 %v3824_v27 }
 0x6aa   : > { %v3053_v33 = vpop.f32.mrf.mxu1  ;;  %v7051_v11 = vpop.f32.mrf.mxu0 }
 0x6ab   : > { %3429 = vrot.lane.b32.xlu1 %v3053_v33, %s9474_s7  ;;  %v7064_v24 = vmul.f32 %v3579_v9, %v3053_v33  ;;  %v7073_v2 = vmul.f32 %v3581_v57, %v7051_v11  ;;  %v7105_v57 = vld [vmem:[%s9510_s15] sm:$0xff]  ;;  %s9514_s15 = smov 113  }
 0x6ac   : > { %v7054_v39 = vpop.f32.mrf.mxu0  ;;  %v7056_v7 = vpop.f32.mrf.mxu1 }
 0x6ad   : > { %9501 = vst [vmem:[#allocation47_spill] sm:$0xff] %v7054_v39  ;;  %9502 = vst [vmem:[#allocation48_spill] sm:$0xff] %v7056_v7 }
 0x6ae   : > { %v3057_v4 = vpop.f32.mrf.mxu1  ;;  %v3108_v42 = vpop.f32.mrf.mxu0  ;;  %9503 = vst [vmem:[#allocation49_spill] sm:$0xff] %v7064_v24  ;;  %9505 = vst [vmem:[#allocation51_spill] sm:$0xff] %v7073_v2 }
 0x6af   : > { %3380 = vrot.lane.b32.xlu1 %v3053_v33, %s9355_s10  ;;  %3431 = vrot.lane.b32.xlu0 %v3057_v4, %s9474_s7  ;;  %v7066_v62 = vmul.f32 %v3587_v63, %v3057_v4  ;;  %v7075_v29 = vmul.f32 %v3589_v23, %v3108_v42  ;;  %v7109_v23 = vcombine.high %v7105_v57, %v7105_v57 }
 0x6b0   : > { %v7068_v56 = vpop.f32.mrf.mxu0  ;;  %v7070_v6 = vpop.f32.mrf.mxu1 }
 0x6b1   : > { %9504 = vst [vmem:[#allocation50_spill] sm:$0xff] %v7066_v62  ;;  %9506 = vst [vmem:[#allocation52_spill] sm:$0xff] %v7075_v29  ;;  %5509 = vmatprep.mubr.msk.bf16.mxu0 %vm2005_vm11, %v7109_v23  ;;  %5508 = vmatprep.mubr.msk.bf16.mxu1 %vm2005_vm11, %v7109_v23 }
 0x6b2   : > { %v7079_v40 = vpop.f32.mrf.mxu1  ;;  %v7081_v8 = vpop.f32.mrf.mxu0  ;;  %9512 = vst [vmem:[#allocation57_spill] sm:$0xff] %v7109_v23 }
 0x6b3   : > { %9507 = vst [vmem:[#allocation53_spill] sm:$0xff] %v7079_v40  ;;  %9508 = vst [vmem:[#allocation54_spill] sm:$0xff] %v7081_v8  ;;  %3332 = vrot.lane.b32.xlu1 %v3053_v33, %s9472_s1  ;;  %3382 = vrot.lane.b32.xlu0 %v3057_v4, %s9355_s10 }
 0x6b4   : > { %v7087_v27 = vpop.f32.mrf.mxu0  ;;  %v7089_v44 = vpop.f32.mrf.mxu1 }
 0x6b5   : > { %9509 = vst [vmem:[#allocation55_spill] sm:$0xff] %v7087_v27  ;;  %9511 = vst [vmem:[#allocation56_spill] sm:$0xff] %v7089_v44 }
 0x6b6   : > { %v3067_v60 = vpop.f32.mrf.mxu1  ;;  %v3118_v61 = vpop.f32.mrf.mxu0 }
 0x6b7   : > { %3478 = vrot.lane.b32.xlu1 %v3053_v33, %s9477_s0  ;;  %3334 = vrot.lane.b32.xlu0 %v3057_v4, %s9472_s1  ;;  %v7120_v60 = vpop.permute.xlu1 %3276  ;;  %v7125_v61 = vpop.permute.xlu0 %3278 }
 0x6b8   : > { %v3119_v9 = vpop.f32.mrf.mxu0  ;;  %v3068_v63 = vpop.f32.mrf.mxu1 }
 0x6bb   : > { %3437 = vrot.lane.b32.xlu1 %v7051_v11, %s9474_s7  ;;  %3480 = vrot.lane.b32.xlu0 %v3057_v4, %s9477_s0  ;;  %v7127_v9 = vpop.permute.xlu1 %3227  ;;  %v7131_v63 = vpop.permute.xlu0 %3229 }
 0x6bf   : > { %3388 = vrot.lane.b32.xlu1 %v7051_v11, %s9355_s10  ;;  %3439 = vrot.lane.b32.xlu0 %v3108_v42, %s9474_s7  ;;  %v7136_v52 = vpop.permute.xlu1 %3178  ;;  %v7140_v31 = vpop.permute.xlu0 %3180 }
 0x6c3   : > { %3340 = vrot.lane.b32.xlu1 %v7051_v11, %s9472_s1  ;;  %3390 = vrot.lane.b32.xlu0 %v3108_v42, %s9355_s10  ;;  %s9513_s10 = smov 15   ;;  %v7142_v44 = vpop.permute.xlu1 %3129  ;;  %v7147_v40 = vpop.permute.xlu0 %3131 }
 0x6c7   : > { %3284 = vrot.lane.b32.xlu1 %v3053_v33, %s9475_s11  ;;  %3342 = vrot.lane.b32.xlu0 %v3108_v42, %s9472_s1  ;;  %v7152_v27 = vpop.permute.xlu1 %3470 }
 0x6cb   : > { %3292 = vrot.lane.b32.xlu1 %v7051_v11, %s9475_s11  ;;  %3286 = vrot.lane.b32.xlu0 %v3057_v4, %s9475_s11  ;;  %v3426_v8 = vpop.permute.xlu1 %3425 }
 0x6cf   : > { %3235 = vrot.lane.b32.xlu1 %v3053_v33, %s9513_s10  ;;  %3294 = vrot.lane.b32.xlu0 %v3108_v42, %s9475_s11 }
 0x6d3   : > { %3243 = vrot.lane.b32.xlu1 %v7051_v11, %s9513_s10  ;;  %3237 = vrot.lane.b32.xlu0 %v3057_v4, %s9513_s10 }
 0x6d7   : > { %3186 = vrot.lane.b32.xlu1 %v3053_v33, %s9473_s23  ;;  %3245 = vrot.lane.b32.xlu0 %v3108_v42, %s9513_s10 }
 0x6db   : > { %3194 = vrot.lane.b32.xlu1 %v7051_v11, %s9473_s23  ;;  %3188 = vrot.lane.b32.xlu0 %v3057_v4, %s9473_s23 }
 0x6df   : > { %3137 = vrot.lane.b32.xlu1 %v3053_v33, %s9476_s26  ;;  %3196 = vrot.lane.b32.xlu0 %v3108_v42, %s9473_s23  ;;  %v7157_v33 = vpop.permute.xlu0 %3472 }
 0x6e3   : > { %3145 = vrot.lane.b32.xlu1 %v7051_v11, %s9476_s26  ;;  %3139 = vrot.lane.b32.xlu0 %v3057_v4, %s9476_s26  ;;  %v3428_v4 = vpop.permute.xlu0 %3427 }
 0x6e4   : > { %v3455_v25 = vsel %vm3445_vm12, %v6982_v47, %v3428_v4  ;;  %v3454_v47 = vsel %vm3445_vm12, %v6962_v50, %v3426_v8 }
 0x6e5   : > { %v3777_v3 = vmul.f32 %v3633_v43, %v3455_v25  ;;  %v3769_v43 = vmul.f32 %v3625_v13, %v3454_v47  ;;  %v3610_v25 = vld [vmem:[%s9471_s18 + $0x318] sm:$0xff] }
 0x6e7   : > { %3486 = vrot.lane.b32.xlu1 %v7051_v11, %s9477_s0  ;;  %3147 = vrot.lane.b32.xlu0 %v3108_v42, %s9476_s26  ;;  %v3377_v11 = vpop.permute.xlu1 %3376  ;;  %v3857_v13 = vpack.c.bf16 %v3777_v3, %v3769_v43  ;;  %v3586_v3 = vld [vmem:[%s9471_s18 + $0x258] sm:$0xff] }
 0x6eb   : > { %3296 = vrot.lane.b32.xlu1 %v7054_v39, %s9475_s11  ;;  %3488 = vrot.lane.b32.xlu0 %v3108_v42, %s9477_s0  ;;  %v7171_v42 = vpop.permute.xlu0 %3378  ;;  %v7173_v41 = vpop.permute.xlu1 %3328 }
 0x6ec   : > { %v3356_v43 = vsel %vm1376_vm9, %v7001_v32, %v7173_v41  ;;  %v3730_v32 = vmul.f32 %v3586_v3, %v6880_v38  ;;  %v3562_v3 = vld [vmem:[%s9471_s18 + $0x198] sm:$0xff] }
 0x6ef   : > { %3247 = vrot.lane.b32.xlu1 %v7054_v39, %s9513_s10  ;;  %3298 = vrot.lane.b32.xlu0 %v7068_v56, %s9475_s11  ;;  %v7179_v49 = vpop.permute.xlu0 %3330  ;;  %v7185_v17 = vpop.permute.xlu1 %3280 }
 0x6f3   : > { %3198 = vrot.lane.b32.xlu1 %v7054_v39, %s9473_s23  ;;  %3249 = vrot.lane.b32.xlu0 %v7068_v56, %s9513_s10  ;;  %v7191_v14 = vpop.permute.xlu0 %3282  ;;  %v7193_v2 = vpop.permute.xlu1 %3231 }
 0x6f7   : > { %3149 = vrot.lane.b32.xlu1 %v7054_v39, %s9476_s26  ;;  %3200 = vrot.lane.b32.xlu0 %v7068_v56, %s9473_s23  ;;  %v7199_v29 = vpop.permute.xlu0 %3233  ;;  %v7205_v24 = vpop.permute.xlu1 %3182 }
 0x6fb   : > { %3433 = vrot.lane.b32.xlu1 %v7056_v7, %s9474_s7  ;;  %3151 = vrot.lane.b32.xlu0 %v7068_v56, %s9476_s26  ;;  %v7211_v62 = vpop.permute.xlu0 %3184  ;;  %v7213_v0 = vpop.permute.xlu1 %3133 }
 0x6ff   : > { %3441 = vrot.lane.b32.xlu1 %v7054_v39, %s9474_s7  ;;  %3435 = vrot.lane.b32.xlu0 %v7070_v6, %s9474_s7  ;;  %v7219_v19 = vpop.permute.xlu0 %3135  ;;  %v7225_v22 = vpop.permute.xlu1 %3474 }
 0x700   : > { %9515 = vst [vmem:[#allocation58_spill] sm:$0xff] %v7219_v19 }
 0x703   : > { %3384 = vrot.lane.b32.xlu1 %v7056_v7, %s9514_s15  ;;  %3443 = vrot.lane.b32.xlu0 %v7068_v56, %s9474_s7  ;;  %v7231_v46 = vpop.permute.xlu0 %3476 }
 0x707   : > { %3392 = vrot.lane.b32.xlu1 %v7054_v39, %s9514_s15  ;;  %3386 = vrot.lane.b32.xlu0 %v7070_v6, %s9514_s15 }
 0x70b   : > { %3336 = vrot.lane.b32.xlu1 %v7056_v7, %s9472_s1  ;;  %3394 = vrot.lane.b32.xlu0 %v7068_v56, %s9514_s15 }
 0x70f   : > { %3344 = vrot.lane.b32.xlu1 %v7054_v39, %s9472_s1  ;;  %3338 = vrot.lane.b32.xlu0 %v7070_v6, %s9472_s1 }
 0x713   : > { %3288 = vrot.lane.b32.xlu1 %v7056_v7, %s9475_s11  ;;  %3346 = vrot.lane.b32.xlu0 %v7068_v56, %s9472_s1 }
 0x717   : > { %3239 = vrot.lane.b32.xlu1 %v7056_v7, %s9513_s10  ;;  %3290 = vrot.lane.b32.xlu0 %v7070_v6, %s9475_s11 }
 0x71b   : > { %3190 = vrot.lane.b32.xlu1 %v7056_v7, %s9473_s23  ;;  %3241 = vrot.lane.b32.xlu0 %v7070_v6, %s9513_s10 }
 0x71d   : > { %v7233_v45 = vpop.permute.xlu1 %3429 }
 0x71e   : > { %9516 = vst [vmem:[#allocation59_spill] sm:$0xff] %v7233_v45  ;;  %v3452_v26 = vsel %vm3445_vm12, %v3426_v8, %v7233_v45  ;;  %v3406_v45 = vsel %vm3396_vm13, %v7003_v15, %v7171_v42  ;;  %v3618_v8 = vld [vmem:[%s9471_s18 + $0x358] sm:$0xff] }
 0x71f   : > { %3141 = vrot.lane.b32.xlu1 %v7056_v7, %s9476_s26  ;;  %3192 = vrot.lane.b32.xlu0 %v7070_v6, %s9473_s23  ;;  %v3770_v28 = vmul.f32 %v3626_v34, %v3452_v26  ;;  %v3761_v15 = vmul.f32 %v3617_v5, %v3406_v45  ;;  %v3594_v5 = vld [vmem:[%s9471_s18 + $0x298] sm:$0xff] }
 0x721   : > { %v7252_v20 = vpop.permute.xlu1 %3380  ;;  %v7254_v54 = vpop.permute.xlu0 %3431 }
 0x722   : > { %9517 = vst [vmem:[#allocation60_spill] sm:$0xff] %v7252_v20  ;;  %v3453_v48 = vsel %vm3445_vm12, %v3428_v4, %v7254_v54  ;;  %v3403_v50 = vsel %vm3396_vm13, %v3377_v11, %v7252_v20  ;;  %v3609_v4 = vld [vmem:[%s9471_s18 + $0x310] sm:$0xff] }
 0x723   : > { %v3778_v23 = vmul.f32 %v3634_v10, %v3453_v48  ;;  %3482 = vrot.lane.b32.xlu1 %v7056_v7, %s9477_s0  ;;  %3143 = vrot.lane.b32.xlu0 %v7070_v6, %s9476_s26  ;;  %v3405_v48 = vsel %vm3396_vm13, %v6980_v1, %v3377_v11  ;;  %v3601_v7 = vld [vmem:[%s9471_s18 + $0x2d0] sm:$0xff]  ;;  %v3357_v1 = vsel %vm1376_vm9, %v7022_v12, %v7179_v49  ;;  %v3602_v12 = vld [vmem:[%s9471_s18 + $0x2d8] sm:$0xff] }
 0x724   : > { %v3754_v11 = vmul.f32 %v3610_v25, %v3403_v50  ;;  %v3753_v45 = vmul.f32 %v3609_v4, %v3405_v48  ;;  %v3745_v48 = vmul.f32 %v3601_v7, %v3357_v1 }
 0x725   : > { %v7277_v10 = vpop.permute.xlu1 %3332  ;;  %v7279_v34 = vpop.permute.xlu0 %3382  ;;  %v3858_v26 = vpack.c.bf16 %v3778_v23, %v3770_v28  ;;  %v3872_v23 = vld [vmem:[%s9519_s2] sm:$0xff]  ;;  %s9522_s2 = sld [smem:[#allocation16_spill]] }
 0x726   : > { %9518 = vst [vmem:[#allocation61_spill] sm:$0xff] %v7277_v10  ;;  %v3404_v47 = vsel %vm3396_vm13, %v7171_v42, %v7279_v34  ;;  %v3354_v28 = vsel %vm1376_vm9, %v7173_v41, %v7277_v10  ;;  %v3593_v42 = vld [vmem:[%s9471_s18 + $0x290] sm:$0xff]  ;;  %v3849_v4 = vpack.c.bf16 %v3761_v15, %v3753_v45  ;;  %v3308_v45 = vsel %vm1351_vm3, %v7120_v60, %v7185_v17 }
 0x727   : > { %v3762_v20 = vmul.f32 %v3618_v8, %v3404_v47  ;;  %3490 = vrot.lane.b32.xlu1 %v7054_v39, %s9477_s0  ;;  %3928 = vmatprep.subr.bf16.mxu0 %v3858_v26  ;;  %v3738_v47 = vmul.f32 %v3594_v5, %v3354_v28  ;;  %v3737_v41 = vmul.f32 %v3593_v42, %v3356_v43  ;;  %v3570_v39 = vld [vmem:[%s9471_s18 + $0x1d8] sm:$0xff]  ;;  %v3569_v28 = vld [vmem:[%s9471_s18 + $0x1d0] sm:$0xff] }
 0x728   : > { %3484 = vrot.lane.b32.xlu0 %v7070_v6, %s9477_s0  ;;  %3929 = vmatpush1.bf16.msra.mxu0 %v3857_v13  ;;  %v3578_v13 = vld [vmem:[%s9471_s18 + $0x218] sm:$0xff]  ;;  %v3261_v42 = vsel %vm3251_vm14, %v7131_v63, %v7199_v29  ;;  %v3561_v43 = vld [vmem:[%s9471_s18 + $0x190] sm:$0xff] }
 0x729   : > { %v7307_v25 = vpop.permute.xlu1 %3478  ;;  %v7309_v50 = vpop.permute.xlu0 %3334  ;;  %v3850_v8 = vpack.c.bf16 %v3762_v20, %v3754_v11  ;;  %v3309_v20 = vsel %vm1351_vm3, %v7125_v61, %v7191_v14  ;;  %v3722_v11 = vmul.f32 %v3578_v13, %v6850_v36  ;;  %v3841_v5 = vpack.c.bf16 %v3745_v48, %v3737_v41  ;;  %v3546_v48 = vld [vmem:[%s9471_s18 + $0x118] sm:$0xff]  ;;  %v3553_v13 = vld [vmem:[%s9471_s18 + $0x150] sm:$0xff] }
 0x72a   : > { %9520 = vst [vmem:[#allocation62_spill] sm:$0xff] %v7307_v25  ;;  %v3355_v26 = vsel %vm1376_vm9, %v7179_v49, %v7309_v50  ;;  %v4065_v49 = vld [vmem:[%s9521_s3] sm:$0xff]  ;;  %v3538_v41 = vld [vmem:[%s9471_s18 + $0xd8] sm:$0xff]  ;;  %s9579_s3 = sld [smem:[#allocation24_spill]] }
 0x72b   : > { %v3746_v10 = vmul.f32 %v3602_v12, %v3355_v26  ;;  %3875 = vperm.xlu1 %5637, %v3872_v23   ;;  %3930 = vmatprep.subr.bf16.mxu0 %v3850_v8  ;;  %v4051_v38 = vld [vmem:[%s9522_s2] sm:$0xff]  ;;  %v3311_v12 = vsel %vm1351_vm3, %v6948_v59, %v7125_v61  ;;  %v3834_v36 = vpack.c.bf16 %v3730_v32, %v3722_v11  ;;  %v3554_v23 = vld [vmem:[%s9471_s18 + $0x158] sm:$0xff]  ;;  %s9580_s2 = sld [smem:[#allocation19_spill]] }
 0x72c   : > { %3492 = vrot.lane.b32.xlu0 %v7068_v56, %s9477_s0  ;;  %3931 = vmatpush1.bf16.msra.mxu0 %v3849_v4  ;;  %v3310_v59 = vsel %vm1351_vm3, %v6944_v35, %v7120_v60  ;;  %v3713_v4 = vmul.f32 %v3569_v28, %v3311_v12  ;;  %v3260_v26 = vsel %vm3251_vm14, %v7127_v9, %v7193_v2  ;;  %v3530_v28 = vld [vmem:[%s9471_s18 + $0x98] sm:$0xff] }
 0x72d   : > { %v7325_v7 = vpop.permute.xlu1 %3437  ;;  %v7327_v15 = vpop.permute.xlu0 %3480  ;;  %v3842_v1 = vpack.c.bf16 %v3746_v10, %v3738_v47  ;;  %v3714_v10 = vmul.f32 %v3570_v39, %v3309_v20  ;;  %v3706_v39 = vmul.f32 %v3562_v3, %v3308_v45  ;;  %v3263_v35 = vsel %vm3251_vm14, %v6952_v30, %v7131_v63 }
 0x72e   : > { %9523 = vst [vmem:[#allocation63_spill] sm:$0xff] %v7327_v15  ;;  %v3698_v60 = vmul.f32 %v3554_v23, %v3261_v42  ;;  %v3705_v32 = vmul.f32 %v3561_v43, %v3310_v59  ;;  %v3212_v20 = vsel %vm3202_vm15, %v7140_v31, %v7211_v62  ;;  %v3262_v63 = vsel %vm3251_vm14, %v6946_v51, %v7127_v9  ;;  %v3522_v23 = vld [vmem:[%s9471_s18 + $0x58] sm:$0xff]  ;;  %v3529_v43 = vld [vmem:[%s9471_s18 + $0x90] sm:$0xff] }
 0x72f   : > { %4068 = vperm.xlu1 %5637, %v4065_v49   ;;  %3932 = vmatprep.subr.bf16.mxu0 %v3842_v1  ;;  %v3826_v47 = vpack.c.bf16 %v3714_v10, %v3706_v39  ;;  %v9524_v49 = vpack.c.bf16 %v6859_v21, %v6857_v55  ;;  %v3545_v1 = vld [vmem:[%s9471_s18 + $0x110] sm:$0xff]  ;;  %v3211_v55 = vsel %vm3202_vm15, %v7136_v52, %v7205_v24 }
 0x730   : > { %4054 = vperm.xlu0 %5636, %v4051_v38   ;;  %3933 = vmatpush1.bf16.msra.mxu0 %v3841_v5  ;;  %v3690_v38 = vmul.f32 %v3546_v48, %v3260_v26  ;;  %v3825_v45 = vpack.c.bf16 %v3713_v4, %v3705_v32  ;;  %v3697_v5 = vmul.f32 %v3553_v13, %v3263_v35  ;;  %v3537_v21 = vld [vmem:[%s9471_s18 + $0xd0] sm:$0xff]  ;;  %v3514_v13 = vld [vmem:[%s9471_s18 + $0x18] sm:$0xff] }
 0x731   : > { %v7352_v61 = vpop.permute.xlu1 %3388  ;;  %3934 = vmatprep.subr.bf16.mxu0 %v3834_v36  ;;  %v7354_v8 = vpop.permute.xlu0 %3439  ;;  %v3214_v9 = vsel %vm3202_vm15, %v6956_v53, %v7140_v31  ;;  %v3682_v12 = vmul.f32 %v3538_v41, %v3212_v20  ;;  %v3689_v36 = vmul.f32 %v3545_v1, %v3262_v63  ;;  %v3163_v42 = vsel %vm3153_vm0, %v7147_v40, %v7219_v19  ;;  %v3650_v20 = vld [vmem:[%s9471_s18 + $0x458] sm:$0xff]  ;;  %v3513_v1 = vld [vmem:[%s9471_s18 + $0x10] sm:$0xff] }
 0x732   : > { %v3818_v10 = vpack.c.bf16 %v3698_v60, %v3690_v38  ;;  %v3213_v59 = vsel %vm3202_vm15, %v6950_v58, %v7136_v52  ;;  %v3674_v39 = vmul.f32 %v3530_v28, %v3211_v55  ;;  %v3681_v26 = vmul.f32 %v3537_v21, %v3214_v9  ;;  %v3521_v60 = vld [vmem:[%s9471_s18 + $0x50] sm:$0xff]  ;;  %v3642_v55 = vld [vmem:[%s9471_s18 + $0x418] sm:$0xff] }
 0x733   : > { %v3817_v48 = vpack.c.bf16 %v3697_v5, %v3689_v36  ;;  %v3162_v35 = vsel %vm3153_vm0, %v7142_v44, %v7213_v0  ;;  %v3165_v52 = vsel %vm3153_vm0, %v6960_v16, %v7147_v40  ;;  %v3673_v41 = vmul.f32 %v3529_v43, %v3213_v59  ;;  %v3649_v9 = vld [vmem:[%s9471_s18 + $0x450] sm:$0xff] }
 0x734   : > { %3935 = vmatpush1.bf16.msra.mxu0 %v9524_v49  ;;  %v3810_v32 = vpack.c.bf16 %v3682_v12, %v3674_v39  ;;  %v3502_v49 = vsel %vm3494_vm1, %v7231_v46, %v7327_v15  ;;  %v3164_v63 = vsel %vm3153_vm0, %v6954_v18, %v7142_v44  ;;  %v3658_v38 = vmul.f32 %v3514_v13, %v3162_v35 }
 0x735   : > { %v7380_v11 = vpop.permute.xlu1 %3340  ;;  %3936 = vmatprep.subr.bf16.mxu0 %v3826_v47  ;;  %v7382_v3 = vpop.permute.xlu0 %3390  ;;  %v3666_v47 = vmul.f32 %v3522_v23, %v3163_v42  ;;  %v3809_v5 = vpack.c.bf16 %v3681_v26, %v3673_v41  ;;  %v3665_v28 = vmul.f32 %v3521_v60, %v3165_v52  ;;  %v3501_v21 = vsel %vm3494_vm1, %v7225_v22, %v7307_v25  ;;  %v3641_v23 = vld [vmem:[%s9471_s18 + $0x410] sm:$0xff]  ;;  %v9525_v41 = vld [vmem:[#allocation57_spill] sm:$0xff] }
 0x736   : > { %v3504_v44 = vsel %vm3494_vm1, %v7157_v33, %v7231_v46  ;;  %v3794_v12 = vmul.f32 %v3650_v20, %v3502_v49  ;;  %v3657_v36 = vmul.f32 %v3513_v1, %v3164_v63  ;;  %v3503_v42 = vsel %vm3494_vm1, %v7152_v27, %v7225_v22 }
 0x737   : > { %v3786_v43 = vmul.f32 %v3642_v55, %v3501_v21  ;;  %v3793_v26 = vmul.f32 %v3649_v9, %v3504_v44  ;;  %v3785_v46 = vmul.f32 %v3641_v23, %v3503_v42  ;;  %v7459_v22 = vcombine.low %v7105_v57, %v7105_v57  ;;  %v3552_v9 = vld [vmem:[%s9471_s18 + $0x148] sm:$0xff]  ;;  %v9533_v44 = vld [vmem:[#allocation35_spill] sm:$0xff]  ;;  %v3567_v42 = vld [vmem:[%s9471_s18 + $0x1c0] sm:$0xff] }
 0x738   : > { %3937 = vmatpush1.bf16.msra.mxu0 %v3825_v45 }
 0x739   : > { %v7405_v31 = vpop.permute.xlu1 %3284  ;;  %3938 = vmatprep.subr.bf16.mxu0 %v3818_v10  ;;  %v7407_v4 = vpop.permute.xlu0 %3342  ;;  %v3802_v10 = vpack.c.bf16 %v3666_v47, %v3658_v38  ;;  %v3866_v13 = vpack.c.bf16 %v3794_v12, %v3786_v43  ;;  %v3865_v52 = vpack.c.bf16 %v3793_v26, %v3785_v46  ;;  %v3265_v12 = vsel %vm3251_vm14, %v9533_v44, %v6952_v30  ;;  %v3544_v43 = vld [vmem:[%s9471_s18 + $0x108] sm:$0xff] }
 0x73a   : > { %v3696_v30 = vmul.f32 %v3552_v9, %v3265_v12  ;;  %v3551_v12 = vld [vmem:[%s9471_s18 + $0x140] sm:$0xff] }
 0x73c   : > { %3939 = vmatpush1.bf16.msra.mxu0 %v3817_v48  ;;  %v3801_v48 = vpack.c.bf16 %v3665_v28, %v3657_v36  ;;  %v9534_v36 = vld [vmem:[#allocation30_spill] sm:$0xff] }
 0x73d   : > { %v7430_v40 = vpop.permute.xlu1 %3292  ;;  %3940 = vmatprep.subr.bf16.mxu0 %v3810_v32  ;;  %v7432_v45 = vpop.permute.xlu0 %3286 }
 0x740   : > { %3941 = vmatpush1.bf16.msra.mxu0 %v3809_v5 }
 0x741   : > { %v7449_v59 = vpop.permute.xlu1 %3235  ;;  %3942 = vmatprep.subr.bf16.mxu0 %v3802_v10  ;;  %v7451_v39 = vpop.permute.xlu0 %3294  ;;  %v3559_v10 = vld [vmem:[%s9471_s18 + $0x180] sm:$0xff] }
 0x744   : > { %3943 = vmatpush1.bf16.msra.mxu0 %v3801_v48  ;;  %v9535_v48 = vld [vmem:[#allocation32_spill] sm:$0xff] }
 0x745   : > { %v7453_v35 = vpop.permute.xlu1 %3243  ;;  %3958 = vmatprep.subr.bf16.mxu0 %v3866_v13  ;;  %v7455_v60 = vpop.permute.xlu0 %3237  ;;  %v3264_v26 = vsel %vm3251_vm14, %v9535_v48, %v6946_v51 }
 0x746   : > { %v3688_v51 = vmul.f32 %v3544_v43, %v3264_v26  ;;  %v3520_v43 = vld [vmem:[%s9471_s18 + $0x48] sm:$0xff] }
 0x748   : > { %3959 = vmatpush2.bf16.msra.mxu0 %v3865_v52  ;;  %v9536_v52 = vld [vmem:[#allocation33_spill] sm:$0xff] }
 0x749   : > { %v7461_v47 = vpop.permute.xlu1 %3186  ;;  %v7463_v32 = vpop.permute.xlu0 %3245 }
 0x74b   : > { %3961 = vmatmul.mubr.bf16.vlgmr.msra.gmra.mxu0 %v7459_v22 }
 0x74c   : > { %5511 = vmatprep.mubr.msk.bf16.mxu0 %vm2005_vm11, %v9525_v41 }
 0x74d   : > { %v7468_v20 = vpop.permute.xlu1 %3194  ;;  %v7470_v49 = vpop.permute.xlu0 %3188 }
 0x74e   : > { %9526 = vst [vmem:[#allocation57_spill] sm:$0xff] %v7468_v20 }
 0x751   : > { %v7472_v57 = vpop.permute.xlu1 %3137  ;;  %v7474_v1 = vpop.permute.xlu0 %3196 }
 0x752   : > { %9527 = vst [vmem:[#allocation64_spill] sm:$0xff] %v7474_v1  ;;  %v3528_v1 = vld [vmem:[%s9471_s18 + $0x88] sm:$0xff] }
 0x755   : > { %v7476_v63 = vpop.permute.xlu1 %3145  ;;  %v7478_v38 = vpop.permute.xlu0 %3139 }
 0x756   : > { %9528 = vst [vmem:[#allocation65_spill] sm:$0xff] %v7476_v63  ;;  %9529 = vst [vmem:[#allocation66_spill] sm:$0xff] %v7478_v38  ;;  %v3543_v63 = vld [vmem:[%s9471_s18 + $0x100] sm:$0xff] }
 0x757   : > { %v3527_v38 = vld [vmem:[%s9471_s18 + $0x80] sm:$0xff] }
 0x759   : > { %v7480_v5 = vpop.permute.xlu1 %3486  ;;  %v7482_v28 = vpop.permute.xlu0 %3147 }
 0x75a   : > { %9530 = vst [vmem:[#allocation67_spill] sm:$0xff] %v7480_v5  ;;  %9531 = vst [vmem:[#allocation68_spill] sm:$0xff] %v7482_v28 }
 0x75d   : > { %v7484_v55 = vpop.permute.xlu1 %3296  ;;  %v7486_v21 = vpop.permute.xlu0 %3488 }
 0x75e   : > { %9532 = vst [vmem:[#allocation69_spill] sm:$0xff] %v7486_v21  ;;  %v3314_v23 = vsel %vm1351_vm3, %v7484_v55, %v9534_v36  ;;  %v3536_v21 = vld [vmem:[%s9471_s18 + $0xc8] sm:$0xff]  ;;  %v9537_v36 = vld [vmem:[#allocation37_spill] sm:$0xff] }
 0x75f   : > { %v3216_v25 = vsel %vm3202_vm15, %v9537_v36, %v6956_v53  ;;  %v3703_v5 = vmul.f32 %v3559_v10, %v3314_v23 }
 0x760   : > { %v3680_v10 = vmul.f32 %v3536_v21, %v3216_v25  ;;  %v3535_v21 = vld [vmem:[%s9471_s18 + $0xc0] sm:$0xff] }
 0x761   : > { %v7504_v13 = vpop.permute.xlu1 %3247  ;;  %v7506_v46 = vpop.permute.xlu0 %3298 }
 0x762   : > { %v3315_v15 = vsel %vm1351_vm3, %v7506_v46, %v9536_v52  ;;  %v3266_v9 = vsel %vm3251_vm14, %v7504_v13, %v9535_v48  ;;  %v9538_v52 = vld [vmem:[#allocation34_spill] sm:$0xff]  ;;  %v9539_v48 = vld [vmem:[#allocation39_spill] sm:$0xff] }
 0x763   : > { %v3711_v28 = vmul.f32 %v3567_v42, %v3315_v15  ;;  %v3215_v20 = vsel %vm3202_vm15, %v9538_v52, %v6950_v58  ;;  %v3816_v42 = vpack.c.bf16 %v3696_v30, %v3688_v51  ;;  %v3167_v58 = vsel %vm3153_vm0, %v9539_v48, %v6960_v16  ;;  %v9540_v30 = vld [vmem:[#allocation36_spill] sm:$0xff] }
 0x764   : > { %v3687_v26 = vmul.f32 %v3543_v63, %v3266_v9  ;;  %v3166_v16 = vsel %vm3153_vm0, %v9540_v30, %v6954_v18 }
 0x765   : > { %v3823_v19 = vpack.c.bf16 %v3711_v28, %v3703_v5  ;;  %v7528_v53 = vpop.permute.xlu1 %3198  ;;  %v7530_v15 = vpop.permute.xlu0 %3249  ;;  %v3672_v28 = vmul.f32 %v3528_v1, %v3215_v20  ;;  %v3664_v1 = vmul.f32 %v3520_v43, %v3167_v58  ;;  %v9544_v58 = vld [vmem:[#allocation41_spill] sm:$0xff] }
 0x766   : > { %v3267_v23 = vsel %vm3251_vm14, %v7530_v15, %v9533_v44  ;;  %v3217_v25 = vsel %vm3202_vm15, %v7528_v53, %v9538_v52  ;;  %v3512_v44 = vld [vmem:[%s9471_s18 + $0x8] sm:$0xff] }
 0x767   : > { %v3695_v5 = vmul.f32 %v3551_v12, %v3267_v23  ;;  %3896 = vmatpush1.bf16.msra.mxu1 %v3823_v19  ;;  %v3808_v9 = vpack.c.bf16 %v3680_v10, %v3672_v28  ;;  %v3648_v12 = vld [vmem:[%s9471_s18 + $0x448] sm:$0xff]  ;;  %v3671_v23 = vmul.f32 %v3527_v38, %v3217_v25 }
 0x768   : > { %3897 = vmatprep.subr.bf16.mxu1 %v3816_v42  ;;  %v9543_v52 = vld [vmem:[#allocation42_spill] sm:$0xff] }
 0x769   : > { %v3815_v63 = vpack.c.bf16 %v3695_v5, %v3687_v26  ;;  %v7552_v19 = vpop.permute.xlu1 %3149  ;;  %v7554_v20 = vpop.permute.xlu0 %3200  ;;  %v3506_v18 = vsel %vm3494_vm1, %v9543_v52, %v7157_v33  ;;  %v3656_v26 = vmul.f32 %v3512_v44, %v3166_v16  ;;  %v3511_v5 = vld [vmem:[%s9471_s18] sm:$0xff]  ;;  %v3640_v10 = vld [vmem:[%s9471_s18 + $0x408] sm:$0xff]  ;;  %v3505_v33 = vsel %vm3494_vm1, %v9544_v58, %v7152_v27  ;;  %v9545_v44 = vld [vmem:[#allocation40_spill] sm:$0xff] }
 0x76a   : > { %9541 = vst [vmem:[#allocation35_spill] sm:$0xff] %v7552_v19  ;;  %9542 = vst [vmem:[#allocation30_spill] sm:$0xff] %v7554_v20  ;;  %v3218_v51 = vsel %vm3202_vm15, %v7554_v20, %v9537_v36  ;;  %v3168_v43 = vsel %vm3153_vm0, %v7552_v19, %v9540_v30  ;;  %v3519_v36 = vld [vmem:[%s9471_s18 + $0x40] sm:$0xff]  ;;  %v3508_v30 = vsel %vm3494_vm1, %v9545_v44, %v9543_v52  ;;  %v3628_v52 = vld [vmem:[%s9471_s18 + $0x3a8] sm:$0xff] }
 0x76b   : > { %v3679_v42 = vmul.f32 %v3535_v21, %v3218_v51  ;;  %3898 = vmatpush1.bf16.msra.mxu1 %v3815_v63  ;;  %v3647_v21 = vld [vmem:[%s9471_s18 + $0x440] sm:$0xff]  ;;  %v3792_v16 = vmul.f32 %v3648_v12, %v3506_v18  ;;  %v3800_v51 = vpack.c.bf16 %v3664_v1, %v3656_v26  ;;  %v3655_v27 = vmul.f32 %v3511_v5, %v3168_v43 }
 0x76c   : > { %3899 = vmatprep.subr.bf16.mxu1 %v3808_v9  ;;  %v3784_v20 = vmul.f32 %v3640_v10, %v3505_v33  ;;  %v3791_v1 = vmul.f32 %v3647_v21, %v3508_v30  ;;  %v3635_v43 = vld [vmem:[%s9471_s18 + $0x3e0] sm:$0xff] }
 0x76d   : > { %v3807_v38 = vpack.c.bf16 %v3679_v42, %v3671_v23  ;;  %v3434_v28 = vpop.permute.xlu1 %3433  ;;  %v7576_v25 = vpop.permute.xlu0 %3151  ;;  %v3639_v23 = vld [vmem:[%s9471_s18 + $0x400] sm:$0xff]  ;;  %v9546_v42 = vld [vmem:[#allocation38_spill] sm:$0xff] }
 0x76e   : > { %v3169_v63 = vsel %vm3153_vm0, %v7576_v25, %v9539_v48  ;;  %v3507_v19 = vsel %vm3494_vm1, %v9546_v42, %v9544_v58  ;;  %v3448_v12 = vsel %vm3445_vm12, %v3434_v28, %v7325_v7  ;;  %v3636_v48 = vld [vmem:[%s9471_s18 + $0x3e8] sm:$0xff]  ;;  %v3864_v58 = vpack.c.bf16 %v3792_v16, %v3784_v20  ;;  %v9548_v42 = vld [vmem:[#allocation28_spill] sm:$0xff] }
 0x76f   : > { %v3663_v9 = vmul.f32 %v3519_v36, %v3169_v63  ;;  %3900 = vmatpush1.bf16.msra.mxu1 %v3807_v38  ;;  %v3783_v33 = vmul.f32 %v3639_v23, %v3507_v19  ;;  %v3627_v38 = vld [vmem:[%s9471_s18 + $0x3a0] sm:$0xff]  ;;  %v9547_v63 = vld [vmem:[#allocation59_spill] sm:$0xff]  ;;  %v3772_v30 = vmul.f32 %v3628_v52, %v3448_v12  ;;  %v3638_v20 = vld [vmem:[%s9471_s18 + $0x3f8] sm:$0xff] }
 0x770   : > { %3901 = vmatprep.subr.bf16.mxu1 %v3800_v51  ;;  %v3450_v21 = vsel %vm3445_vm12, %v9547_v63, %v3434_v28  ;;  %v3629_v51 = vld [vmem:[%s9471_s18 + $0x3b0] sm:$0xff]  ;;  %v9550_v63 = vld [vmem:[#allocation60_spill] sm:$0xff] }
 0x771   : > { %v3799_v18 = vpack.c.bf16 %v3663_v9, %v3655_v27  ;;  %v3442_v26 = vpop.permute.xlu1 %3441  ;;  %v3436_v5 = vpop.permute.xlu0 %3435  ;;  %v3630_v9 = vld [vmem:[%s9471_s18 + $0x3b8] sm:$0xff]  ;;  %v3637_v19 = vld [vmem:[%s9471_s18 + $0x3f0] sm:$0xff]  ;;  %v3863_v28 = vpack.c.bf16 %v3791_v1, %v3783_v33 }
 0x772   : > { %v3449_v36 = vsel %vm3445_vm12, %v3436_v5, %v7354_v8  ;;  %v3451_v10 = vsel %vm3445_vm12, %v7254_v54, %v3436_v5  ;;  %v3446_v44 = vsel %vm3445_vm12, %v7325_v7, %v3442_v26  ;;  %v3460_v54 = vsel %vm3445_vm12, %v3442_v26, %v9548_v42  ;;  %v3580_v26 = vld [vmem:[%s9471_s18 + $0x228] sm:$0xff]  ;;  %v3590_v33 = vld [vmem:[%s9471_s18 + $0x278] sm:$0xff] }
 0x773   : > { %v3780_v27 = vmul.f32 %v3636_v48, %v3449_v36  ;;  %3902 = vmatpush1.bf16.msra.mxu1 %v3799_v18  ;;  %v3779_v16 = vmul.f32 %v3635_v43, %v3451_v10  ;;  %v3771_v48 = vmul.f32 %v3627_v38, %v3450_v21  ;;  %v9549_v18 = vld [vmem:[#allocation27_spill] sm:$0xff]  ;;  %v3773_v5 = vmul.f32 %v3629_v51, %v3446_v44  ;;  %v3611_v36 = vld [vmem:[%s9471_s18 + $0x320] sm:$0xff]  ;;  %v3612_v38 = vld [vmem:[%s9471_s18 + $0x328] sm:$0xff] }
 0x774   : > { %3917 = vmatprep.subr.bf16.mxu1 %v3864_v58  ;;  %v3774_v1 = vmul.f32 %v3630_v9, %v3460_v54  ;;  %v3588_v58 = vld [vmem:[%s9471_s18 + $0x268] sm:$0xff] }
 0x775   : > { %v3385_v23 = vpop.permute.xlu1 %3384  ;;  %v3444_v52 = vpop.permute.xlu0 %3443  ;;  %v3860_v12 = vpack.c.bf16 %v3780_v27, %v3772_v30  ;;  %v3619_v30 = vld [vmem:[%s9471_s18 + $0x360] sm:$0xff]  ;;  %v3620_v44 = vld [vmem:[%s9471_s18 + $0x368] sm:$0xff]  ;;  %v3859_v51 = vpack.c.bf16 %v3779_v16, %v3771_v48  ;;  %v7649_v16 = vmul.f32 %v3588_v58, %v7070_v6  ;;  %v3622_v58 = vld [vmem:[%s9471_s18 + $0x378] sm:$0xff] }
 0x776   : > { %v3447_v7 = vsel %vm3445_vm12, %v7354_v8, %v3444_v52  ;;  %v3461_v42 = vsel %vm3445_vm12, %v3444_v52, %v9549_v18  ;;  %v3399_v8 = vsel %vm3396_vm13, %v3385_v23, %v7352_v61  ;;  %v3401_v21 = vsel %vm3396_vm13, %v9550_v63, %v3385_v23  ;;  %v3582_v52 = vld [vmem:[%s9471_s18 + $0x238] sm:$0xff] }
 0x777   : > { %v3781_v43 = vmul.f32 %v3637_v19, %v3447_v7  ;;  %v3782_v10 = vmul.f32 %v3638_v20, %v3461_v42  ;;  %3918 = vmatpush2.bf16.msra.mxu1 %v3863_v28  ;;  %v9551_v20 = vld [vmem:[#allocation48_spill] sm:$0xff]  ;;  %v3755_v48 = vmul.f32 %v3611_v36, %v3401_v21  ;;  %v3756_v18 = vmul.f32 %v3612_v38, %v3399_v8  ;;  %v3613_v42 = vld [vmem:[%s9471_s18 + $0x330] sm:$0xff] }
 0x778   : > { %3969 = vmatprep.subr.bf16.mxu1 %v3860_v12  ;;  %v7638_v28 = vmul.f32 %v3580_v26, %v9551_v20  ;;  %v7652_v12 = vmul.f32 %v3590_v33, %v7068_v56  ;;  %v9553_v56 = vld [vmem:[#allocation47_spill] sm:$0xff]  ;;  %v3563_v33 = vld [vmem:[%s9471_s18 + $0x1a0] sm:$0xff] }
 0x779   : > { %v3861_v27 = vpack.c.bf16 %v3781_v43, %v3773_v5  ;;  %v3393_v9 = vpop.permute.xlu1 %3392  ;;  %v3387_v54 = vpop.permute.xlu0 %3386  ;;  %v3862_v19 = vpack.c.bf16 %v3782_v10, %v3774_v1  ;;  %v3614_v1 = vld [vmem:[%s9471_s18 + $0x338] sm:$0xff]  ;;  %v9552_v43 = vld [vmem:[#allocation26_spill] sm:$0xff]  ;;  %v3621_v10 = vld [vmem:[%s9471_s18 + $0x370] sm:$0xff]  ;;  %v7665_v36 = vmul.f32 %v3582_v52, %v9553_v56  ;;  %v3307_v52 = vsel %vm1351_vm3, %v7191_v14, %v7432_v45 }
 0x77a   : > { %v3400_v7 = vsel %vm3396_vm13, %v3387_v54, %v7382_v3  ;;  %v3402_v23 = vsel %vm3396_vm13, %v7279_v34, %v3387_v54  ;;  %3920 = vmatmul.mubr.bf16.vlgmr.msra.gmra.mxu1 %v7459_v22  ;;  %v3397_v34 = vsel %vm3396_vm13, %v7352_v61, %v3393_v9  ;;  %v3411_v6 = vsel %vm3396_vm13, %v3393_v9, %v9552_v43  ;;  %v3595_v54 = vld [vmem:[%s9471_s18 + $0x2a0] sm:$0xff] }
 0x77b   : > { %v3763_v26 = vmul.f32 %v3619_v30, %v3402_v23  ;;  %v3764_v5 = vmul.f32 %v3620_v44, %v3400_v7  ;;  %3970 = vmatpush1.bf16.msra.mxu1 %v3859_v51  ;;  %4010 = vmatprep.subr.bf16.mxu0 %v3862_v19  ;;  %v3306_v61 = vsel %vm1351_vm3, %v7185_v17, %v7405_v31  ;;  %v9554_v44 = vld [vmem:[#allocation29_spill] sm:$0xff]  ;;  %v3596_v7 = vld [vmem:[%s9471_s18 + $0x2a8] sm:$0xff] }
 0x77c   : > { %5510 = vmatprep.mubr.msk.bf16.mxu1 %vm2005_vm11, %v9525_v41  ;;  %4011 = vmatpush1.bf16.msra.mxu0 %v3861_v27  ;;  %v3836_v51 = vpack.c.bf16 %v7649_v16, %v7638_v28  ;;  %v3838_v17 = vpack.c.bf16 %v7652_v12, %v7665_v36  ;;  %v3757_v27 = vmul.f32 %v3613_v42, %v3397_v34  ;;  %v3603_v42 = vld [vmem:[%s9471_s18 + $0x2e0] sm:$0xff]  ;;  %v3550_v16 = vld [vmem:[%s9471_s18 + $0x138] sm:$0xff]  ;;  %v3557_v36 = vld [vmem:[%s9471_s18 + $0x170] sm:$0xff] }
 0x77d   : > { %v3851_v38 = vpack.c.bf16 %v3763_v26, %v3755_v48  ;;  %v3337_v8 = vpop.permute.xlu1 %3336  ;;  %v3395_v63 = vpop.permute.xlu0 %3394  ;;  %v3852_v21 = vpack.c.bf16 %v3764_v5, %v3756_v18  ;;  %v3758_v9 = vmul.f32 %v3614_v1, %v3411_v6  ;;  %v9555_v48 = vld [vmem:[#allocation61_spill] sm:$0xff]  ;;  %v3604_v26 = vld [vmem:[%s9471_s18 + $0x2e8] sm:$0xff]  ;;  %v3258_v14 = vsel %vm3251_vm14, %v7193_v2, %v7449_v59 }
 0x77e   : > { %v3398_v30 = vsel %vm3396_vm13, %v7382_v3, %v3395_v63  ;;  %v3412_v41 = vsel %vm3396_vm13, %v3395_v63, %v9554_v44  ;;  %v7685_v3 = vmul.f32 %v3563_v33, %v3306_v61  ;;  %v3350_v23 = vsel %vm1376_vm9, %v3337_v8, %v7380_v11  ;;  %v3571_v5 = vld [vmem:[%s9471_s18 + $0x1e0] sm:$0xff] }
 0x77f   : > { %v3765_v19 = vmul.f32 %v3621_v10, %v3398_v30  ;;  %v3766_v20 = vmul.f32 %v3622_v58, %v3412_v41  ;;  %3971 = vmatprep.subr.bf16.mxu1 %v3852_v21  ;;  %v3352_v18 = vsel %vm1376_vm9, %v9555_v48, %v3337_v8  ;;  %v3555_v1 = vld [vmem:[%s9471_s18 + $0x160] sm:$0xff]  ;;  %v3259_v34 = vsel %vm3251_vm14, %v7199_v29, %v7455_v60 }
 0x780   : > { %3972 = vmatpush1.bf16.msra.mxu1 %v3851_v38  ;;  %v3547_v56 = vld [vmem:[%s9471_s18 + $0x120] sm:$0xff]  ;;  %v3209_v33 = vsel %vm3202_vm15, %v7205_v24, %v7461_v47  ;;  %v3210_v2 = vsel %vm3202_vm15, %v7211_v62, %v7470_v49  ;;  %v3739_v63 = vmul.f32 %v3595_v54, %v3352_v18  ;;  %v3740_v21 = vmul.f32 %v3596_v7, %v3350_v23  ;;  %v3597_v24 = vld [vmem:[%s9471_s18 + $0x2b0] sm:$0xff] }
 0x781   : > { %v3853_v43 = vpack.c.bf16 %v3765_v19, %v3757_v27  ;;  %v3345_v6 = vpop.permute.xlu1 %3344  ;;  %v3339_v10 = vpop.permute.xlu0 %3338  ;;  %v3854_v58 = vpack.c.bf16 %v3766_v20, %v3758_v9  ;;  %v3539_v61 = vld [vmem:[%s9471_s18 + $0xe0] sm:$0xff]  ;;  %v7728_v41 = vmul.f32 %v3571_v5, %v3307_v52  ;;  %v7730_v62 = vmul.f32 %v3555_v1, %v3259_v34  ;;  %v3598_v27 = vld [vmem:[%s9471_s18 + $0x2b8] sm:$0xff]  ;;  %v3605_v54 = vld [vmem:[%s9471_s18 + $0x2f0] sm:$0xff] }
 0x782   : > { %v3351_v29 = vsel %vm1376_vm9, %v3339_v10, %v7407_v4  ;;  %v3353_v38 = vsel %vm1376_vm9, %v7309_v50, %v3339_v10  ;;  %v3531_v8 = vld [vmem:[%s9471_s18 + $0xa0] sm:$0xff]  ;;  %v3348_v9 = vsel %vm1376_vm9, %v7380_v11, %v3345_v6  ;;  %v3606_v20 = vld [vmem:[%s9471_s18 + $0x2f8] sm:$0xff]  ;;  %v7741_v7 = vmul.f32 %v3547_v56, %v3258_v14  ;;  %v9557_v14 = vld [vmem:[#allocation31_spill] sm:$0xff] }
 0x783   : > { %v3747_v30 = vmul.f32 %v3603_v42, %v3353_v38  ;;  %v3748_v44 = vmul.f32 %v3604_v26, %v3351_v29  ;;  %4012 = vmatprep.subr.bf16.mxu0 %v3854_v58  ;;  %v9556_v19 = vld [vmem:[#allocation25_spill] sm:$0xff]  ;;  %v7743_v23 = vmul.f32 %v3539_v61, %v3210_v2  ;;  %v7745_v26 = vmul.f32 %v3531_v8, %v3209_v33  ;;  %v3574_v33 = vld [vmem:[%s9471_s18 + $0x1f8] sm:$0xff]  ;;  %v3564_v61 = vld [vmem:[%s9471_s18 + $0x1a8] sm:$0xff] }
 0x784   : > { %v3362_v50 = vsel %vm1376_vm9, %v3345_v6, %v9556_v19  ;;  %4013 = vmatpush1.bf16.msra.mxu0 %v3853_v43  ;;  %v3160_v11 = vsel %vm3153_vm0, %v7213_v0, %v7472_v57  ;;  %v3515_v34 = vld [vmem:[%s9471_s18 + $0x20] sm:$0xff]  ;;  %v3741_v43 = vmul.f32 %v3597_v24, %v3348_v9  ;;  %v3827_v56 = vpack.c.bf16 %v7728_v41, %v7685_v3  ;;  %v3572_v29 = vld [vmem:[%s9471_s18 + $0x1e8] sm:$0xff]  ;;  %v3566_v38 = vld [vmem:[%s9471_s18 + $0x1b8] sm:$0xff] }
 0x785   : > { %v3843_v52 = vpack.c.bf16 %v3747_v30, %v3739_v63  ;;  %v3289_v48 = vpop.permute.xlu1 %3288  ;;  %v3347_v18 = vpop.permute.xlu0 %3346  ;;  %v3844_v42 = vpack.c.bf16 %v3748_v44, %v3740_v21  ;;  %v3742_v6 = vmul.f32 %v3598_v27, %v3362_v50  ;;  %v3819_v0 = vpack.c.bf16 %v7730_v62, %v7741_v7  ;;  %v3558_v44 = vld [vmem:[%s9471_s18 + $0x178] sm:$0xff]  ;;  %v3573_v27 = vld [vmem:[%s9471_s18 + $0x1f0] sm:$0xff]  ;;  %v9558_v19 = vld [vmem:[#allocation66_spill] sm:$0xff] }
 0x786   : > { %v3349_v5 = vsel %vm1376_vm9, %v7407_v4, %v3347_v18  ;;  %v3363_v1 = vsel %vm1376_vm9, %v3347_v18, %v9557_v14  ;;  %v3301_v4 = vsel %vm1351_vm3, %v7451_v39, %v7506_v46  ;;  %v3304_v2 = vsel %vm1351_vm3, %v7405_v31, %v3289_v48  ;;  %v9559_v50 = vld [vmem:[#allocation58_spill] sm:$0xff]  ;;  %v9561_v18 = vld [vmem:[#allocation49_spill] sm:$0xff] }
 0x787   : > { %v3749_v10 = vmul.f32 %v3605_v54, %v3349_v5  ;;  %v3750_v58 = vmul.f32 %v3606_v20, %v3363_v1  ;;  %3973 = vmatprep.subr.bf16.mxu1 %v3844_v42  ;;  %v3811_v3 = vpack.c.bf16 %v7743_v23, %v7745_v26  ;;  %v3300_v8 = vsel %vm1351_vm3, %v7430_v40, %v7484_v55  ;;  %v3548_v20 = vld [vmem:[%s9471_s18 + $0x128] sm:$0xff]  ;;  %v9563_v5 = vld [vmem:[#allocation57_spill] sm:$0xff] }
 0x788   : > { %3974 = vmatpush1.bf16.msra.mxu1 %v3843_v52  ;;  %v7782_v24 = vmul.f32 %v3515_v34, %v3160_v11  ;;  %v3252_v30 = vsel %vm3251_vm14, %v7453_v35, %v7504_v13  ;;  %v3253_v55 = vsel %vm3251_vm14, %v7463_v32, %v7530_v15  ;;  %v3708_v41 = vmul.f32 %v3564_v61, %v3304_v2  ;;  %v9560_v52 = vld [vmem:[#allocation50_spill] sm:$0xff]  ;;  %v3534_v11 = vld [vmem:[%s9471_s18 + $0xb8] sm:$0xff]  ;;  %v3565_v34 = vld [vmem:[%s9471_s18 + $0x1b0] sm:$0xff] }
 0x789   : > { %v3845_v63 = vpack.c.bf16 %v3749_v10, %v3741_v43  ;;  %v3240_v46 = vpop.permute.xlu1 %3239  ;;  %v3291_v21 = vpop.permute.xlu0 %3290  ;;  %3975 = vmatprep.subr.bf16.mxu1 %v3836_v51  ;;  %v3846_v31 = vpack.c.bf16 %v3750_v58, %v3742_v6  ;;  %v3718_v51 = vmul.f32 %v3574_v33, %v3301_v4  ;;  %v3161_v15 = vsel %vm3153_vm0, %v9559_v50, %v9558_v19  ;;  %v3542_v33 = vld [vmem:[%s9471_s18 + $0xf8] sm:$0xff]  ;;  %v9564_v4 = vld [vmem:[#allocation30_spill] sm:$0xff]  ;;  %v9574_v26 = vld [vmem:[#allocation69_spill] sm:$0xff] }
 0x78a   : > { %v3305_v28 = vsel %vm1351_vm3, %v7432_v45, %v3291_v21  ;;  %v3303_v13 = vsel %vm1351_vm3, %v3291_v21, %v7451_v39  ;;  %v3710_v54 = vmul.f32 %v3566_v38, %v3300_v8  ;;  %v3256_v45 = vsel %vm3251_vm14, %v7449_v59, %v3240_v46  ;;  %v3556_v39 = vld [vmem:[%s9471_s18 + $0x168] sm:$0xff]  ;;  %v9565_v61 = vld [vmem:[#allocation64_spill] sm:$0xff] }
 0x78b   : > { %v3716_v9 = vmul.f32 %v3572_v29, %v3305_v28  ;;  %4014 = vmatprep.subr.bf16.mxu0 %v3846_v31  ;;  %v9562_v42 = vpack.c.bf16 %v9560_v52, %v9561_v18  ;;  %v3203_v14 = vsel %vm3202_vm15, %v9563_v5, %v7528_v53  ;;  %v3702_v1 = vmul.f32 %v3558_v44, %v3253_v55  ;;  %v9567_v31 = vld [vmem:[#allocation51_spill] sm:$0xff]  ;;  %v3540_v44 = vld [vmem:[%s9471_s18 + $0xe8] sm:$0xff] }
 0x78c   : > { %4015 = vmatpush1.bf16.msra.mxu0 %v3845_v63  ;;  %v3302_v43 = vsel %vm1351_vm3, %v3289_v48, %v7430_v40  ;;  %v3694_v58 = vmul.f32 %v3550_v16, %v3252_v30  ;;  %v3204_v53 = vsel %vm3202_vm15, %v9565_v61, %v9564_v4  ;;  %v3717_v2 = vmul.f32 %v3573_v27, %v3303_v13  ;;  %v3532_v63 = vld [vmem:[%s9471_s18 + $0xa8] sm:$0xff]  ;;  %v3549_v28 = vld [vmem:[%s9471_s18 + $0x130] sm:$0xff] }
 0x78d   : > { %3976 = vmatpush1.bf16.msra.mxu1 %v9562_v42  ;;  %v3191_v59 = vpop.permute.xlu1 %3190  ;;  %4016 = vmatprep.subr.bf16.mxu0 %v3838_v17  ;;  %v3242_v6 = vpop.permute.xlu0 %3241  ;;  %v3828_v10 = vpack.c.bf16 %v3716_v9, %v3708_v41  ;;  %v3692_v12 = vmul.f32 %v3548_v20, %v3256_v45  ;;  %v3830_v29 = vpack.c.bf16 %v3718_v51, %v3710_v54  ;;  %v9569_v13 = vld [vmem:[#allocation35_spill] sm:$0xff]  ;;  %v9570_v9 = vld [vmem:[#allocation65_spill] sm:$0xff] }
 0x78e   : > { %v3257_v40 = vsel %vm3251_vm14, %v7455_v60, %v3242_v6  ;;  %v3255_v17 = vsel %vm3251_vm14, %v3242_v6, %v7463_v32  ;;  %v7837_v38 = vmul.f32 %v3534_v11, %v3203_v14  ;;  %v3709_v8 = vmul.f32 %v3565_v34, %v3302_v43  ;;  %v9566_v60 = vld [vmem:[#allocation52_spill] sm:$0xff]  ;;  %v3523_v32 = vld [vmem:[%s9471_s18 + $0x60] sm:$0xff]  ;;  %v3541_v42 = vld [vmem:[%s9471_s18 + $0xf0] sm:$0xff] }
 0x78f   : > { %v3700_v48 = vmul.f32 %v3556_v39, %v3257_v40  ;;  %3977 = vmatprep.subr.bf16.mxu1 %v3828_v10  ;;  %v3207_v21 = vsel %vm3202_vm15, %v7461_v47, %v3191_v59  ;;  %v9568_v30 = vpack.c.bf16 %v9566_v60, %v9567_v31  ;;  %v3686_v55 = vmul.f32 %v3542_v33, %v3204_v53  ;;  %v3516_v34 = vld [vmem:[%s9471_s18 + $0x28] sm:$0xff]  ;;  %v3533_v6 = vld [vmem:[%s9471_s18 + $0xb0] sm:$0xff] }
 0x790   : > { %v3254_v16 = vsel %vm3251_vm14, %v3240_v46, %v7453_v35  ;;  %v3822_v47 = vpack.c.bf16 %v3702_v1, %v3694_v58  ;;  %v3154_v50 = vsel %vm3153_vm0, %v9570_v9, %v9569_v13  ;;  %v3829_v54 = vpack.c.bf16 %v3717_v2, %v3709_v8  ;;  %v3526_v35 = vld [vmem:[%s9471_s18 + $0x78] sm:$0xff]  ;;  %v3525_v53 = vld [vmem:[%s9471_s18 + $0x70] sm:$0xff]  ;;  %v3652_v60 = vld [vmem:[%s9471_s18 + $0x468] sm:$0xff] }
 0x791   : > { %3978 = vmatpush1.bf16.msra.mxu1 %v3827_v56  ;;  %4017 = vmatpush1.bf16.msra.mxu0 %v9568_v30  ;;  %v3142_v51 = vpop.permute.xlu1 %3141  ;;  %v3193_v41 = vpop.permute.xlu0 %3192  ;;  %v3820_v27 = vpack.c.bf16 %v3700_v48, %v3692_v12  ;;  %v3518_v56 = vld [vmem:[%s9471_s18 + $0x38] sm:$0xff]  ;;  %v3701_v20 = vmul.f32 %v3557_v36, %v3255_v17  ;;  %v3676_v18 = vmul.f32 %v3532_v63, %v3207_v21  ;;  %v3643_v36 = vld [vmem:[%s9471_s18 + $0x420] sm:$0xff]  ;;  %v3644_v17 = vld [vmem:[%s9471_s18 + $0x428] sm:$0xff] }
 0x792   : > { %4018 = vmatprep.subr.bf16.mxu0 %v3830_v29  ;;  %v3208_v45 = vsel %vm3202_vm15, %v7470_v49, %v3193_v41  ;;  %v9571_v46 = vld [vmem:[#allocation68_spill] sm:$0xff]  ;;  %v3206_v39 = vsel %vm3202_vm15, %v3193_v41, %v9565_v61  ;;  %v3667_v14 = vmul.f32 %v3523_v32, %v3161_v15  ;;  %v3693_v1 = vmul.f32 %v3549_v28, %v3254_v16  ;;  %v3517_v61 = vld [vmem:[%s9471_s18 + $0x30] sm:$0xff]  ;;  %v9573_v29 = vld [vmem:[#allocation62_spill] sm:$0xff] }
 0x793   : > { %v3155_v52 = vsel %vm3153_vm0, %v9571_v46, %v7576_v25  ;;  %v3684_v11 = vmul.f32 %v3540_v44, %v3208_v45  ;;  %3979 = vmatprep.subr.bf16.mxu1 %v3820_v27  ;;  %v3158_v49 = vsel %vm3153_vm0, %v7472_v57, %v3142_v51  ;;  %v3524_v25 = vld [vmem:[%s9471_s18 + $0x68] sm:$0xff]  ;;  %v3662_v43 = vmul.f32 %v3518_v56, %v3154_v50  ;;  %v9572_v48 = vld [vmem:[#allocation67_spill] sm:$0xff]  ;;  %v3651_v21 = vld [vmem:[%s9471_s18 + $0x460] sm:$0xff] }
 0x794   : > { %v3205_v15 = vsel %vm3202_vm15, %v3191_v59, %v9563_v5  ;;  %v3814_v33 = vpack.c.bf16 %v3686_v55, %v7837_v38  ;;  %v3670_v62 = vmul.f32 %v3526_v35, %v3155_v52  ;;  %v3821_v7 = vpack.c.bf16 %v3701_v20, %v3693_v1  ;;  %v3645_v41 = vld [vmem:[%s9471_s18 + $0x430] sm:$0xff]  ;;  %v3646_v13 = vld [vmem:[%s9471_s18 + $0x438] sm:$0xff] }
 0x795   : > { %3980 = vmatpush1.bf16.msra.mxu1 %v3819_v0  ;;  %4019 = vmatpush1.bf16.msra.mxu0 %v3829_v54  ;;  %v3483_v10 = vpop.permute.xlu1 %3482  ;;  %v3144_v58 = vpop.permute.xlu0 %3143  ;;  %v3812_v57 = vpack.c.bf16 %v3684_v11, %v3676_v18  ;;  %v3685_v0 = vmul.f32 %v3541_v42, %v3206_v39  ;;  %v3156_v5 = vsel %vm3153_vm0, %v3142_v51, %v9570_v9  ;;  %v9576_v9 = vld [vmem:[#allocation38_spill] sm:$0xff]  ;;  %v3653_v54 = vld [vmem:[%s9471_s18 + $0x470] sm:$0xff]  ;;  %v3654_v20 = vld [vmem:[%s9471_s18 + $0x478] sm:$0xff] }
 0x796   : > { %4020 = vmatprep.subr.bf16.mxu0 %v3822_v47  ;;  %v3159_v4 = vsel %vm3153_vm0, %v9558_v19, %v3144_v58  ;;  %v3660_v59 = vmul.f32 %v3516_v34, %v3158_v49  ;;  %v3157_v2 = vsel %vm3153_vm0, %v3144_v58, %v9571_v46  ;;  %v3677_v12 = vmul.f32 %v3533_v6, %v3205_v15  ;;  %v9577_v39 = vld [vmem:[#allocation40_spill] sm:$0xff] }
 0x797   : > { %v3668_v40 = vmul.f32 %v3524_v25, %v3159_v4  ;;  %3981 = vmatprep.subr.bf16.mxu1 %v3812_v57  ;;  %v3497_v19 = vsel %vm3494_vm1, %v3483_v10, %v9572_v48  ;;  %v3499_v38 = vsel %vm3494_vm1, %v9573_v29, %v3483_v10  ;;  %v3803_v8 = vpack.c.bf16 %v3667_v14, %v7782_v24  ;;  %v9575_v24 = vld [vmem:[#allocation63_spill] sm:$0xff] }
 0x798   : > { %v3661_v30 = vmul.f32 %v3517_v61, %v3156_v5  ;;  %v3813_v44 = vpack.c.bf16 %v3685_v0, %v3677_v12  ;;  %v3669_v32 = vmul.f32 %v3525_v53, %v3157_v2  ;;  %v3806_v28 = vpack.c.bf16 %v3670_v62, %v3662_v43 }
 0x799   : > { %3982 = vmatpush1.bf16.msra.mxu1 %v3811_v3  ;;  %4021 = vmatpush1.bf16.msra.mxu0 %v3821_v7  ;;  %v3491_v63 = vpop.permute.xlu1 %3490  ;;  %v3804_v31 = vpack.c.bf16 %v3668_v40, %v3660_v59  ;;  %v3787_v16 = vmul.f32 %v3643_v36, %v3499_v38  ;;  %v3788_v23 = vmul.f32 %v3644_v17, %v3497_v19  ;;  %v9578_v43 = vmov 0  }
 0x79a   : > { %4022 = vmatprep.subr.bf16.mxu0 %v3814_v33  ;;  %v3485_v55 = vpop.permute.xlu0 %3484  ;;  %v3495_v27 = vsel %vm3494_vm1, %v9572_v48, %v3491_v63  ;;  %v3509_v50 = vsel %vm3494_vm1, %v3491_v63, %v9576_v9  ;;  %v3805_v45 = vpack.c.bf16 %v3669_v32, %v3661_v30 }
 0x79b   : > { %v3498_v3 = vsel %vm3494_vm1, %v3485_v55, %v9574_v26  ;;  %v3500_v51 = vsel %vm3494_vm1, %v9575_v24, %v3485_v55  ;;  %3983 = vmatprep.subr.bf16.mxu1 %v3804_v31  ;;  %v3789_v18 = vmul.f32 %v3645_v41, %v3495_v27  ;;  %v3790_v14 = vmul.f32 %v3646_v13, %v3509_v50 }
 0x79c   : > { %v3795_v47 = vmul.f32 %v3651_v21, %v3500_v51  ;;  %v3796_v56 = vmul.f32 %v3652_v60, %v3498_v3 }
 0x79d   : > { %3984 = vmatpush1.bf16.msra.mxu1 %v3803_v8  ;;  %4023 = vmatpush1.bf16.msra.mxu0 %v3813_v44 }
 0x79e   : > { %4024 = vmatprep.subr.bf16.mxu0 %v3806_v28  ;;  %v3867_v35 = vpack.c.bf16 %v3795_v47, %v3787_v16  ;;  %v3493_v46 = vpop.permute.xlu0 %3492  ;;  %v3868_v52 = vpack.c.bf16 %v3796_v56, %v3788_v23 }
 0x79f   : > { %v3496_v42 = vsel %vm3494_vm1, %v9574_v26, %v3493_v46  ;;  %v3510_v11 = vsel %vm3494_vm1, %v3493_v46, %v9577_v39 }
 0x7a0   : > { %v3797_v1 = vmul.f32 %v3653_v54, %v3496_v42  ;;  %v3798_v34 = vmul.f32 %v3654_v20, %v3510_v11  ;;  %3999 = vmatprep.subr.bf16.mxu1 %v3868_v52 }
 0x7a1   : > { %4025 = vmatpush1.bf16.msra.mxu0 %v3805_v45  ;;  %4000 = vmatpush2.bf16.msra.mxu1 %v3867_v35 }
 0x7a2   : > { %v3869_v49 = vpack.c.bf16 %v3797_v1, %v3789_v18  ;;  %v3870_v25 = vpack.c.bf16 %v3798_v34, %v3790_v14  ;;  %v4671_v14 = vld [vmem:[%s9579_s3] sm:$0xff]  ;;  %s9582_s3 = sld [smem:[#allocation18_spill]] }
 0x7a3   : > { %v4464_v1 = vld [vmem:[%s9580_s2] sm:$0xff] }
 0x7a4   : > { %4002 = vmatmul.mubr.bf16.vlgmr.msra.gmra.mxu1 %v7459_v22  ;;  %4040 = vmatprep.subr.bf16.mxu0 %v3870_v25  ;;  %v4685_v25 = vld [vmem:[%s5993_s8] sm:$0xff] }
 0x7a5   : > { %4041 = vmatpush2.bf16.msra.mxu0 %v3869_v49  ;;  %4531 = vmatprep.mubr.bf16.mxu1 %v9578_v43 }
 0x7a6   : > { %v7933_v57 = vpop.permute.xlu1 %3875 }
 0x7a8   : > { %4043 = vmatmul.mubr.bf16.vlgmr.msra.gmra.mxu0 %v7459_v22 }
 0x7a9   : > { %4572 = vmatprep.mubr.bf16.mxu0 %v9578_v43 }
 0x7aa   : > { %v7940_v5 = vpop.permute.xlu1 %4068 }
 0x7ab   : > { %v7936_v7 = vpop.permute.xlu0 %4054 }
 0x80b   : > { %v3962_v6 = vpop.f32.mrf.mxu0 }
 0x80c   : > { %v3963_v17 = vadd.f32 %v3962_v6, %v7933_v57 }
 0x80d   : > { %v3964_v15 = vpop.f32.mrf.mxu0 }
 0x80e   : > { %v4059_v48 = vmul.f32 %v7936_v7, %v3963_v17  ;;  %v3965_v38 = vadd.f32 %v3964_v15, %v7933_v57 }
 0x80f   : > { %v3966_v10 = vpop.f32.mrf.mxu0 }
 0x810   : > { %v4073_v19 = vadd.f32 %v7940_v5, %v4059_v48  ;;  %v4060_v8 = vmul.f32 %v7936_v7, %v3965_v38  ;;  %v4343_v10 = vld [vmem:[%s9581_s5 + $0x200] sm:$0xff] }
 0x811   : > { %v3967_v58 = vpop.f32.mrf.mxu0 }
 0x812   : > { %v7976_v29 = vmax.f32 %v4073_v19, 0.0  ;;  %v4074_v21 = vadd.f32 %v7940_v5, %v4060_v8  ;;  %v4328_v19 = vld [vmem:[%s9581_s5 + $0x188] sm:$0xff] }
 0x813   : > { %v4336_v8 = vld [vmem:[%s9581_s5 + $0x1c8] sm:$0xff] }
 0x814   : > { %v7997_v44 = vmax.f32 %v4074_v21, 0.0 }
 0x83a   : > { %v3921_v33 = vpop.f32.mrf.mxu1 }
 0x83b   : > { %v3922_v62 = vadd.f32 %v3921_v33, %v7933_v57 }
 0x83c   : > { %v3923_v0 = vpop.f32.mrf.mxu1 }
 0x83d   : > { %v4057_v4 = vmul.f32 %v7936_v7, %v3922_v62  ;;  %v3924_v61 = vadd.f32 %v3923_v0, %v7933_v57 }
 0x83e   : > { %v3925_v22 = vpop.f32.mrf.mxu1 }
 0x83f   : > { %v4071_v59 = vadd.f32 %v7940_v5, %v4057_v4  ;;  %v4058_v40 = vmul.f32 %v7936_v7, %v3924_v61 }
 0x840   : > { %v3926_v53 = vpop.f32.mrf.mxu1 }
 0x841   : > { %v7943_v2 = vmax.f32 %v4071_v59, 0.0  ;;  %v4072_v12 = vadd.f32 %v7940_v5, %v4058_v40 }
 0x843   : > { %4207 = vrot.lane.b32.xlu1 %v7943_v2, %s9514_s15  ;;  %4255 = vrot.lane.b32.xlu0 %v7943_v2, %s9477_s0  ;;  %v7955_v36 = vmax.f32 %v4072_v12, 0.0  ;;  %v4335_v12 = vld [vmem:[%s9581_s5 + $0x1c0] sm:$0xff] }
 0x847   : > { %4183 = vrot.lane.b32.xlu1 %v7943_v2, %s9472_s1  ;;  %4231 = vrot.lane.b32.xlu0 %v7943_v2, %s9474_s7 }
 0x84b   : > { %4257 = vrot.lane.b32.xlu1 %v7955_v36, %s9477_s0  ;;  %4135 = vrot.lane.b32.xlu0 %v7943_v2, %s9513_s10 }
 0x84f   : > { %4209 = vrot.lane.b32.xlu1 %v7955_v36, %s9514_s15  ;;  %4159 = vrot.lane.b32.xlu0 %v7943_v2, %s9475_s11 }
 0x853   : > { %4233 = vrot.lane.b32.xlu1 %v7955_v36, %s9474_s7  ;;  %4087 = vrot.lane.b32.xlu0 %v7943_v2, %s9476_s26 }
 0x857   : > { %4185 = vrot.lane.b32.xlu1 %v7955_v36, %s9472_s1  ;;  %4111 = vrot.lane.b32.xlu0 %v7943_v2, %s9473_s23 }
 0x85b   : > { %4137 = vrot.lane.b32.xlu1 %v7955_v36, %s9513_s10  ;;  %4259 = vrot.lane.b32.xlu0 %v7976_v29, %s9477_s0 }
 0x85f   : > { %4161 = vrot.lane.b32.xlu1 %v7955_v36, %s9475_s11  ;;  %4211 = vrot.lane.b32.xlu0 %v7976_v29, %s9514_s15 }
 0x863   : > { %4089 = vrot.lane.b32.xlu1 %v7955_v36, %s9476_s26  ;;  %4235 = vrot.lane.b32.xlu0 %v7976_v29, %s9474_s7 }
 0x864   : > { %v4003_v63 = vpop.f32.mrf.mxu1 }
 0x865   : > { %v4004_v16 = vadd.f32 %v4003_v63, %v7933_v57  ;;  %v4327_v63 = vld [vmem:[%s9581_s5 + $0x180] sm:$0xff] }
 0x866   : > { %v4005_v60 = vpop.f32.mrf.mxu1 }
 0x867   : > { %4113 = vrot.lane.b32.xlu1 %v7955_v36, %s9473_s23  ;;  %4187 = vrot.lane.b32.xlu0 %v7976_v29, %s9472_s1  ;;  %v4061_v26 = vmul.f32 %v7936_v7, %v4004_v16  ;;  %v4006_v51 = vadd.f32 %v4005_v60, %v7933_v57 }
 0x868   : > { %v4044_v31 = vpop.f32.mrf.mxu0  ;;  %v4007_v30 = vpop.f32.mrf.mxu1 }
 0x869   : > { %v4075_v3 = vadd.f32 %v7940_v5, %v4061_v26  ;;  %v4045_v41 = vadd.f32 %v4044_v31, %v7933_v57  ;;  %v4062_v27 = vmul.f32 %v7936_v7, %v4006_v51 }
 0x86a   : > { %v4046_v32 = vpop.f32.mrf.mxu0  ;;  %v4008_v55 = vpop.f32.mrf.mxu1 }
 0x86b   : > { %4141 = vrot.lane.b32.xlu1 %v7997_v44, %s9513_s10  ;;  %4139 = vrot.lane.b32.xlu0 %v7976_v29, %s9513_s10  ;;  %v8018_v24 = vmax.f32 %v4075_v3, 0.0  ;;  %v4063_v47 = vmul.f32 %v7936_v7, %v4045_v41  ;;  %v4076_v56 = vadd.f32 %v7940_v5, %v4062_v27  ;;  %v4047_v54 = vadd.f32 %v4046_v32, %v7933_v57  ;;  %v4319_v55 = vld [vmem:[%s9581_s5 + $0x140] sm:$0xff]  ;;  %v4304_v3 = vld [vmem:[%s9581_s5 + $0xc8] sm:$0xff] }
 0x86c   : > { %v4048_v28 = vpop.f32.mrf.mxu0  ;;  %v4320_v41 = vld [vmem:[%s9581_s5 + $0x148] sm:$0xff] }
 0x86d   : > { %v4077_v13 = vadd.f32 %v7940_v5, %v4063_v47  ;;  %v8042_v9 = vmax.f32 %v4076_v56, 0.0  ;;  %v4064_v20 = vmul.f32 %v7936_v7, %v4047_v54  ;;  %v4344_v7 = vld [vmem:[%s9581_s5 + $0x208] sm:$0xff]  ;;  %v4311_v47 = vld [vmem:[%s9581_s5 + $0x100] sm:$0xff] }
 0x86e   : > { %v4049_v23 = vpop.f32.mrf.mxu0  ;;  %v4312_v27 = vld [vmem:[%s9581_s5 + $0x108] sm:$0xff] }
 0x86f   : > { %4165 = vrot.lane.b32.xlu1 %v7997_v44, %s9475_s11  ;;  %4163 = vrot.lane.b32.xlu0 %v7976_v29, %s9475_s11  ;;  %v8044_v50 = vmax.f32 %v4077_v13, 0.0  ;;  %v4078_v45 = vadd.f32 %v7940_v5, %v4064_v20 }
 0x871   : > { %v8065_v35 = vmax.f32 %v4078_v45, 0.0 }
 0x873   : > { %4093 = vrot.lane.b32.xlu1 %v7997_v44, %s9476_s26  ;;  %4091 = vrot.lane.b32.xlu0 %v7976_v29, %s9476_s26 }
 0x877   : > { %4117 = vrot.lane.b32.xlu1 %v7997_v44, %s9473_s23  ;;  %4115 = vrot.lane.b32.xlu0 %v7976_v29, %s9473_s23 }
 0x87b   : > { %4263 = vrot.lane.b32.xlu1 %v8018_v24, %s9477_s0  ;;  %4261 = vrot.lane.b32.xlu0 %v7997_v44, %s9477_s0 }
 0x87f   : > { %4215 = vrot.lane.b32.xlu1 %v8018_v24, %s9514_s15  ;;  %4213 = vrot.lane.b32.xlu0 %v7997_v44, %s9514_s15 }
 0x883   : > { %4239 = vrot.lane.b32.xlu1 %v8018_v24, %s9474_s7  ;;  %4237 = vrot.lane.b32.xlu0 %v7997_v44, %s9474_s7 }
 0x887   : > { %4191 = vrot.lane.b32.xlu1 %v8018_v24, %s9472_s1  ;;  %4189 = vrot.lane.b32.xlu0 %v7997_v44, %s9472_s1 }
 0x88b   : > { %4267 = vrot.lane.b32.xlu1 %v8044_v50, %s9477_s0  ;;  %4265 = vrot.lane.b32.xlu0 %v8042_v9, %s9477_s0 }
 0x88f   : > { %4219 = vrot.lane.b32.xlu1 %v8044_v50, %s9514_s15  ;;  %4217 = vrot.lane.b32.xlu0 %v8042_v9, %s9514_s15 }
 0x893   : > { %4243 = vrot.lane.b32.xlu1 %v8044_v50, %s9474_s7  ;;  %4241 = vrot.lane.b32.xlu0 %v8042_v9, %s9474_s7 }
 0x897   : > { %4195 = vrot.lane.b32.xlu1 %v8044_v50, %s9472_s1  ;;  %4193 = vrot.lane.b32.xlu0 %v8042_v9, %s9472_s1 }
 0x89b   : > { %4173 = vrot.lane.b32.xlu1 %v8065_v35, %s9475_s11  ;;  %4149 = vrot.lane.b32.xlu0 %v8065_v35, %s9513_s10 }
 0x89f   : > { %4125 = vrot.lane.b32.xlu1 %v8065_v35, %s9473_s23  ;;  %4101 = vrot.lane.b32.xlu0 %v8065_v35, %s9476_s26 }
 0x8a3   : > { %4143 = vrot.lane.b32.xlu1 %v8018_v24, %s9513_s10  ;;  %4145 = vrot.lane.b32.xlu0 %v8042_v9, %s9513_s10 }
 0x8a7   : > { %4167 = vrot.lane.b32.xlu1 %v8018_v24, %s9475_s11  ;;  %4169 = vrot.lane.b32.xlu0 %v8042_v9, %s9475_s11 }
 0x8ab   : > { %4095 = vrot.lane.b32.xlu1 %v8018_v24, %s9476_s26  ;;  %4097 = vrot.lane.b32.xlu0 %v8042_v9, %s9476_s26 }
 0x8af   : > { %4119 = vrot.lane.b32.xlu1 %v8018_v24, %s9473_s23  ;;  %4269 = vrot.lane.b32.xlu0 %v8065_v35, %s9477_s0 }
 0x8b3   : > { %4221 = vrot.lane.b32.xlu1 %v8065_v35, %s9514_s15  ;;  %4245 = vrot.lane.b32.xlu0 %v8065_v35, %s9474_s7 }
 0x8b5   : > { %v8095_v46 = vpop.permute.xlu1 %4207  ;;  %v8097_v52 = vpop.permute.xlu0 %4255 }
 0x8b7   : > { %4197 = vrot.lane.b32.xlu1 %v8065_v35, %s9472_s1  ;;  %4121 = vrot.lane.b32.xlu0 %v8042_v9, %s9473_s23 }
 0x8b9   : > { %v8103_v18 = vpop.permute.xlu1 %4183  ;;  %v8105_v42 = vpop.permute.xlu0 %4231 }
 0x8bb   : > { %4171 = vrot.lane.b32.xlu1 %v8044_v50, %s9475_s11  ;;  %4147 = vrot.lane.b32.xlu0 %v8044_v50, %s9513_s10 }
 0x8bd   : > { %v4258_v39 = vpop.permute.xlu1 %4257  ;;  %v8111_v11 = vpop.permute.xlu0 %4135 }
 0x8be   : > { %v4277_v58 = vsel %vm3494_vm1, %v8097_v52, %v4258_v39 }
 0x8bf   : > { %4123 = vrot.lane.b32.xlu1 %v8044_v50, %s9473_s23  ;;  %4099 = vrot.lane.b32.xlu0 %v8044_v50, %s9476_s26  ;;  %v4415_v62 = vmul.f32 %v4343_v10, %v4277_v58  ;;  %v4383_v10 = vmul.f32 %v4311_v47, %v7943_v2  ;;  %v4338_v47 = vld [vmem:[%s9581_s5 + $0x1d8] sm:$0xff] }
 0x8c1   : > { %v4210_v34 = vpop.permute.xlu1 %4209  ;;  %v8119_v49 = vpop.permute.xlu0 %4159  ;;  %v4455_v5 = vpack.c.bf16 %v4415_v62, %v4415_v62 }
 0x8c2   : > { %v4229_v21 = vsel %vm3396_vm13, %v8095_v46, %v4210_v34 }
 0x8c3   : > { %4674 = vperm.xlu1 %5637, %v4671_v14   ;;  %4467 = vperm.xlu0 %5636, %v4464_v1   ;;  %v4476_v48 = vsel %vm4474_vm2, %v4455_v5, 0  ;;  %v4399_v26 = vmul.f32 %v4327_v63, %v4229_v21 }
 0x8c5   : > { %v4234_v6 = vpop.permute.xlu1 %4233  ;;  %v8122_v15 = vpop.permute.xlu0 %4087 }
 0x8c6   : > { %v4253_v17 = vsel %vm3445_vm12, %v8105_v42, %v4234_v6 }
 0x8c7   : > { %4688 = vperm.xlu0 %5636, %v4685_v25   ;;  %v4407_v30 = vmul.f32 %v4335_v12, %v4253_v17 }
 0x8c9   : > { %v4186_v57 = vpop.permute.xlu1 %4185  ;;  %v8128_v33 = vpop.permute.xlu0 %4111  ;;  %v4447_v20 = vpack.c.bf16 %v4407_v30, %v4399_v26  ;;  %v8217_v26 = vld [vmem:[%s9581_s5 + $0x190] sm:$0xff] }
 0x8ca   : > { %v4205_v28 = vsel %vm1376_vm9, %v8103_v18, %v4186_v57 }
 0x8cb   : > { %v4391_v45 = vmul.f32 %v4319_v55, %v4205_v28 }
 0x8cd   : > { %v8131_v0 = vpop.permute.xlu1 %4137  ;;  %v8133_v4 = vpop.permute.xlu0 %4259  ;;  %v4439_v5 = vpack.c.bf16 %v4391_v45, %v4383_v10  ;;  %v8247_v10 = vld [vmem:[%s9581_s5 + $0xd8] sm:$0xff] }
 0x8ce   : > { %v4276_v61 = vsel %vm3494_vm1, %v4258_v39, %v8133_v4  ;;  %v4296_v39 = vld [vmem:[%s9581_s5 + $0x88] sm:$0xff]  ;;  %v4157_v14 = vsel %vm3251_vm14, %v8111_v11, %v8131_v0 }
 0x8cf   : > { %v4416_v22 = vmul.f32 %v4344_v7, %v4276_v61  ;;  %v4368_v58 = vmul.f32 %v4296_v39, %v4157_v14  ;;  %v8241_v14 = vld [vmem:[%s9581_s5 + $0x110] sm:$0xff] }
 0x8d1   : > { %v4456_v59 = vpack.c.bf16 %v4416_v22, %v4416_v22  ;;  %v8138_v53 = vpop.permute.xlu1 %4161  ;;  %v8140_v40 = vpop.permute.xlu0 %4211 }
 0x8d2   : > { %v4228_v38 = vsel %vm3396_vm13, %v4210_v34, %v8140_v40  ;;  %v4181_v51 = vsel %vm1351_vm3, %v8119_v49, %v8138_v53 }
 0x8d3   : > { %5512 = vmatprep.subr.msk.bf16.mxu1 %vm4474_vm2, %v4456_v59  ;;  %v4400_v16 = vmul.f32 %v4328_v19, %v4228_v38  ;;  %v4376_v34 = vmul.f32 %v4304_v3, %v4181_v51  ;;  %v4346_v19 = vld [vmem:[%s9581_s5 + $0x218] sm:$0xff] }
 0x8d4   : > { %4506 = vmatpush1.bf16.msra.mxu1 %v4476_v48  ;;  %v4345_v48 = vld [vmem:[%s9581_s5 + $0x210] sm:$0xff]  ;;  %v4330_v51 = vld [vmem:[%s9581_s5 + $0x198] sm:$0xff] }
 0x8d5   : > { %v8157_v60 = vpop.permute.xlu1 %4089  ;;  %v8159_v31 = vpop.permute.xlu0 %4235  ;;  %v4432_v22 = vpack.c.bf16 %v4376_v34, %v4368_v58 }
 0x8d6   : > { %v4252_v32 = vsel %vm3445_vm12, %v4234_v6, %v8159_v31  ;;  %v4384_v6 = vmul.f32 %v4312_v27, %v7955_v36  ;;  %v8229_v27 = vld [vmem:[%s9581_s5 + $0x1d0] sm:$0xff] }
 0x8d7   : > { %v4408_v23 = vmul.f32 %v4336_v8, %v4252_v32 }
 0x8d9   : > { %v8176_v56 = vpop.permute.xlu1 %4113  ;;  %v8178_v13 = vpop.permute.xlu0 %4187  ;;  %v4448_v54 = vpack.c.bf16 %v4408_v23, %v4400_v16 }
 0x8da   : > { %v4204_v1 = vsel %vm1376_vm9, %v4186_v57, %v8178_v13 }
 0x8db   : > { %v4392_v25 = vmul.f32 %v4320_v41, %v4204_v1  ;;  %4507 = vmatprep.subr.bf16.mxu1 %v4448_v54 }
 0x8dc   : > { %4508 = vmatpush1.bf16.msra.mxu1 %v4447_v20 }
 0x8dd   : > { %v8190_v62 = vpop.permute.xlu1 %4141  ;;  %v8192_v7 = vpop.permute.xlu0 %4139  ;;  %v4440_v61 = vpack.c.bf16 %v4392_v25, %v4384_v6  ;;  %v4314_v6 = vld [vmem:[%s9581_s5 + $0x118] sm:$0xff] }
 0x8df   : > { %4509 = vmatprep.subr.bf16.mxu1 %v4440_v61  ;;  %v8253_v61 = vld [vmem:[%s9581_s5 + $0x150] sm:$0xff] }
 0x8e0   : > { %4510 = vmatpush1.bf16.msra.mxu1 %v4439_v5 }
 0x8e1   : > { %v8194_v57 = vpop.permute.xlu1 %4165  ;;  %v4164_v59 = vpop.permute.xlu0 %4163  ;;  %4511 = vmatprep.subr.bf16.mxu1 %v4432_v22 }
 0x8e2   : > { %v4179_v58 = vsel %vm1351_vm3, %v4164_v59, %v8194_v57 }
 0x8e5   : > { %v8196_v36 = vpop.permute.xlu1 %4093  ;;  %v8198_v2 = vpop.permute.xlu0 %4091 }
 0x8e9   : > { %v8200_v12 = vpop.permute.xlu1 %4117  ;;  %v8202_v17 = vpop.permute.xlu0 %4115 }
 0x8ed   : > { %v8206_v38 = vpop.permute.xlu1 %4263  ;;  %v4262_v8 = vpop.permute.xlu0 %4261 }
 0x8ee   : > { %v4274_v63 = vsel %vm3494_vm1, %v4262_v8, %v8206_v38  ;;  %v4275_v21 = vsel %vm3494_vm1, %v8133_v4, %v4262_v8 }
 0x8ef   : > { %v4417_v30 = vmul.f32 %v4345_v48, %v4275_v21  ;;  %v4418_v32 = vmul.f32 %v4346_v19, %v4274_v63  ;;  %v4385_v48 = vmul.f32 %v8241_v14, %v7976_v29  ;;  %v8261_v63 = vld [vmem:[%s9581_s5 + $0x98] sm:$0xff]  ;;  %v4155_v21 = vsel %vm3251_vm14, %v8192_v7, %v8190_v62 }
 0x8f0   : > { %v4386_v29 = vmul.f32 %v4314_v6, %v7997_v44  ;;  %v4131_v44 = vsel %vm3202_vm15, %v8202_v17, %v8200_v12 }
 0x8f1   : > { %v4457_v55 = vpack.c.bf16 %v4417_v30, %v4417_v30  ;;  %v4458_v28 = vpack.c.bf16 %v4418_v32, %v4418_v32  ;;  %v8214_v16 = vpop.permute.xlu1 %4215  ;;  %v4214_v23 = vpop.permute.xlu0 %4213 }
 0x8f2   : > { %v4226_v4 = vsel %vm3396_vm13, %v4214_v23, %v8214_v16  ;;  %v4227_v41 = vsel %vm3396_vm13, %v8140_v40, %v4214_v23  ;;  %v4378_v23 = vmul.f32 %v8247_v10, %v4179_v58  ;;  %v8317_v58 = vld [vmem:[%s9581_s5 + $0x10] sm:$0xff] }
 0x8f3   : > { %5514 = vmatprep.subr.msk.bf16.mxu0 %vm4474_vm2, %v4458_v28  ;;  %v4482_v3 = vsel %vm4474_vm2, %v4457_v55, 0  ;;  %v4401_v40 = vmul.f32 %v8217_v26, %v4227_v41  ;;  %v4402_v1 = vmul.f32 %v4330_v51, %v4226_v4  ;;  %v8275_v55 = vld [vmem:[%s9581_s5 + $0xd0] sm:$0xff]  ;;  %v4180_v28 = vsel %vm1351_vm3, %v8138_v53, %v4164_v59  ;;  %v8283_v4 = vld [vmem:[%s9581_s5 + $0x58] sm:$0xff] }
 0x8f4   : > { %4547 = vmatpush1.bf16.msra.mxu0 %v4482_v3  ;;  %v4156_v53 = vsel %vm3251_vm14, %v8131_v0, %v8192_v7  ;;  %v4370_v59 = vmul.f32 %v8261_v63, %v4155_v21  ;;  %v4132_v0 = vsel %vm3202_vm15, %v8176_v56, %v8202_v17  ;;  %v4362_v7 = vmul.f32 %v8283_v4, %v4131_v44 }
 0x8f5   : > { %v8232_v54 = vpop.permute.xlu1 %4239  ;;  %v4238_v20 = vpop.permute.xlu0 %4237  ;;  %v4133_v44 = vsel %vm3202_vm15, %v8128_v33, %v8176_v56 }
 0x8f6   : > { %v4250_v45 = vsel %vm3445_vm12, %v4238_v20, %v8232_v54  ;;  %v4251_v39 = vsel %vm3445_vm12, %v8159_v31, %v4238_v20  ;;  %v4322_v31 = vld [vmem:[%s9581_s5 + $0x158] sm:$0xff] }
 0x8f7   : > { %v4409_v34 = vmul.f32 %v8229_v27, %v4251_v39  ;;  %v4410_v25 = vmul.f32 %v4338_v47, %v4250_v45  ;;  %v4377_v39 = vmul.f32 %v8275_v55, %v4180_v28  ;;  %v8333_v28 = vld [vmem:[%s9582_s3] sm:$0xf] }
 0x8f9   : > { %v4449_v5 = vpack.c.bf16 %v4409_v34, %v4401_v40  ;;  %v8256_v22 = vpop.permute.xlu1 %4191  ;;  %v4190_v19 = vpop.permute.xlu0 %4189  ;;  %v4450_v8 = vpack.c.bf16 %v4410_v25, %v4402_v1  ;;  %v8301_v40 = vld [vmem:[%s9581_s5 + $0x18] sm:$0xff]  ;;  %v4107_v1 = vsel %vm3153_vm0, %v8198_v2, %v8196_v36  ;;  %v8308_v34 = vld [vmem:[%s9581_s5 + $0x50] sm:$0xff]  ;;  %v4434_v25 = vpack.c.bf16 %v4378_v23, %v4370_v59 }
 0x8fa   : > { %v4202_v30 = vsel %vm1376_vm9, %v4190_v19, %v8256_v22  ;;  %v4203_v32 = vsel %vm1376_vm9, %v8178_v13, %v4190_v19  ;;  %v8290_v13 = vld [vmem:[%s9581_s5 + $0x90] sm:$0xff]  ;;  %v4109_v59 = vsel %vm3153_vm0, %v8122_v15, %v8157_v60 }
 0x8fb   : > { %v4393_v3 = vmul.f32 %v8253_v61, %v4203_v32  ;;  %v4394_v51 = vmul.f32 %v4322_v31, %v4202_v30  ;;  %4548 = vmatprep.subr.bf16.mxu0 %v4450_v8  ;;  %v4369_v6 = vmul.f32 %v8290_v13, %v4156_v53  ;;  %v4108_v31 = vsel %vm3153_vm0, %v8157_v60, %v8198_v2  ;;  %v8345_v53 = vld [vmem:[%s9581_s5 + $0x8] sm:$0xff] }
 0x8fc   : > { %4549 = vmatpush1.bf16.msra.mxu0 %v4449_v5  ;;  %v4354_v5 = vmul.f32 %v8301_v40, %v4107_v1  ;;  %v4361_v8 = vmul.f32 %v8308_v34, %v4132_v0  ;;  %v4353_v30 = vmul.f32 %v8317_v58, %v4108_v31  ;;  %9583 = vst [vmem:[#allocation32_spill] sm:$0xff] %v8345_v53 }
 0x8fd   : > { %v4441_v41 = vpack.c.bf16 %v4393_v3, %v4385_v48  ;;  %v8297_v47 = vpop.permute.xlu1 %4267  ;;  %v4266_v20 = vpop.permute.xlu0 %4265  ;;  %v4442_v45 = vpack.c.bf16 %v4394_v51, %v4386_v29  ;;  %v4433_v19 = vpack.c.bf16 %v4377_v39, %v4369_v6  ;;  %v8338_v51 = vld [vmem:[%s9581_s5 + $0x48] sm:$0xff]  ;;  %v4352_v0 = vmul.f32 %v8345_v53, %v4109_v59 }
 0x8fe   : > { %v4426_v21 = vpack.c.bf16 %v4362_v7, %v4354_v5  ;;  %v4425_v29 = vpack.c.bf16 %v4361_v8, %v4353_v30  ;;  %v4360_v56 = vmul.f32 %v8338_v51, %v4133_v44  ;;  %v8378_v6 = vld [vmem:[%s9581_s5 + $0x228] sm:$0xff]  ;;  %v4272_v31 = vsel %vm3494_vm1, %v4266_v20, %v8297_v47  ;;  %v8389_v8 = vld [vmem:[%s9581_s5 + $0x40] sm:$0xff] }
 0x8ff   : > { %4550 = vmatprep.subr.bf16.mxu0 %v4442_v45  ;;  %v8357_v45 = vld [vmem:[%s9581_s5 + $0x80] sm:$0xff]  ;;  %9585 = vst [vmem:[#allocation37_spill] sm:$0xff] %v8378_v6  ;;  %v4273_v5 = vsel %vm3494_vm1, %v8206_v38, %v4266_v20  ;;  %v4420_v53 = vmul.f32 %v8378_v6, %v4272_v31 }
 0x900   : > { %4551 = vmatpush1.bf16.msra.mxu0 %v4441_v41  ;;  %v8354_v41 = vld [vmem:[%s9581_s5 + $0xc0] sm:$0xff]  ;;  %v4424_v44 = vpack.c.bf16 %v4360_v56, %v4352_v0 }
 0x901   : > { %v8324_v48 = vpop.permute.xlu1 %4219  ;;  %4552 = vmatprep.subr.bf16.mxu0 %v4434_v25  ;;  %v8326_v17 = vpop.permute.xlu0 %4217  ;;  %v8375_v25 = vld [vmem:[%s9581_s5 + $0x220] sm:$0xff] }
 0x902   : > { %9584 = vst [vmem:[#allocation33_spill] sm:$0xff] %v8375_v25  ;;  %v4419_v59 = vmul.f32 %v8375_v25, %v4273_v5  ;;  %v8426_v6 = vld [vmem:[%s9581_s5 + $0x1e0] sm:$0xff] }
 0x903   : > { %9588 = vst [vmem:[#allocation36_spill] sm:$0xff] %v8426_v6 }
 0x904   : > { %4553 = vmatpush1.bf16.msra.mxu0 %v4433_v19 }
 0x905   : > { %v8330_v32 = vpop.permute.xlu1 %4243  ;;  %4554 = vmatprep.subr.bf16.mxu0 %v4426_v21  ;;  %v4242_v2 = vpop.permute.xlu0 %4241 }
 0x906   : > { %v4248_v56 = vsel %vm3445_vm12, %v4242_v2, %v8330_v32 }
 0x908   : > { %4555 = vmatpush1.bf16.msra.mxu0 %v4425_v29 }
 0x909   : > { %v8335_v23 = vpop.permute.xlu1 %4195  ;;  %v4194_v3 = vpop.permute.xlu0 %4193 }
 0x90a   : > { %v4201_v25 = vsel %vm1376_vm9, %v8256_v22, %v4194_v3  ;;  %v8472_v22 = vld [vmem:[%s9581_s5 + $0x120] sm:$0xff] }
 0x90b   : > { %5515 = vmatmul.mubr.msk.bf16.vlgmr.msra.gmra.mxu0 %vm4470_vm4, %v8333_v28  ;;  %9593 = vst [vmem:[#allocation27_spill] sm:$0xff] %v8472_v22 }
 0x90c   : > { %4654 = vmatprep.mubr.bf16.mxu0 %v9578_v43 }
 0x90d   : > { %v8361_v39 = vpop.permute.xlu1 %4173  ;;  %v8363_v1 = vpop.permute.xlu0 %4149 }
 0x90e   : > { %v4182_v60 = vsel %vm1351_vm3, %v8361_v39, %v8119_v49  ;;  %v4158_v7 = vsel %vm3251_vm14, %v8363_v1, %v8111_v11  ;;  %v8392_v11 = vld [vmem:[%s9581_s5] sm:$0xff] }
 0x90f   : > { %v4375_v49 = vmul.f32 %v8354_v41, %v4182_v60  ;;  %v4367_v19 = vmul.f32 %v8357_v45, %v4158_v7  ;;  %v8409_v60 = vld [vmem:[%s9581_s5 + $0x1e8] sm:$0xff] }
 0x910   : > { %9586 = vst [vmem:[#allocation34_spill] sm:$0xff] %v8409_v60 }
 0x911   : > { %v4431_v21 = vpack.c.bf16 %v4375_v49, %v4367_v19  ;;  %v8394_v30 = vpop.permute.xlu1 %4125  ;;  %v8396_v29 = vpop.permute.xlu0 %4101  ;;  %v4459_v19 = vpack.c.bf16 %v4419_v59, %v4419_v59 }
 0x912   : > { %v4134_v38 = vsel %vm3202_vm15, %v8394_v30, %v8128_v33  ;;  %v4110_v20 = vsel %vm3153_vm0, %v8396_v29, %v8122_v15  ;;  %v8417_v33 = vld [vmem:[%s9581_s5 + $0x1a8] sm:$0xff]  ;;  %v4224_v15 = vsel %vm3396_vm13, %v8326_v17, %v8324_v48 }
 0x913   : > { %v4359_v0 = vmul.f32 %v8389_v8, %v4134_v38  ;;  %v4351_v7 = vmul.f32 %v8392_v11, %v4110_v20  ;;  %4512 = vmatpush1.bf16.msra.mxu1 %v4431_v21  ;;  %9587 = vst [vmem:[#allocation39_spill] sm:$0xff] %v8417_v33  ;;  %v4460_v38 = vpack.c.bf16 %v4420_v53, %v4420_v53  ;;  %v8433_v20 = vld [vmem:[%s9581_s5 + $0x168] sm:$0xff] }
 0x914   : > { %4513 = vmatprep.subr.bf16.mxu1 %v4424_v44  ;;  %v4249_v21 = vsel %vm3445_vm12, %v8232_v54, %v4242_v2  ;;  %v4412_v44 = vmul.f32 %v8409_v60, %v4248_v56  ;;  %9589 = vst [vmem:[#allocation42_spill] sm:$0xff] %v8433_v20  ;;  %v4225_v53 = vsel %vm3396_vm13, %v8214_v16, %v8326_v17  ;;  %v8451_v60 = vld [vmem:[%s9581_s5 + $0x128] sm:$0xff]  ;;  %v4488_v17 = vsel %vm4474_vm2, %v4459_v19, 0 }
 0x915   : > { %v4423_v31 = vpack.c.bf16 %v4359_v0, %v4351_v7  ;;  %v4144_v5 = vpop.permute.xlu1 %4143  ;;  %v8423_v49 = vpop.permute.xlu0 %4145  ;;  %v4200_v0 = vsel %vm1376_vm9, %v4194_v3, %v8335_v23  ;;  %v8439_v7 = vld [vmem:[%s9581_s5 + $0x1a0] sm:$0xff]  ;;  %v4404_v59 = vmul.f32 %v8417_v33, %v4224_v15  ;;  %v4411_v54 = vmul.f32 %v8426_v6, %v4249_v21  ;;  %v8465_v21 = vld [vmem:[%s9581_s5 + $0xe8] sm:$0xff] }
 0x916   : > { %9590 = vst [vmem:[#allocation41_spill] sm:$0xff] %v8439_v7  ;;  %v4396_v16 = vmul.f32 %v8433_v20, %v4200_v0  ;;  %9592 = vst [vmem:[#allocation28_spill] sm:$0xff] %v8465_v21  ;;  %v4388_v3 = vmul.f32 %v8451_v60, %v8042_v9  ;;  %v8478_v0 = vld [vmem:[%s9581_s5 + $0xa8] sm:$0xff] }
 0x917   : > { %4514 = vmatpush1.bf16.msra.mxu1 %v4423_v31  ;;  %v8454_v31 = vld [vmem:[%s9581_s5 + $0x160] sm:$0xff]  ;;  %v4452_v15 = vpack.c.bf16 %v4412_v44, %v4404_v59  ;;  %9594 = vst [vmem:[#allocation60_spill] sm:$0xff] %v8478_v0 }
 0x918   : > { %5516 = vmatprep.subr.msk.bf16.mxu1 %vm4474_vm2, %v4460_v38  ;;  %9591 = vst [vmem:[#allocation59_spill] sm:$0xff] %v8454_v31  ;;  %v4403_v38 = vmul.f32 %v8439_v7, %v4225_v53  ;;  %v4395_v44 = vmul.f32 %v8454_v31, %v4201_v25  ;;  %v4153_v53 = vsel %vm3251_vm14, %v4144_v5, %v8423_v49  ;;  %v8484_v59 = vld [vmem:[%s9581_s5 + $0xe0] sm:$0xff] }
 0x919   : > { %v4168_v2 = vpop.permute.xlu1 %4167  ;;  %v8448_v56 = vpop.permute.xlu0 %4169  ;;  %9595 = vst [vmem:[#allocation48_spill] sm:$0xff] %v8484_v59  ;;  %v4444_v25 = vpack.c.bf16 %v4396_v16, %v4388_v3  ;;  %v4154_v31 = vsel %vm3251_vm14, %v8190_v62, %v4144_v5  ;;  %v4372_v33 = vmul.f32 %v8478_v0, %v4153_v53 }
 0x91a   : > { %5513 = vmatmul.mubr.msk.bf16.vlgmr.msra.gmra.mxu1 %vm4470_vm4, %v8333_v28  ;;  %v4177_v6 = vsel %vm1351_vm3, %v4168_v2, %v8448_v56  ;;  %v4451_v19 = vpack.c.bf16 %v4411_v54, %v4403_v38  ;;  %v4387_v54 = vmul.f32 %v8472_v22, %v8018_v24  ;;  %v8495_v38 = vld [vmem:[%s9581_s5 + $0xa0] sm:$0xff] }
 0x91b   : > { %4588 = vmatpush1.bf16.msra.mxu1 %v4488_v17  ;;  %4613 = vmatprep.mubr.bf16.mxu1 %v9578_v43  ;;  %v4178_v17 = vsel %vm1351_vm3, %v8194_v57, %v4168_v2  ;;  %v4380_v9 = vmul.f32 %v8465_v21, %v4177_v6  ;;  %9596 = vst [vmem:[#allocation26_spill] sm:$0xff] %v8495_v38  ;;  %v8503_v2 = vld [vmem:[%s9581_s5 + $0x230] sm:$0xff]  ;;  %v8506_v6 = vld [vmem:[%s9581_s5 + $0x238] sm:$0xff] }
 0x91c   : > { %4589 = vmatprep.subr.bf16.mxu1 %v4452_v15  ;;  %v4379_v57 = vmul.f32 %v8484_v59, %v4178_v17  ;;  %v4443_v24 = vpack.c.bf16 %v4395_v44, %v4387_v54  ;;  %v4371_v21 = vmul.f32 %v8495_v38, %v4154_v31  ;;  %v8518_v44 = vld [vmem:[%s9581_s5 + $0x1b0] sm:$0xff]  ;;  %v8521_v31 = vld [vmem:[%s9581_s5 + $0x1b8] sm:$0xff]  ;;  %v8560_v38 = vld [vmem:[%s9581_s5 + $0x28] sm:$0xff] }
 0x91d   : > { %v4096_v15 = vpop.permute.xlu1 %4095  ;;  %v8489_v20 = vpop.permute.xlu0 %4097  ;;  %9597 = vst [vmem:[#allocation47_spill] sm:$0xff] %v8518_v44  ;;  %9602 = vst [vmem:[#allocation66_spill] sm:$0xff] %v8560_v38  ;;  %v8575_v59 = vld [vmem:[%s9581_s5 + $0x178] sm:$0xff] }
 0x91f   : > { %4590 = vmatpush1.bf16.msra.mxu1 %v4451_v19  ;;  %v4436_v19 = vpack.c.bf16 %v4380_v9, %v4372_v33  ;;  %v4106_v33 = vsel %vm3153_vm0, %v8196_v36, %v4096_v15 }
 0x920   : > { %4591 = vmatprep.subr.bf16.mxu1 %v4444_v25  ;;  %v4435_v25 = vpack.c.bf16 %v4379_v57, %v4371_v21 }
 0x921   : > { %v4120_v16 = vpop.permute.xlu1 %4119  ;;  %v4270_v3 = vpop.permute.xlu0 %4269 }
 0x922   : > { %v4271_v62 = vsel %vm3494_vm1, %v8297_v47, %v4270_v3  ;;  %v4278_v5 = vsel %vm3494_vm1, %v4270_v3, %v8097_v52  ;;  %v8524_v47 = vld [vmem:[%s9581_s5 + $0x1f0] sm:$0xff]  ;;  %v8527_v52 = vld [vmem:[%s9581_s5 + $0x1f8] sm:$0xff]  ;;  %v4130_v9 = vsel %vm3202_vm15, %v8200_v12, %v4120_v16 }
 0x923   : > { %v4421_v53 = vmul.f32 %v8503_v2, %v4271_v62  ;;  %v4422_v17 = vmul.f32 %v8506_v6, %v4278_v5  ;;  %4592 = vmatpush1.bf16.msra.mxu1 %v4443_v24  ;;  %9598 = vst [vmem:[#allocation29_spill] sm:$0xff] %v8524_v47  ;;  %v8536_v3 = vld [vmem:[%s9581_s5 + $0x130] sm:$0xff]  ;;  %v8539_v62 = vld [vmem:[%s9581_s5 + $0x60] sm:$0xff] }
 0x924   : > { %4593 = vmatprep.subr.bf16.mxu1 %v4436_v19  ;;  %9599 = vst [vmem:[#allocation61_spill] sm:$0xff] %v8536_v3  ;;  %9600 = vst [vmem:[#allocation25_spill] sm:$0xff] %v8539_v62 }
 0x925   : > { %v4461_v54 = vpack.c.bf16 %v4421_v53, %v4421_v53  ;;  %v4462_v21 = vpack.c.bf16 %v4422_v17, %v4422_v17  ;;  %v4222_v57 = vpop.permute.xlu1 %4221  ;;  %v4246_v24 = vpop.permute.xlu0 %4245  ;;  %v8554_v53 = vld [vmem:[%s9581_s5 + $0x138] sm:$0xff]  ;;  %v8557_v17 = vld [vmem:[%s9581_s5 + $0x20] sm:$0xff] }
 0x926   : > { %v4223_v5 = vsel %vm3396_vm13, %v8324_v48, %v4222_v57  ;;  %v4230_v36 = vsel %vm3396_vm13, %v4222_v57, %v8095_v46  ;;  %v4247_v12 = vsel %vm3445_vm12, %v8330_v32, %v4246_v24  ;;  %v4254_v19 = vsel %vm3445_vm12, %v4246_v24, %v8105_v42  ;;  %9601 = vst [vmem:[#allocation31_spill] sm:$0xff] %v8557_v17  ;;  %v8572_v24 = vld [vmem:[%s9581_s5 + $0x170] sm:$0xff] }
 0x927   : > { %v4405_v48 = vmul.f32 %v8518_v44, %v4223_v5  ;;  %v4406_v0 = vmul.f32 %v8521_v31, %v4230_v36  ;;  %v4413_v46 = vmul.f32 %v8524_v47, %v4247_v12  ;;  %v4414_v57 = vmul.f32 %v8527_v52, %v4254_v19  ;;  %4594 = vmatpush1.bf16.msra.mxu1 %v4435_v25  ;;  %v8580_v36 = vld [vmem:[%s9581_s5 + $0x68] sm:$0xff] }
 0x928   : > { %v4105_v32 = vsel %vm3153_vm0, %v4096_v15, %v8489_v20  ;;  %5518 = vmatprep.subr.msk.bf16.mxu0 %vm4474_vm2, %v4462_v21  ;;  %v4494_v42 = vsel %vm4474_vm2, %v4461_v54, 0  ;;  %9603 = vst [vmem:[#allocation58_spill] sm:$0xff] %v8572_v24  ;;  %v4389_v5 = vmul.f32 %v8536_v3, %v8044_v50  ;;  %9604 = vst [vmem:[#allocation50_spill] sm:$0xff] %v8580_v36  ;;  %v5681_v44 = vld [vmem:[%s9581_s5 + $0x1c8] sm:$0xff] }
 0x929   : > { %v4363_v12 = vmul.f32 %v8539_v62, %v4130_v9  ;;  %v4453_v25 = vpack.c.bf16 %v4413_v46, %v4405_v48  ;;  %4629 = vmatpush1.bf16.msra.mxu0 %v4494_v42  ;;  %v4198_v15 = vpop.permute.xlu1 %4197  ;;  %v4122_v21 = vpop.permute.xlu0 %4121  ;;  %v4454_v54 = vpack.c.bf16 %v4414_v57, %v4406_v0  ;;  %v4390_v19 = vmul.f32 %v8554_v53, %v8065_v35  ;;  %v8602_v42 = vld [vmem:[%s9581_s5 + $0xf8] sm:$0xff] }
 0x92a   : > { %v4355_v22 = vmul.f32 %v8557_v17, %v4106_v33  ;;  %v4199_v50 = vsel %vm1376_vm9, %v8335_v23, %v4198_v15  ;;  %v4206_v9 = vsel %vm1376_vm9, %v4198_v15, %v8103_v18  ;;  %v4129_v48 = vsel %vm3202_vm15, %v4120_v16, %v4122_v21  ;;  %v8599_v33 = vld [vmem:[%s9581_s5 + $0xf0] sm:$0xff]  ;;  %9606 = vst [vmem:[#allocation57_spill] sm:$0xff] %v8602_v42  ;;  %v8608_v17 = vld [vmem:[%s9581_s5 + $0xb8] sm:$0xff] }
 0x92b   : > { %v4356_v46 = vmul.f32 %v8560_v38, %v4105_v32  ;;  %v4397_v0 = vmul.f32 %v8572_v24, %v4199_v50  ;;  %v4398_v57 = vmul.f32 %v8575_v59, %v4206_v9  ;;  %v4364_v35 = vmul.f32 %v8580_v36, %v4129_v48  ;;  %4630 = vmatprep.subr.bf16.mxu0 %v4454_v54  ;;  %v8605_v23 = vld [vmem:[%s9581_s5 + $0xb0] sm:$0xff] }
 0x92c   : > { %9605 = vst [vmem:[#allocation49_spill] sm:$0xff] %v8599_v33  ;;  %9607 = vst [vmem:[#allocation30_spill] sm:$0xff] %v8605_v23  ;;  %v4427_v18 = vpack.c.bf16 %v4363_v12, %v4355_v22 }
 0x92d   : > { %9608 = vst [vmem:[#allocation64_spill] sm:$0xff] %v8608_v17  ;;  %v4445_v16 = vpack.c.bf16 %v4397_v0, %v4389_v5  ;;  %4631 = vmatpush1.bf16.msra.mxu0 %v4453_v25  ;;  %v4172_v32 = vpop.permute.xlu1 %4171  ;;  %v4148_v15 = vpop.permute.xlu0 %4147  ;;  %v4428_v50 = vpack.c.bf16 %v4364_v35, %v4356_v46  ;;  %v4446_v9 = vpack.c.bf16 %v4398_v57, %v4390_v19  ;;  %v8627_v46 = vld [vmem:[%s9581_s5 + $0x70] sm:$0xff]  ;;  %v8636_v0 = vld [vmem:[%s9581_s5 + $0x38] sm:$0xff] }
 0x92e   : > { %v4175_v54 = vsel %vm1351_vm3, %v4172_v32, %v8361_v39  ;;  %v4176_v48 = vsel %vm1351_vm3, %v8448_v56, %v4172_v32  ;;  %v4151_v22 = vsel %vm3251_vm14, %v4148_v15, %v8363_v1  ;;  %v4152_v5 = vsel %vm3251_vm14, %v8423_v49, %v4148_v15  ;;  %9609 = vst [vmem:[#allocation52_spill] sm:$0xff] %v8627_v46  ;;  %v8630_v56 = vld [vmem:[%s9581_s5 + $0x78] sm:$0xff]  ;;  %v8633_v1 = vld [vmem:[%s9581_s5 + $0x30] sm:$0xff] }
 0x92f   : > { %v4381_v12 = vmul.f32 %v8599_v33, %v4176_v48  ;;  %v4382_v25 = vmul.f32 %v8602_v42, %v4175_v54  ;;  %v4373_v19 = vmul.f32 %v8605_v23, %v4152_v5  ;;  %v4374_v39 = vmul.f32 %v8608_v17, %v4151_v22  ;;  %4595 = vmatprep.subr.bf16.mxu1 %v4428_v50 }
 0x930   : > { %4632 = vmatprep.subr.bf16.mxu0 %v4446_v9  ;;  %4596 = vmatpush1.bf16.msra.mxu1 %v4427_v18  ;;  %9610 = vst [vmem:[#allocation51_spill] sm:$0xff] %v8630_v56  ;;  %9611 = vst [vmem:[#allocation35_spill] sm:$0xff] %v8633_v1 }
 0x931   : > { %9612 = vst [vmem:[#allocation65_spill] sm:$0xff] %v8636_v0  ;;  %v4437_v49 = vpack.c.bf16 %v4381_v12, %v4373_v19  ;;  %4633 = vmatpush1.bf16.msra.mxu0 %v4445_v16  ;;  %v4124_v57 = vpop.permute.xlu1 %4123  ;;  %v4100_v35 = vpop.permute.xlu0 %4099  ;;  %v4438_v32 = vpack.c.bf16 %v4382_v25, %v4374_v39  ;;  %v9613_v25 = vld [vmem:[#allocation44_spill] sm:$0xff] }
 0x932   : > { %v4127_v15 = vsel %vm3202_vm15, %v4124_v57, %v8394_v30  ;;  %v4128_v50 = vsel %vm3202_vm15, %v4122_v21, %v4124_v57  ;;  %v4103_v18 = vsel %vm3153_vm0, %v4100_v35, %v8396_v29  ;;  %v4104_v9 = vsel %vm3153_vm0, %v8489_v20, %v4100_v35 }
 0x933   : > { %v4365_v16 = vmul.f32 %v8627_v46, %v4128_v50  ;;  %v4366_v54 = vmul.f32 %v8630_v56, %v4127_v15  ;;  %v4357_v48 = vmul.f32 %v8633_v1, %v4104_v9  ;;  %v4358_v22 = vmul.f32 %v8636_v0, %v4103_v18  ;;  %5517 = vmatmul.mubr.msk.bf16.vlgmr.msra.gmra.mxu1 %vm4470_vm4, %v8333_v28 }
 0x934   : > { %4634 = vmatprep.subr.bf16.mxu0 %v4438_v32  ;;  %5077 = vmatprep.mubr.bf16.mxu1 %v9578_v43  ;;  %v9614_v32 = vld [vmem:[#allocation45_spill] sm:$0xff] }
 0x935   : > { %v4429_v30 = vpack.c.bf16 %v4365_v16, %v4357_v48  ;;  %4635 = vmatpush1.bf16.msra.mxu0 %v4437_v49  ;;  %v4430_v29 = vpack.c.bf16 %v4366_v54, %v4358_v22 }
 0x937   : > { %4636 = vmatprep.subr.bf16.mxu0 %v4430_v29 }
 0x939   : > { %4637 = vmatpush1.bf16.msra.mxu0 %v4429_v30 }
 0x93c   : > { %5519 = vmatmul.mubr.msk.bf16.vlgmr.msra.gmra.mxu0 %vm4470_vm4, %v8333_v28 }
 0x93d   : > { %5118 = vmatprep.mubr.bf16.mxu0 %v9578_v43 }
 0x93e   : > { %v8659_v20 = vpop.permute.xlu0 %4467  ;;  %v8664_v57 = vpop.permute.xlu1 %4674 }
 0x942   : > { %v8668_v28 = vpop.permute.xlu0 %4688 }
 0x9cb   : > { %v4574_v21 = vpop.f32.mrf.mxu0 }
 0x9cc   : > { %v4575_v5 = vadd.f32 %v4574_v21, %v8659_v20 }
 0x9cd   : > { %v4576_v12 = vpop.f32.mrf.mxu0 }
 0x9ce   : > { %v4665_v19 = vadd.f32 %v4575_v5, %v9613_v25  ;;  %v4577_v39 = vadd.f32 %v4576_v12, %v8659_v20  ;;  %v9615_v12 = vld [vmem:[#allocation43_spill] sm:$0xff] }
 0x9cf   : > { %v4578_v49 = vpop.f32.mrf.mxu0 }
 0x9d0   : > { %v4679_v35 = vmul.f32 %v8664_v57, %v4665_v19  ;;  %v4666_v15 = vadd.f32 %v4577_v39, %v9614_v32 }
 0x9d1   : > { %v4579_v50 = vpop.f32.mrf.mxu0 }
 0x9d2   : > { %v4693_v18 = vadd.f32 %v8668_v28, %v4679_v35  ;;  %v4680_v9 = vmul.f32 %v8664_v57, %v4666_v15  ;;  %v9616_v35 = vld [vmem:[#allocation46_spill] sm:$0xff] }
 0x9d4   : > { %v8672_v16 = vmax.f32 %v4693_v18, 0.0  ;;  %v4694_v54 = vadd.f32 %v8668_v28, %v4680_v9 }
 0x9d6   : > { %v8675_v48 = vmax.f32 %v4694_v54, 0.0  ;;  %4879 = vrot.lane.b32.xlu1 %v8672_v16, %s9477_s0 }
 0x9d8   : > { %4881 = vrot.lane.b32.xlu0 %v8675_v48, %s9477_s0 }
 0x9da   : > { %4831 = vrot.lane.b32.xlu1 %v8672_v16, %s9514_s15  ;;  %v4533_v22 = vpop.f32.mrf.mxu1 }
 0x9db   : > { %v4534_v5 = vadd.f32 %v4533_v22, %v8659_v20 }
 0x9dc   : > { %4833 = vrot.lane.b32.xlu0 %v8675_v48, %s9514_s15  ;;  %v4535_v30 = vpop.f32.mrf.mxu1 }
 0x9dd   : > { %v4663_v25 = vadd.f32 %v4534_v5, %v9615_v12  ;;  %v4536_v39 = vadd.f32 %v4535_v30, %v8659_v20 }
 0x9de   : > { %4855 = vrot.lane.b32.xlu1 %v8672_v16, %s9474_s7  ;;  %v4537_v29 = vpop.f32.mrf.mxu1 }
 0x9df   : > { %v4677_v19 = vmul.f32 %v8664_v57, %v4663_v25  ;;  %v4664_v32 = vadd.f32 %v4536_v39, %v9616_v35  ;;  %v9617_v25 = vld [vmem:[#allocation54_spill] sm:$0xff] }
 0x9e0   : > { %4857 = vrot.lane.b32.xlu0 %v8675_v48, %s9474_s7  ;;  %v4538_v21 = vpop.f32.mrf.mxu1 }
 0x9e1   : > { %v4691_v49 = vadd.f32 %v8668_v28, %v4677_v19  ;;  %v4678_v9 = vmul.f32 %v8664_v57, %v4664_v32 }
 0x9e2   : > { %4807 = vrot.lane.b32.xlu1 %v8672_v16, %s9472_s1 }
 0x9e3   : > { %v8713_v50 = vmax.f32 %v4691_v49, 0.0  ;;  %v4692_v30 = vadd.f32 %v8668_v28, %v4678_v9 }
 0x9e4   : > { %4809 = vrot.lane.b32.xlu0 %v8675_v48, %s9472_s1 }
 0x9e5   : > { %v8728_v5 = vmax.f32 %v4692_v30, 0.0 }
 0x9e6   : > { %4759 = vrot.lane.b32.xlu1 %v8672_v16, %s9513_s10 }
 0x9e8   : > { %4761 = vrot.lane.b32.xlu0 %v8675_v48, %s9513_s10 }
 0x9ea   : > { %4783 = vrot.lane.b32.xlu1 %v8672_v16, %s9475_s11 }
 0x9ec   : > { %4785 = vrot.lane.b32.xlu0 %v8675_v48, %s9475_s11 }
 0x9ee   : > { %4711 = vrot.lane.b32.xlu1 %v8672_v16, %s9476_s26 }
 0x9f0   : > { %4713 = vrot.lane.b32.xlu0 %v8675_v48, %s9476_s26 }
 0x9f2   : > { %4735 = vrot.lane.b32.xlu1 %v8672_v16, %s9473_s23 }
 0x9f3   : > { %v4615_v15 = vpop.f32.mrf.mxu1 }
 0x9f4   : > { %4737 = vrot.lane.b32.xlu0 %v8675_v48, %s9473_s23 }
 0x9f5   : > { %v4617_v18 = vpop.f32.mrf.mxu1 }
 0x9f6   : > { %4875 = vrot.lane.b32.xlu1 %v8713_v50, %s9477_s0 }
 0x9f7   : > { %v4619_v54 = vpop.f32.mrf.mxu1 }
 0x9f8   : > { %4827 = vrot.lane.b32.xlu0 %v8713_v50, %s9514_s15 }
 0x9f9   : > { %v4620_v22 = vpop.f32.mrf.mxu1 }
 0x9fa   : > { %4851 = vrot.lane.b32.xlu1 %v8713_v50, %s9474_s7  ;;  %v9619_v22 = vld [vmem:[#allocation55_spill] sm:$0xff] }
 0x9fc   : > { %v4656_v29 = vpop.f32.mrf.mxu0  ;;  %4803 = vrot.lane.b32.xlu0 %v8713_v50, %s9472_s1 }
 0x9fd   : > { %v4657_v21 = vadd.f32 %v4656_v29, %v8659_v20 }
 0x9fe   : > { %v4658_v12 = vpop.f32.mrf.mxu0  ;;  %4755 = vrot.lane.b32.xlu1 %v8713_v50, %s9513_s10 }
 0x9ff   : > { %v4669_v19 = vadd.f32 %v4657_v21, %v9617_v25  ;;  %v4659_v9 = vadd.f32 %v4658_v12, %v8659_v20  ;;  %v4616_v12 = vadd.f32 %v4615_v15, %v8659_v20 }
 0xa00   : > { %4877 = vrot.lane.b32.xlu0 %v8728_v5, %s9477_s0  ;;  %v4660_v39 = vpop.f32.mrf.mxu0 }
 0xa01   : > { %v4683_v35 = vmul.f32 %v8664_v57, %v4669_v19  ;;  %v4670_v30 = vadd.f32 %v4659_v9, %v9619_v22  ;;  %v9620_v19 = vld [vmem:[#allocation53_spill] sm:$0xff]  ;;  %v9622_v9 = vld [vmem:[#allocation56_spill] sm:$0xff] }
 0xa02   : > { %4779 = vrot.lane.b32.xlu1 %v8713_v50, %s9475_s11  ;;  %v4661_v49 = vpop.f32.mrf.mxu0  ;;  %v4667_v39 = vadd.f32 %v4616_v12, %v9620_v19 }
 0xa03   : > { %v4697_v32 = vadd.f32 %v8668_v28, %v4683_v35  ;;  %v4684_v29 = vmul.f32 %v8664_v57, %v4670_v30 }
 0xa04   : > { %4829 = vrot.lane.b32.xlu0 %v8728_v5, %s9514_s15  ;;  %v4681_v49 = vmul.f32 %v8664_v57, %v4667_v39 }
 0xa05   : > { %v8748_v54 = vmax.f32 %v4697_v32, 0.0  ;;  %v4698_v21 = vadd.f32 %v8668_v28, %v4684_v29  ;;  %v4618_v32 = vadd.f32 %v4617_v18, %v8659_v20 }
 0xa06   : > { %4707 = vrot.lane.b32.xlu1 %v8713_v50, %s9476_s26  ;;  %v4695_v15 = vadd.f32 %v8668_v28, %v4681_v49 }
 0xa07   : > { %9618 = vst [vmem:[#allocation68_spill] sm:$0xff] %v8748_v54  ;;  %v8766_v25 = vmax.f32 %v4698_v21, 0.0  ;;  %v4668_v22 = vadd.f32 %v4618_v32, %v9622_v9 }
 0xa08   : > { %4853 = vrot.lane.b32.xlu0 %v8728_v5, %s9474_s7  ;;  %v8787_v35 = vmax.f32 %v4695_v15, 0.0  ;;  %v5012_v15 = vld [vmem:[%s6003_s12] sm:$0xff] }
 0xa09   : > { %v4682_v30 = vmul.f32 %v8664_v57, %v4668_v22 }
 0xa0a   : > { %4731 = vrot.lane.b32.xlu1 %v8713_v50, %s9473_s23  ;;  %9621 = vst [vmem:[#allocation67_spill] sm:$0xff] %v8787_v35 }
 0xa0b   : > { %v4696_v20 = vadd.f32 %v8668_v28, %v4682_v30 }
 0xa0c   : > { %4805 = vrot.lane.b32.xlu0 %v8728_v5, %s9472_s1 }
 0xa0d   : > { %v8815_v18 = vmax.f32 %v4696_v20, 0.0 }
 0xa0e   : > { %4839 = vrot.lane.b32.xlu1 %v8748_v54, %s9514_s15 }
 0xa0f   : > { %9623 = vst [vmem:[#allocation62_spill] sm:$0xff] %v8815_v18 }
 0xa10   : > { %4757 = vrot.lane.b32.xlu0 %v8728_v5, %s9513_s10 }
 0xa12   : > { %4815 = vrot.lane.b32.xlu1 %v8748_v54, %s9472_s1 }
 0xa14   : > { %4781 = vrot.lane.b32.xlu0 %v8728_v5, %s9475_s11 }
 0xa16   : > { %4767 = vrot.lane.b32.xlu1 %v8748_v54, %s9513_s10 }
 0xa18   : > { %4709 = vrot.lane.b32.xlu0 %v8728_v5, %s9476_s26 }
 0xa1a   : > { %4769 = vrot.lane.b32.xlu1 %v8766_v25, %s9513_s10 }
 0xa1c   : > { %4733 = vrot.lane.b32.xlu0 %v8728_v5, %s9473_s23 }
 0xa1e   : > { %4721 = vrot.lane.b32.xlu1 %v8766_v25, %s9476_s26 }
 0xa20   : > { %4887 = vrot.lane.b32.xlu0 %v8748_v54, %s9477_s0 }
 0xa22   : > { %4889 = vrot.lane.b32.xlu1 %v8766_v25, %s9477_s0 }
 0xa24   : > { %4863 = vrot.lane.b32.xlu0 %v8748_v54, %s9474_s7 }
 0xa26   : > { %4865 = vrot.lane.b32.xlu1 %v8766_v25, %s9474_s7 }
 0xa28   : > { %4791 = vrot.lane.b32.xlu0 %v8748_v54, %s9475_s11 }
 0xa2a   : > { %4883 = vrot.lane.b32.xlu1 %v8787_v35, %s9477_s0 }
 0xa2c   : > { %4793 = vrot.lane.b32.xlu0 %v8766_v25, %s9475_s11 }
 0xa2e   : > { %4835 = vrot.lane.b32.xlu1 %v8787_v35, %s9514_s15 }
 0xa30   : > { %4745 = vrot.lane.b32.xlu0 %v8766_v25, %s9473_s23 }
 0xa32   : > { %4859 = vrot.lane.b32.xlu1 %v8787_v35, %s9474_s7 }
 0xa34   : > { %4841 = vrot.lane.b32.xlu0 %v8766_v25, %s9514_s15 }
 0xa36   : > { %4811 = vrot.lane.b32.xlu1 %v8787_v35, %s9472_s1 }
 0xa38   : > { %4817 = vrot.lane.b32.xlu0 %v8766_v25, %s9472_s1 }
 0xa3a   : > { %4763 = vrot.lane.b32.xlu1 %v8787_v35, %s9513_s10 }
 0xa3c   : > { %4787 = vrot.lane.b32.xlu0 %v8787_v35, %s9475_s11 }
 0xa3e   : > { %4715 = vrot.lane.b32.xlu1 %v8787_v35, %s9476_s26 }
 0xa40   : > { %4837 = vrot.lane.b32.xlu0 %v8815_v18, %s9514_s15 }
 0xa42   : > { %4885 = vrot.lane.b32.xlu1 %v8815_v18, %s9477_s0 }
 0xa44   : > { %4739 = vrot.lane.b32.xlu0 %v8787_v35, %s9473_s23  ;;  %v5677_v35 = vld [vmem:[%s9581_s5 + $0x208] sm:$0xff] }
 0xa46   : > { %4861 = vrot.lane.b32.xlu1 %v8815_v18, %s9474_s7  ;;  %s5531_s7 = sshll.u32 %s9674_s28, 6 }
 0xa48   : > { %v8827_v57 = vpop.permute.xlu1 %4879  ;;  %4813 = vrot.lane.b32.xlu0 %v8815_v18, %s9472_s1 }
 0xa4a   : > { %v8831_v28 = vpop.permute.xlu0 %4881  ;;  %4719 = vrot.lane.b32.xlu1 %v8748_v54, %s9476_s26 }
 0xa4c   : > { %v4832_v29 = vpop.permute.xlu1 %4831  ;;  %4765 = vrot.lane.b32.xlu0 %v8815_v18, %s9513_s10 }
 0xa4e   : > { %v8837_v21 = vpop.permute.xlu0 %4833  ;;  %4789 = vrot.lane.b32.xlu1 %v8815_v18, %s9475_s11 }
 0xa4f   : > { %v4847_v19 = vsel %vm3396_vm13, %v4832_v29, %v8837_v21 }
 0xa50   : > { %v4856_v12 = vpop.permute.xlu1 %4855  ;;  %4717 = vrot.lane.b32.xlu0 %v8815_v18, %s9476_s26  ;;  %v8855_v32 = vmul.f32 %v4847_v19, %v8217_v26  ;;  %s9313_s26 = scalar_lea.vmem %s6008_s20, %s5531_s7 }
 0xa52   : > { %v8846_v39 = vpop.permute.xlu0 %4857  ;;  %4741 = vrot.lane.b32.xlu1 %v8815_v18, %s9473_s23 }
 0xa53   : > { %v4871_v49 = vsel %vm3445_vm12, %v4856_v12, %v8846_v39 }
 0xa54   : > { %v8858_v9 = vmul.f32 %v4871_v49, %v8229_v27  ;;  %v8860_v22 = vpop.permute.xlu1 %4807  ;;  %4743 = vrot.lane.b32.xlu0 %v8748_v54, %s9473_s23  ;;  %v8874_v27 = vmul.f32 %v8672_v16, %v8241_v14 }
 0xa56   : > { %v8866_v20 = vpop.permute.xlu0 %4809  ;;  %5015 = vperm.xlu1 %5637, %v5012_v15  }
 0xa57   : > { %v4823_v26 = vsel %vm1376_vm9, %v8860_v22, %v8866_v20 }
 0xa58   : > { %v8877_v19 = vmul.f32 %v4823_v26, %v8253_v61  ;;  %v8879_v49 = vpop.permute.xlu1 %4759 }
 0xa5a   : > { %v8883_v56 = vpop.permute.xlu0 %4761 }
 0xa5b   : > { %9624 = vst [vmem:[#allocation69_spill] sm:$0xff] %v8883_v56  ;;  %v4775_v46 = vsel %vm3251_vm14, %v8879_v49, %v8883_v56 }
 0xa5c   : > { %v8885_v15 = vpop.permute.xlu1 %4783  ;;  %v8898_v61 = vmul.f32 %v4775_v46, %v8261_v63 }
 0xa5e   : > { %v8891_v1 = vpop.permute.xlu0 %4785 }
 0xa5f   : > { %9625 = vst [vmem:[#allocation63_spill] sm:$0xff] %v8891_v1  ;;  %v4799_v14 = vsel %vm1351_vm3, %v8885_v15, %v8891_v1 }
 0xa60   : > { %v8901_v16 = vmul.f32 %v4799_v14, %v8247_v10  ;;  %v8903_v26 = vpop.permute.xlu1 %4711 }
 0xa62   : > { %v8905_v30 = vpop.permute.xlu0 %4713 }
 0xa63   : > { %9626 = vst [vmem:[#allocation38_spill] sm:$0xff] %v8905_v30  ;;  %v4727_v38 = vsel %vm3153_vm0, %v8903_v26, %v8905_v30 }
 0xa64   : > { %v8909_v36 = vpop.permute.xlu1 %4735  ;;  %v8922_v46 = vmul.f32 %v4727_v38, %v8301_v40  ;;  %v5676_v38 = vld [vmem:[%s9581_s5 + $0x200] sm:$0xff] }
 0xa66   : > { %v8915_v63 = vpop.permute.xlu0 %4737 }
 0xa67   : > { %9627 = vst [vmem:[#allocation40_spill] sm:$0xff] %v8915_v63  ;;  %v4751_v10 = vsel %vm3202_vm15, %v8909_v36, %v8915_v63 }
 0xa68   : > { %v8925_v14 = vmul.f32 %v4751_v10, %v8283_v4  ;;  %v8927_v0 = vpop.permute.xlu1 %4875 }
 0xa6a   : > { %v8929_v62 = vpop.permute.xlu0 %4827 }
 0xa6c   : > { %v8933_v33 = vpop.permute.xlu1 %4851 }
 0xa6e   : > { %v8935_v23 = vpop.permute.xlu0 %4803 }
 0xa70   : > { %v8937_v56 = vpop.permute.xlu1 %4755 }
 0xa72   : > { %v4878_v63 = vpop.permute.xlu0 %4877 }
 0xa73   : > { %v4896_v40 = vsel %vm3494_vm1, %v4878_v63, %v8827_v57  ;;  %v4897_v4 = vsel %vm3494_vm1, %v8927_v0, %v4878_v63 }
 0xa74   : > { %v4963_v10 = vmul.f32 %v5676_v38, %v4897_v4  ;;  %v4964_v30 = vmul.f32 %v5677_v35, %v4896_v40  ;;  %v8947_v54 = vpop.permute.xlu1 %4779  ;;  %v5678_v4 = vld [vmem:[%s9581_s5 + $0x180] sm:$0xff]  ;;  %v5679_v38 = vld [vmem:[%s9581_s5 + $0x188] sm:$0xff] }
 0xa76   : > { %v5003_v3 = vpack.c.bf16 %v4963_v10, %v4963_v10  ;;  %v5004_v1 = vpack.c.bf16 %v4964_v30, %v4964_v30  ;;  %v4830_v17 = vpop.permute.xlu0 %4829  ;;  %v5680_v10 = vld [vmem:[%s9581_s5 + $0x1c0] sm:$0xff] }
 0xa77   : > { %v4848_v63 = vsel %vm3396_vm13, %v4830_v17, %v4832_v29  ;;  %v4849_v35 = vsel %vm3396_vm13, %v8929_v62, %v4830_v17 }
 0xa78   : > { %5520 = vmatprep.subr.msk.bf16.mxu1 %vm4474_vm2, %v5004_v1  ;;  %v8950_v24 = vpop.permute.xlu1 %4707  ;;  %v5022_v42 = vsel %vm4474_vm2, %v5003_v3, 0  ;;  %v4947_v3 = vmul.f32 %v5678_v4, %v4849_v35  ;;  %v4948_v29 = vmul.f32 %v5679_v38, %v4848_v63  ;;  %v5682_v4 = vld [vmem:[%s9581_s5 + $0x100] sm:$0xff] }
 0xa79   : > { %5052 = vmatpush1.bf16.msra.mxu1 %v5022_v42  ;;  %v4931_v63 = vmul.f32 %v5682_v4, %v8713_v50 }
 0xa7a   : > { %v4854_v40 = vpop.permute.xlu0 %4853 }
 0xa7b   : > { %v4872_v30 = vsel %vm3445_vm12, %v4854_v40, %v4856_v12  ;;  %v4873_v1 = vsel %vm3445_vm12, %v8933_v33, %v4854_v40 }
 0xa7c   : > { %v4955_v7 = vmul.f32 %v5680_v10, %v4873_v1  ;;  %v4956_v17 = vmul.f32 %v5681_v44, %v4872_v30  ;;  %v8967_v42 = vpop.permute.xlu1 %4731  ;;  %v5683_v1 = vld [vmem:[%s9581_s5 + $0x140] sm:$0xff]  ;;  %v5684_v10 = vld [vmem:[%s9581_s5 + $0x148] sm:$0xff] }
 0xa7d   : > { %v5685_v30 = vld [vmem:[%s9581_s5 + $0x108] sm:$0xff] }
 0xa7e   : > { %v4995_v47 = vpack.c.bf16 %v4955_v7, %v4947_v3  ;;  %v4806_v12 = vpop.permute.xlu0 %4805  ;;  %v4996_v18 = vpack.c.bf16 %v4956_v17, %v4948_v29  ;;  %v4932_v3 = vmul.f32 %v5685_v30, %v8728_v5 }
 0xa7f   : > { %v4824_v40 = vsel %vm1376_vm9, %v4806_v12, %v8860_v22  ;;  %v4825_v35 = vsel %vm1376_vm9, %v8935_v23, %v4806_v12 }
 0xa80   : > { %v4939_v38 = vmul.f32 %v5683_v1, %v4825_v35  ;;  %v4940_v44 = vmul.f32 %v5684_v10, %v4824_v40  ;;  %5053 = vmatprep.subr.bf16.mxu1 %v4996_v18  ;;  %v8979_v7 = vpop.permute.xlu1 %4839  ;;  %v5686_v35 = vld [vmem:[%s9581_s5 + $0x88] sm:$0xff] }
 0xa81   : > { %5054 = vmatpush1.bf16.msra.mxu1 %v4995_v47 }
 0xa82   : > { %v4987_v22 = vpack.c.bf16 %v4939_v38, %v4931_v63  ;;  %v4758_v29 = vpop.permute.xlu0 %4757  ;;  %v4988_v17 = vpack.c.bf16 %v4940_v44, %v4932_v3 }
 0xa83   : > { %v4776_v50 = vsel %vm3251_vm14, %v4758_v29, %v8879_v49  ;;  %v4777_v18 = vsel %vm3251_vm14, %v8937_v56, %v4758_v29  ;;  %v5687_v49 = vld [vmem:[%s9581_s5 + $0xc8] sm:$0xff] }
 0xa84   : > { %5055 = vmatprep.subr.bf16.mxu1 %v4988_v17  ;;  %v8983_v12 = vpop.permute.xlu1 %4815  ;;  %v4916_v4 = vmul.f32 %v5686_v35, %v4777_v18  ;;  %v8999_v63 = vmul.f32 %v4776_v50, %v8290_v13 }
 0xa85   : > { %9628 = vst [vmem:[#allocation44_spill] sm:$0xff] %v8983_v12  ;;  %5056 = vmatpush1.bf16.msra.mxu1 %v4987_v22  ;;  %v9629_v12 = vld [vmem:[#allocation32_spill] sm:$0xff] }
 0xa86   : > { %v4782_v40 = vpop.permute.xlu0 %4781 }
 0xa87   : > { %v4800_v47 = vsel %vm1351_vm3, %v4782_v40, %v8885_v15  ;;  %v4801_v5 = vsel %vm1351_vm3, %v8947_v54, %v4782_v40 }
 0xa88   : > { %v4924_v1 = vmul.f32 %v5687_v49, %v4801_v5  ;;  %v9003_v38 = vmul.f32 %v4800_v47, %v8275_v55  ;;  %v9005_v10 = vpop.permute.xlu1 %4767 }
 0xa8a   : > { %v4710_v15 = vpop.permute.xlu0 %4709  ;;  %v4980_v30 = vpack.c.bf16 %v4924_v1, %v4916_v4 }
 0xa8b   : > { %v4728_v13 = vsel %vm3153_vm0, %v4710_v15, %v8903_v26 }
 0xa8c   : > { %v9009_v3 = vpop.permute.xlu1 %4769  ;;  %5057 = vmatprep.subr.bf16.mxu1 %v4980_v30  ;;  %v9018_v29 = vmul.f32 %v4728_v13, %v8317_v58  ;;  %v4895_v58 = vsel %vm3494_vm1, %v8827_v57, %v8831_v28  ;;  %v4729_v13 = vsel %vm3153_vm0, %v8950_v24, %v4710_v15 }
 0xa8d   : > { %v4778_v1 = vsel %vm3251_vm14, %v9009_v3, %v8937_v56  ;;  %v4900_v15 = vmul.f32 %v4729_v13, %v9629_v12 }
 0xa8e   : > { %v4734_v22 = vpop.permute.xlu0 %4733  ;;  %v4915_v18 = vmul.f32 %v4778_v1, %v8357_v45  ;;  %v5690_v1 = vld [vmem:[%s9581_s5 + $0x198] sm:$0xff] }
 0xa8f   : > { %v4752_v55 = vsel %vm3202_vm15, %v4734_v22, %v8909_v36  ;;  %v4753_v4 = vsel %vm3202_vm15, %v8967_v42, %v4734_v22 }
 0xa90   : > { %v9021_v17 = vmul.f32 %v4752_v55, %v8308_v34  ;;  %v9023_v50 = vpop.permute.xlu1 %4721  ;;  %v5688_v34 = vld [vmem:[%s9581_s5 + $0x210] sm:$0xff]  ;;  %v5689_v55 = vld [vmem:[%s9581_s5 + $0x218] sm:$0xff] }
 0xa91   : > { %v4965_v5 = vmul.f32 %v5688_v34, %v4895_v58  ;;  %v4908_v34 = vmul.f32 %v4753_v4, %v8338_v51 }
 0xa92   : > { %v9027_v40 = vpop.permute.xlu0 %4887 }
 0xa93   : > { %v5005_v30 = vpack.c.bf16 %v4965_v5, %v4965_v5 }
 0xa94   : > { %v9029_v26 = vpop.permute.xlu1 %4889 }
 0xa95   : > { %v5028_v45 = vsel %vm4474_vm2, %v5005_v30, 0 }
 0xa96   : > { %v9031_v47 = vpop.permute.xlu0 %4863 }
 0xa98   : > { %v9037_v36 = vpop.permute.xlu1 %4865 }
 0xa9a   : > { %v9040_v35 = vpop.permute.xlu0 %4791 }
 0xa9c   : > { %v9045_v49 = vpop.permute.xlu1 %4883 }
 0xa9d   : > { %v4894_v57 = vsel %vm3494_vm1, %v8831_v28, %v9045_v49 }
 0xa9e   : > { %v4966_v58 = vmul.f32 %v5689_v55, %v4894_v57  ;;  %v9059_v22 = vpop.permute.xlu0 %4793  ;;  %v4730_v57 = vsel %vm3153_vm0, %v9023_v50, %v8950_v24  ;;  %v4972_v24 = vpack.c.bf16 %v4908_v34, %v4900_v15 }
 0xa9f   : > { %v4802_v56 = vsel %vm1351_vm3, %v9059_v22, %v8947_v54  ;;  %v4899_v12 = vmul.f32 %v4730_v57, %v8392_v11  ;;  %v5692_v57 = vld [vmem:[%s9581_s5 + $0x158] sm:$0xff] }
 0xaa0   : > { %v5006_v44 = vpack.c.bf16 %v4966_v58, %v4966_v58  ;;  %v4923_v28 = vmul.f32 %v4802_v56, %v8354_v41  ;;  %v9068_v5 = vpop.permute.xlu1 %4835 }
 0xaa1   : > { %v4846_v41 = vsel %vm3396_vm13, %v8837_v21, %v9068_v5  ;;  %v4874_v21 = vsel %vm3445_vm12, %v9037_v36, %v8933_v33 }
 0xaa2   : > { %v4979_v51 = vpack.c.bf16 %v4923_v28, %v4915_v18  ;;  %v9075_v4 = vpop.permute.xlu0 %4745  ;;  %5522 = vmatprep.subr.msk.bf16.mxu0 %vm4474_vm2, %v5006_v44  ;;  %v4950_v11 = vmul.f32 %v5690_v1, %v4846_v41  ;;  %v9105_v33 = vmul.f32 %v4874_v21, %v8527_v52  ;;  %v9113_v28 = vld [vmem:[%s5998_s4] sm:$0xf]  ;;  %v5693_v52 = vld [vmem:[%s9581_s5 + $0x118] sm:$0xff]  ;;  %v9631_v21 = vpack.c.bf16 %v8877_v19, %v8874_v27 }
 0xaa3   : > { %v4754_v54 = vsel %vm3202_vm15, %v9075_v4, %v8967_v42  ;;  %5093 = vmatpush1.bf16.msra.mxu0 %v5028_v45  ;;  %v4934_v45 = vmul.f32 %v5693_v52, %v8675_v48 }
 0xaa4   : > { %v4907_v18 = vmul.f32 %v4754_v54, %v8389_v8  ;;  %v9089_v44 = vpop.permute.xlu1 %4859  ;;  %5058 = vmatpush1.bf16.msra.mxu1 %v4979_v51  ;;  %v5691_v8 = vld [vmem:[%s9581_s5 + $0x1d8] sm:$0xff]  ;;  %v4891_v54 = vsel %vm3494_vm1, %v9027_v40, %v9029_v26 }
 0xaa5   : > { %v4870_v42 = vsel %vm3445_vm12, %v8846_v39, %v9089_v44  ;;  %5059 = vmatprep.subr.bf16.mxu1 %v4972_v24 }
 0xaa6   : > { %v4971_v30 = vpack.c.bf16 %v4907_v18, %v4899_v12  ;;  %v4958_v13 = vmul.f32 %v5691_v8, %v4870_v42  ;;  %v4842_v55 = vpop.permute.xlu0 %4841 }
 0xaa7   : > { %v4850_v58 = vsel %vm3396_vm13, %v4842_v55, %v8929_v62 }
 0xaa8   : > { %v9108_v34 = vmul.f32 %v4850_v58, %v8521_v31  ;;  %v9110_v39 = vpop.permute.xlu1 %4811  ;;  %5060 = vmatpush1.bf16.msra.mxu1 %v4971_v30  ;;  %v4998_v56 = vpack.c.bf16 %v4958_v13, %v4950_v11  ;;  %v9633_v30 = vpack.c.bf16 %v9003_v38, %v8999_v63 }
 0xaa9   : > { %v4822_v15 = vsel %vm1376_vm9, %v8866_v20, %v9110_v39  ;;  %v9630_v20 = vpack.c.bf16 %v8858_v9, %v8855_v32  ;;  %v4969_v9 = vmul.f32 %v4891_v54, %v8503_v2  ;;  %v4867_v2 = vsel %vm3445_vm12, %v9031_v47, %v9037_v36  ;;  %v9637_v36 = vld [vmem:[#allocation37_spill] sm:$0xff] }
 0xaaa   : > { %v4942_v51 = vmul.f32 %v5692_v57, %v4822_v15  ;;  %v4818_v62 = vpop.permute.xlu0 %4817  ;;  %5094 = vmatprep.subr.bf16.mxu0 %v4998_v56  ;;  %v5002_v31 = vpack.c.bf16 %v9105_v33, %v9108_v34  ;;  %v4795_v56 = vsel %vm1351_vm3, %v9040_v35, %v9059_v22  ;;  %v9640_v15 = vld [vmem:[#allocation47_spill] sm:$0xff] }
 0xaab   : > { %v4826_v41 = vsel %vm1376_vm9, %v4818_v62, %v8935_v23  ;;  %5521 = vmatmul.mubr.msk.bf16.vlgmr.msra.gmra.mxu1 %vm4470_vm4, %v9113_v28  ;;  %5095 = vmatpush1.bf16.msra.mxu0 %v9630_v20  ;;  %v9143_v23 = vmul.f32 %v8766_v25, %v8554_v53  ;;  %v9632_v53 = vpack.c.bf16 %v8901_v16, %v8898_v61  ;;  %v9635_v16 = vld [vmem:[#allocation62_spill] sm:$0xff]  ;;  %v9643_v20 = vld [vmem:[#allocation39_spill] sm:$0xff] }
 0xaac   : > { %v9137_v48 = vmul.f32 %v4826_v41, %v8575_v59  ;;  %v9139_v24 = vpop.permute.xlu1 %4763  ;;  %v4990_v12 = vpack.c.bf16 %v4942_v51, %v4934_v45  ;;  %5159 = vmatprep.mubr.bf16.mxu1 %v9578_v43  ;;  %v4898_v59 = vsel %vm3494_vm1, %v9029_v26, %v8927_v0  ;;  %v5009_v11 = vpack.c.bf16 %v4969_v9, %v4969_v9  ;;  %v9641_v45 = vld [vmem:[#allocation44_spill] sm:$0xff]  ;;  %v9645_v9 = vld [vmem:[#allocation34_spill] sm:$0xff]  ;;  %v9655_v33 = vld [vmem:[#allocation67_spill] sm:$0xff] }
 0xaad   : > { %v4970_v42 = vmul.f32 %v4898_v59, %v8506_v6  ;;  %v9634_v0 = vpack.c.bf16 %v8925_v14, %v8922_v46  ;;  %v4843_v6 = vsel %vm3396_vm13, %v8979_v7, %v4842_v55  ;;  %v4936_v63 = vmul.f32 %v9635_v16, %v8451_v60  ;;  %v9636_v14 = vld [vmem:[#allocation33_spill] sm:$0xff] }
 0xaae   : > { %v9146_v18 = vpop.permute.xlu0 %4787  ;;  %5096 = vmatprep.subr.bf16.mxu0 %v4990_v12  ;;  %v4994_v32 = vpack.c.bf16 %v9137_v48, %v9143_v23  ;;  %v5040_v58 = vsel %vm4474_vm2, %v5009_v11, 0  ;;  %v4953_v57 = vmul.f32 %v4843_v6, %v9640_v15  ;;  %v9644_v12 = vld [vmem:[#allocation36_spill] sm:$0xff]  ;;  %v9647_v11 = vld [vmem:[#allocation58_spill] sm:$0xff] }
 0xaaf   : > { %5097 = vmatpush1.bf16.msra.mxu0 %v9631_v21  ;;  %v5010_v38 = vpack.c.bf16 %v4970_v42, %v4970_v42  ;;  %v9646_v42 = vld [vmem:[#allocation57_spill] sm:$0xff]  ;;  %v9660_v48 = vld [vmem:[#allocation30_spill] sm:$0xff] }
 0xab0   : > { %5098 = vmatprep.subr.bf16.mxu0 %v9632_v53  ;;  %v9161_v25 = vpop.permute.xlu1 %4715 }
 0xab2   : > { %v4838_v1 = vpop.permute.xlu0 %4837 }
 0xab3   : > { %5099 = vmatpush1.bf16.msra.mxu0 %v9633_v30  ;;  %v4845_v46 = vsel %vm3396_vm13, %v9068_v5, %v4838_v1  ;;  %v4844_v60 = vsel %vm3396_vm13, %v4838_v1, %v8979_v7  ;;  %v9639_v5 = vpack.c.bf16 %v9021_v17, %v9018_v29  ;;  %v4819_v7 = vsel %vm1376_vm9, %v9641_v45, %v4818_v62  ;;  %v9642_v29 = vld [vmem:[#allocation41_spill] sm:$0xff] }
 0xab4   : > { %5100 = vmatprep.subr.bf16.mxu0 %v9634_v0  ;;  %v4886_v27 = vpop.permute.xlu1 %4885  ;;  %v4951_v17 = vmul.f32 %v4845_v46, %v9642_v29  ;;  %v4952_v54 = vmul.f32 %v4844_v60, %v9643_v20  ;;  %v4945_v30 = vmul.f32 %v4819_v7, %v9647_v11  ;;  %v9648_v0 = vld [vmem:[#allocation42_spill] sm:$0xff]  ;;  %v9650_v46 = vld [vmem:[#allocation63_spill] sm:$0xff]  ;;  %v9659_v7 = vld [vmem:[#allocation60_spill] sm:$0xff] }
 0xab5   : > { %v4892_v19 = vsel %vm3494_vm1, %v4886_v27, %v9027_v40  ;;  %v4893_v61 = vsel %vm3494_vm1, %v9045_v49, %v4886_v27  ;;  %v4771_v40 = vsel %vm3251_vm14, %v9005_v10, %v9009_v3  ;;  %v9638_v49 = vld [vmem:[#allocation29_spill] sm:$0xff]  ;;  %v9654_v60 = vld [vmem:[#allocation27_spill] sm:$0xff] }
 0xab6   : > { %v4967_v26 = vmul.f32 %v4893_v61, %v9636_v14  ;;  %v4968_v8 = vmul.f32 %v4892_v19, %v9637_v36  ;;  %v9190_v13 = vpop.permute.xlu0 %4739  ;;  %v4961_v55 = vmul.f32 %v4867_v2, %v9638_v49  ;;  %v9649_v61 = vld [vmem:[#allocation64_spill] sm:$0xff]  ;;  %v9651_v14 = vld [vmem:[#allocation59_spill] sm:$0xff]  ;;  %v9652_v36 = vld [vmem:[#allocation61_spill] sm:$0xff]  ;;  %v4935_v34 = vmul.f32 %v9655_v33, %v9654_v60 }
 0xab7   : > { %5101 = vmatpush1.bf16.msra.mxu0 %v9639_v5  ;;  %v4922_v16 = vmul.f32 %v4771_v40, %v9649_v61  ;;  %v9666_v11 = vld [vmem:[#allocation31_spill] sm:$0xff]  ;;  %v9669_v61 = vld [vmem:[#allocation65_spill] sm:$0xff] }
 0xab8   : > { %v5007_v3 = vpack.c.bf16 %v4967_v26, %v4967_v26  ;;  %v5008_v51 = vpack.c.bf16 %v4968_v8, %v4968_v8  ;;  %5526 = vmatprep.subr.msk.bf16.mxu0 %vm4474_vm2, %v5010_v38  ;;  %v4862_v52 = vpop.permute.xlu1 %4861  ;;  %v5001_v38 = vpack.c.bf16 %v4961_v55, %v4953_v57  ;;  %v9653_v8 = vld [vmem:[#allocation68_spill] sm:$0xff] }
 0xab9   : > { %v4868_v41 = vsel %vm3445_vm12, %v4862_v52, %v9031_v47  ;;  %v4869_v22 = vsel %vm3445_vm12, %v9089_v44, %v4862_v52  ;;  %v4930_v47 = vmul.f32 %v4795_v56, %v9646_v42  ;;  %v4937_v49 = vmul.f32 %v9653_v8, %v9652_v36  ;;  %v9656_v56 = vld [vmem:[#allocation69_spill] sm:$0xff]  ;;  %v9657_v57 = vld [vmem:[#allocation48_spill] sm:$0xff] }
 0xaba   : > { %v4959_v59 = vmul.f32 %v4869_v22, %v9644_v12  ;;  %v4960_v21 = vmul.f32 %v4868_v41, %v9645_v9  ;;  %v4814_v53 = vpop.permute.xlu0 %4813  ;;  %5523 = vmatmul.mubr.msk.bf16.vlgmr.msra.gmra.mxu0 %vm4470_vm4, %v9113_v28  ;;  %5524 = vmatprep.subr.msk.bf16.mxu1 %vm4474_vm2, %v5008_v51  ;;  %v5034_v62 = vsel %vm4474_vm2, %v5007_v3, 0  ;;  %v4774_v15 = vsel %vm3251_vm14, %v9656_v56, %v9139_v24  ;;  %v9662_v41 = vld [vmem:[#allocation49_spill] sm:$0xff] }
 0xabb   : > { %v4820_v44 = vsel %vm1376_vm9, %v4814_v53, %v9641_v45  ;;  %v4821_v1 = vsel %vm1376_vm9, %v9110_v39, %v4814_v53  ;;  %5134 = vmatpush1.bf16.msra.mxu1 %v5034_v62  ;;  %5175 = vmatpush1.bf16.msra.mxu0 %v5040_v58  ;;  %v4798_v39 = vsel %vm1351_vm3, %v9650_v46, %v9146_v18 }
 0xabc   : > { %v4999_v2 = vpack.c.bf16 %v4959_v59, %v4951_v17  ;;  %v4944_v27 = vmul.f32 %v4820_v44, %v9648_v0  ;;  %5176 = vmatprep.subr.bf16.mxu0 %v5002_v31  ;;  %v4720_v6 = vpop.permute.xlu1 %4719  ;;  %v5000_v19 = vpack.c.bf16 %v4960_v21, %v4952_v54  ;;  %v4943_v26 = vmul.f32 %v4821_v1, %v9651_v14  ;;  %v9663_v54 = vld [vmem:[#allocation26_spill] sm:$0xff] }
 0xabd   : > { %5200 = vmatprep.mubr.bf16.mxu0 %v9578_v43  ;;  %v4986_v43 = vpack.c.bf16 %v4930_v47, %v4922_v16  ;;  %v4993_v58 = vpack.c.bf16 %v4945_v30, %v4937_v49  ;;  %v4927_v3 = vmul.f32 %v4798_v39, %v9657_v57  ;;  %v4919_v12 = vmul.f32 %v4774_v15, %v9663_v54  ;;  %v9664_v59 = vld [vmem:[#allocation38_spill] sm:$0xff]  ;;  %v9665_v47 = vld [vmem:[#allocation25_spill] sm:$0xff]  ;;  %v9671_v39 = vld [vmem:[#allocation52_spill] sm:$0xff] }
 0xabe   : > { %v4766_v31 = vpop.permute.xlu0 %4765  ;;  %5135 = vmatprep.subr.bf16.mxu1 %v5000_v19  ;;  %v4992_v5 = vpack.c.bf16 %v4944_v27, %v4936_v63  ;;  %v9658_v63 = vld [vmem:[#allocation40_spill] sm:$0xff]  ;;  %v4991_v52 = vpack.c.bf16 %v4943_v26, %v4935_v34  ;;  %v4723_v9 = vsel %vm3153_vm0, %v4720_v6, %v9023_v50  ;;  %v9668_v27 = vld [vmem:[#allocation50_spill] sm:$0xff]  ;;  %v9672_v26 = vld [vmem:[#allocation51_spill] sm:$0xff] }
 0xabf   : > { %v4772_v40 = vsel %vm3251_vm14, %v4766_v31, %v9005_v10  ;;  %v4773_v55 = vsel %vm3251_vm14, %v9139_v24, %v4766_v31  ;;  %5136 = vmatpush1.bf16.msra.mxu1 %v4999_v2  ;;  %5177 = vmatpush1.bf16.msra.mxu0 %v5001_v38  ;;  %v4750_v51 = vsel %vm3202_vm15, %v9658_v63, %v9190_v13  ;;  %v9667_v2 = vld [vmem:[#allocation66_spill] sm:$0xff] }
 0xac0   : > { %5178 = vmatprep.subr.bf16.mxu0 %v4994_v32  ;;  %v4790_v10 = vpop.permute.xlu1 %4789  ;;  %5137 = vmatprep.subr.bf16.mxu1 %v4992_v5  ;;  %v4920_v29 = vmul.f32 %v4773_v55, %v9659_v7  ;;  %v4921_v23 = vmul.f32 %v4772_v40, %v9660_v48  ;;  %v9661_v32 = vld [vmem:[#allocation28_spill] sm:$0xff]  ;;  %v4983_v42 = vpack.c.bf16 %v4927_v3, %v4919_v12 }
 0xac1   : > { %v4796_v45 = vsel %vm1351_vm3, %v4790_v10, %v9040_v35  ;;  %v4797_v24 = vsel %vm1351_vm3, %v9146_v18, %v4790_v10  ;;  %v4726_v35 = vsel %vm3153_vm0, %v9664_v59, %v9161_v25  ;;  %v4911_v44 = vmul.f32 %v4750_v51, %v9665_v47 }
 0xac2   : > { %v4928_v17 = vmul.f32 %v4797_v24, %v9661_v32  ;;  %v4929_v22 = vmul.f32 %v4796_v45, %v9662_v41  ;;  %v4718_v20 = vpop.permute.xlu0 %4717  ;;  %v4903_v30 = vmul.f32 %v4726_v35, %v9666_v11  ;;  %v4906_v16 = vmul.f32 %v4723_v9, %v9669_v61 }
 0xac3   : > { %v4725_v18 = vsel %vm3153_vm0, %v9161_v25, %v4718_v20  ;;  %5138 = vmatpush1.bf16.msra.mxu1 %v4991_v52  ;;  %5179 = vmatpush1.bf16.msra.mxu0 %v4993_v58  ;;  %v4724_v1 = vsel %vm3153_vm0, %v4718_v20, %v4720_v6 }
 0xac4   : > { %v4985_v21 = vpack.c.bf16 %v4929_v22, %v4921_v23  ;;  %5180 = vmatprep.subr.bf16.mxu0 %v4986_v43  ;;  %v4742_v53 = vpop.permute.xlu1 %4741  ;;  %v4984_v62 = vpack.c.bf16 %v4928_v17, %v4920_v29  ;;  %v4904_v0 = vmul.f32 %v4725_v18, %v9667_v2  ;;  %v4975_v49 = vpack.c.bf16 %v4911_v44, %v4903_v30 }
 0xac5   : > { %v4749_v25 = vsel %vm3202_vm15, %v9190_v13, %v4742_v53  ;;  %v9670_v13 = vld [vmem:[#allocation35_spill] sm:$0xff] }
 0xac6   : > { %v4912_v50 = vmul.f32 %v4749_v25, %v9668_v27  ;;  %v4744_v19 = vpop.permute.xlu0 %4743  ;;  %5139 = vmatprep.subr.bf16.mxu1 %v4984_v62  ;;  %v4905_v46 = vmul.f32 %v4724_v1, %v9670_v13 }
 0xac7   : > { %v4747_v38 = vsel %vm3202_vm15, %v4744_v19, %v9075_v4  ;;  %v4748_v6 = vsel %vm3202_vm15, %v4742_v53, %v4744_v19  ;;  %5140 = vmatpush1.bf16.msra.mxu1 %v4983_v42  ;;  %5181 = vmatpush1.bf16.msra.mxu0 %v4985_v21 }
 0xac8   : > { %v4913_v14 = vmul.f32 %v4748_v6, %v9671_v39  ;;  %v4914_v36 = vmul.f32 %v4747_v38, %v9672_v26  ;;  %v4976_v8 = vpack.c.bf16 %v4912_v50, %v4904_v0 }
 0xaca   : > { %v4977_v60 = vpack.c.bf16 %v4913_v14, %v4905_v46  ;;  %5141 = vmatprep.subr.bf16.mxu1 %v4976_v8  ;;  %v4978_v33 = vpack.c.bf16 %v4914_v36, %v4906_v16 }
 0xacb   : > { %5142 = vmatpush1.bf16.msra.mxu1 %v4975_v49 }
 0xacc   : > { %5182 = vmatprep.subr.bf16.mxu0 %v4978_v33 }
 0xacd   : > { %5183 = vmatpush1.bf16.msra.mxu0 %v4977_v60 }
 0xace   : > { %5525 = vmatmul.mubr.msk.bf16.vlgmr.msra.gmra.mxu1 %vm4470_vm4, %v9113_v28 }
 0xad0   : > { %5527 = vmatmul.mubr.msk.bf16.vlgmr.msra.gmra.mxu0 %vm4470_vm4, %v9113_v28 }
 0xad1   : > { %v5016_v37 = vpop.permute.xlu1 %5015 }
 0xb6b   : > { %v5079_v4 = vpop.f32.mrf.mxu1 }
 0xb6c   : > { %v5080_v34 = vadd.f32 %v5079_v4, %v5016_v37 }
 0xb6d   : > { %v5081_v31 = vpop.f32.mrf.mxu1 }
 0xb6e   : > { %5660 = vtanh.f32 %v5080_v34  ;;  %v5082_v5 = vadd.f32 %v5081_v31, %v5016_v37 }
 0xb6f   : > { %v5083_v40 = vpop.f32.mrf.mxu1 }
 0xb70   : > { %5662 = vtanh.f32 %v5082_v5 }
 0xb71   : > { %v5084_v55 = vpop.f32.mrf.mxu1 }
 0xb7a   : > { %v5120_v43 = vpop.f32.mrf.mxu0 }
 0xb7b   : > { %v5661_v58 = vpop.eup %5660  ;;  %v5121_v56 = vadd.f32 %v5120_v43, %v5016_v37 }
 0xb7c   : > { %5217 = vst [vmem:[%s9313_s26] sm:$0xff] %v5661_v58  ;;  %v5122_v28 = vpop.f32.mrf.mxu0 }
 0xb7d   : > { %v5663_v15 = vpop.eup %5662  ;;  %5664 = vtanh.f32 %v5121_v56  ;;  %v5123_v57 = vadd.f32 %v5122_v28, %v5016_v37 }
 0xb7e   : > { %5218 = vst [vmem:[%s9313_s26 + $0x8] sm:$0xff] %v5663_v15  ;;  %v5124_v3 = vpop.f32.mrf.mxu0 }
 0xb7f   : > { %5666 = vtanh.f32 %v5123_v57 }
 0xb80   : > { %v5125_v10 = vpop.f32.mrf.mxu0 }
 0xb8a   : > { %v5665_v63 = vpop.eup %5664 }
 0xb8b   : > { %5219 = vst [vmem:[%s9313_s26 + $0x10] sm:$0xff] %v5665_v63 }
 0xb8c   : > { %v5667_v51 = vpop.eup %5666 }
 0xb8d   : > { %5220 = vst [vmem:[%s9313_s26 + $0x18] sm:$0xff] %v5667_v51 }
 0xb8e   : > { %v5161_v52 = vpop.f32.mrf.mxu1 }
 0xb8f   : > { %v5162_v45 = vadd.f32 %v5161_v52, %v5016_v37 }
 0xb90   : > { %v5163_v24 = vpop.f32.mrf.mxu1  ;;  %v5202_v7 = vpop.f32.mrf.mxu0 }
 0xb91   : > { %5668 = vtanh.f32 %v5162_v45  ;;  %v5164_v29 = vadd.f32 %v5163_v24, %v5016_v37  ;;  %v5203_v48 = vadd.f32 %v5202_v7, %v5016_v37 }
 0xb92   : > { %v5204_v23 = vpop.f32.mrf.mxu0  ;;  %v5165_v32 = vpop.f32.mrf.mxu1 }
 0xb93   : > { %5670 = vtanh.f32 %v5164_v29  ;;  %v5205_v17 = vadd.f32 %v5204_v23, %v5016_v37 }
 0xb94   : > { %5672 = vtanh.f32 %v5203_v48  ;;  %v5206_v41 = vpop.f32.mrf.mxu0  ;;  %v5166_v22 = vpop.f32.mrf.mxu1 }
 0xb95   : > { %5674 = vtanh.f32 %v5205_v17 }
 0xb96   : > { %v5207_v20 = vpop.f32.mrf.mxu0 }
 0xb9e   : > { %v5669_v54 = vpop.eup %5668 }
 0xb9f   : > { %5221 = vst [vmem:[%s9313_s26 + $0x20] sm:$0xff] %v5669_v54 }
 0xba0   : > { %v5671_v12 = vpop.eup %5670 }
 0xba1   : > { %v5673_v59 = vpop.eup %5672  ;;  %5222 = vst [vmem:[%s9313_s26 + $0x28] sm:$0xff] %v5671_v12 }
 0xba2   : > { %v5675_v35 = vpop.eup %5674  ;;  %5223 = vst [vmem:[%s9313_s26 + $0x30] sm:$0xff] %v5673_v59 }
 0xba3   : > { %5224 = vst [vmem:[%s9313_s26 + $0x38] sm:$0xff] %v5675_v35 }
 0xba4 PF: > { %s75_s22 = sadd.s32 1, %s5786_s22  }
 0xba5   : > { %p72_p3 = scmp.ge.s32.totalorder %s75_s22, 4  }
 0xba7   :  { %74 = sbr.rel (!%p72_p3) target bundleno = 58 (0x3a), region = 218 }
 0xbac   :  { %5246 = vsyncpa [#allocation3], 1 }
 0xbad   :  { %5248 = vsyncpa [#allocation3 + $0x1], 1 }
 0xbae   :  { %5249 = vsyncpa [#allocation5], 1 }

</bundles_post_ra>
